<compile_context>
chip_gen: v7x
topology: tpu7x:2x2x1
jax: 0.10.0
libtpu: 0.0.40
codegen_flags: <defaults>
</compile_context>

<pallas_src>
import numpy as np
import jax
import jax.numpy as jnp
from jax.experimental import pallas as pl
from jax.experimental.pallas import tpu as pltpu


def make_seq2seq_kernel(num_layers, seq_len, output_len, Bp, Ip, H):
    """Kernel closed over static problem sizes.

    Ref layout (inputs, then output, then scratch), all VMEM:
      src                    : (T*Bp, Ip) bf16   time-major, lane-padded source
      per encoder layer (x3) : Wih^T (K_l, 4H) bf16, Whh^T (H, 4H) bf16,
                               bias (1, 4H) f32   (bih + bhh pre-summed)
      per decoder layer (x3) : same as encoder
      fc_wt (H, Ip) bf16, fc_b (1, Ip) f32
      out                    : (output_len*Bp, Ip) f32
      xbuf (scratch)         : (T*Bp, H) f32     inter-layer encoder activations
    """
    bf16 = jnp.bfloat16
    f32 = jnp.float32

    def kernel(*refs):
        src_ref = refs[0]
        idx = 1
        enc = []
        for _ in range(num_layers):
            enc.append((refs[idx], refs[idx + 1], refs[idx + 2]))
            idx += 3
        dec = []
        for _ in range(num_layers):
            dec.append((refs[idx], refs[idx + 1], refs[idx + 2]))
            idx += 3
        fc_wt_ref = refs[idx]
        fc_b_ref = refs[idx + 1]
        out_ref = refs[idx + 2]
        xbuf_ref = refs[idx + 3]

        def gate_update(gates, c):
            # gates: (Bp, 4H) f32.  With H=32, 4H == 128: each transcendental
            # pass below covers all four gates in one full-lane vreg set.
            sig = 0.5 * jnp.tanh(0.5 * gates) + 0.5   # sigmoid via single EUP op
            th = jnp.tanh(gates)
            i_g = sig[:, 0 * H:1 * H]
            f_g = sig[:, 1 * H:2 * H]
            g_g = th[:, 2 * H:3 * H]
            o_g = sig[:, 3 * H:4 * H]
            c_new = f_g * c + i_g * g_g
            h_new = o_g * jnp.tanh(c_new)
            return h_new, c_new

        # ---------------- Encoder: layer-outer / time-inner -------------------
        h_fin, c_fin = [], []
        for l in range(num_layers):
            wih = enc[l][0][...]                        # (K_l, 4H) bf16
            whh = enc[l][1][...]                        # (H, 4H)   bf16
            b = enc[l][2][...]                          # (1, 4H)   f32
            if l == 0:
                x_all = src_ref[...]                    # (T*Bp, Ip) bf16
            else:
                x_all = xbuf_ref[...].astype(bf16)      # (T*Bp, H)  bf16
            # Hoisted input projection: one batched matmul over all timesteps.
            xp = jnp.dot(x_all, wih, preferred_element_type=f32) + b
            h_b = jnp.zeros((Bp, H), bf16)
            c = jnp.zeros((Bp, H), f32)
            for t in range(seq_len):
                gates = xp[t * Bp:(t + 1) * Bp, :] + jnp.dot(
                    h_b, whh, preferred_element_type=f32)
                h, c = gate_update(gates, c)
                h_b = h.astype(bf16)
                if l + 1 < num_layers:
                    xbuf_ref[t * Bp:(t + 1) * Bp, :] = h   # feeds next layer
            h_fin.append(h_b)
            c_fin.append(c)

        # ---------------- Decoder: autoregressive -----------------------------
        dec_w = [(dec[l][0][...], dec[l][1][...], dec[l][2][...])
                 for l in range(num_layers)]
        fc_wt = fc_wt_ref[...]                          # (H, Ip) bf16
        fc_b = fc_b_ref[...]                            # (1, Ip) f32
        h_b = list(h_fin)
        c = list(c_fin)
        x_b = src_ref[(seq_len - 1) * Bp:seq_len * Bp, :]   # seed = last src step
        for step in range(output_len):
            for l in range(num_layers):
                wih, whh, b = dec_w[l]
                gates = (jnp.dot(x_b, wih, preferred_element_type=f32)
                         + jnp.dot(h_b[l], whh, preferred_element_type=f32)
                         + b)
                h, c[l] = gate_update(gates, c[l])
                h_b[l] = h.astype(bf16)
                x_b = h_b[l]
            pred = jnp.dot(x_b, fc_wt, preferred_element_type=f32) + fc_b
            out_ref[step * Bp:(step + 1) * Bp, :] = pred    # per-step writeback
            x_b = pred.astype(bf16)                         # feedback

    return kernel


def seq2seq_forward(src, enc_params, dec_params, fc_w_t, fc_b, output_len):
    B, T, I = src.shape
    H = fc_w_t.shape[0]
    L = len(enc_params)
    bf16 = jnp.bfloat16
    Bp = ((B + 7) // 8) * 8        # batch padded to fp32 sublane count
    Ip = ((I + 7) // 8) * 8        # feature dim padded only to 8 lanes

    # ---- wrapper-side layout plumbing (pure XLA, outside the kernel) --------
    # Source: (B,T,I) -> pad batch+feature -> time-major -> (T*Bp, Ip) bf16.
    src_p = jnp.pad(src, ((0, Bp - B), (0, 0), (0, Ip - I)))
    src_tb = jnp.transpose(src_p, (1, 0, 2)).reshape(T * Bp, Ip).astype(bf16)

    def prep_layer(p, k_pad):
        wih_t, whh_t, bih, bhh = p
        wih = jnp.pad(wih_t, ((0, k_pad - wih_t.shape[0]), (0, 0))).astype(bf16)
        whh = whh_t.astype(bf16)
        b = (bih + bhh).astype(jnp.float32)           # pre-summed bias, f32
        return [wih, whh, b]

    flat = [src_tb]
    for l, p in enumerate(enc_params):
        flat.extend(prep_layer(p, Ip if l == 0 else H))
    for l, p in enumerate(dec_params):
        flat.extend(prep_layer(p, Ip if l == 0 else H))
    fc_wt_p = jnp.pad(fc_w_t, ((0, 0), (0, Ip - I))).astype(bf16)       # (H, Ip)
    fc_b_p = jnp.pad(fc_b, ((0, 0), (0, Ip - I))).astype(jnp.float32)   # (1, Ip)
    flat.extend([fc_wt_p, fc_b_p])

    kernel = make_seq2seq_kernel(L, T, output_len, Bp, Ip, H)

    out = pl.pallas_call(
        kernel,
        out_shape=jax.ShapeDtypeStruct((output_len * Bp, Ip), jnp.float32),
        in_specs=[pl.BlockSpec(memory_space=pltpu.MemorySpace.VMEM)] * len(flat),
        out_specs=pl.BlockSpec(memory_space=pltpu.MemorySpace.VMEM),
        scratch_shapes=[pltpu.VMEM((T * Bp, H), jnp.float32)],
    )(*flat)

    # (output_len*Bp, Ip) -> (B, output_len, I)  (PyTorch batch-first layout)
    out = out.reshape(output_len, Bp, Ip)[:, :B, :I]
    return jnp.transpose(out, (1, 0, 2))


# ---------------- parameter initialization (deterministic, PyTorch-like) ----
def init_lstm_params(key, input_size, hidden_size, num_layers):
    params = []
    k = 1.0 / np.sqrt(hidden_size)
    for l in range(num_layers):
        in_l = input_size if l == 0 else hidden_size
        key, k1, k2, k3, k4 = jax.random.split(key, 5)
        wih_t = jax.random.uniform(k1, (in_l, 4 * hidden_size), jnp.float32, -k, k)
        whh_t = jax.random.uniform(k2, (hidden_size, 4 * hidden_size), jnp.float32, -k, k)
        bih = jax.random.uniform(k3, (1, 4 * hidden_size), jnp.float32, -k, k)
        bhh = jax.random.uniform(k4, (1, 4 * hidden_size), jnp.float32, -k, k)
        params.append((wih_t, whh_t, bih, bhh))
    return params, key


# ---------------- pure-JAX f32 reference (same math, no Pallas, no padding) --
def reference_forward(src, enc_params, dec_params, fc_w_t, fc_b, output_len):
    B, T, I = src.shape
    H = fc_w_t.shape[0]
    L = len(enc_params)

    def cell(x, h, c, p):
        wih_t, whh_t, bih, bhh = p
        gates = x @ wih_t + h @ whh_t + bih + bhh
        i_g = jax.nn.sigmoid(gates[:, :H])
        f_g = jax.nn.sigmoid(gates[:, H:2 * H])
        g_g = jnp.tanh(gates[:, 2 * H:3 * H])
        o_g = jax.nn.sigmoid(gates[:, 3 * H:])
        c = f_g * c + i_g * g_g
        return o_g * jnp.tanh(c), c

    h = [jnp.zeros((B, H), jnp.float32) for _ in range(L)]
    c = [jnp.zeros((B, H), jnp.float32) for _ in range(L)]
    for t in range(T):
        x = src[:, t, :]
        for l in range(L):
            h[l], c[l] = cell(x, h[l], c[l], enc_params[l])
            x = h[l]
    outs = []
    dec_in = src[:, -1, :]
    for _ in range(output_len):
        x = dec_in
        for l in range(L):
            h[l], c[l] = cell(x, h[l], c[l], dec_params[l])
            x = h[l]
        pred = x @ fc_w_t + fc_b
        outs.append(pred[:, None, :])
        dec_in = pred
    return jnp.concatenate(outs, axis=1)


if __name__ == "__main__":
    # Small, module-consistent shapes.
    B, T = 2, 8
    input_size, hidden_size, num_layers, output_len = 4, 32, 2, 5

    key = jax.random.PRNGKey(0)
    key, src_key = jax.random.split(key)
    source = jax.random.normal(src_key, (B, T, input_size), jnp.float32)

    enc_params, key = init_lstm_params(key, input_size, hidden_size, num_layers)
    dec_params, key = init_lstm_params(key, input_size, hidden_size, num_layers)
    key, kf1, kf2 = jax.random.split(key, 3)
    kfc = 1.0 / np.sqrt(hidden_size)
    fc_w_t = jax.random.uniform(kf1, (hidden_size, input_size), jnp.float32, -kfc, kfc)
    fc_b = jax.random.uniform(kf2, (1, input_size), jnp.float32, -kfc, kfc)

    out = seq2seq_forward(source, enc_params, dec_params, fc_w_t, fc_b, output_len)
    out = jax.block_until_ready(out)

    ref = reference_forward(source, enc_params, dec_params, fc_w_t, fc_b, output_len)
    # bf16 weights / bf16 matmul operands in the kernel (f32 accumulation, f32
    # cell state) -> relaxed tolerance vs. the pure-f32 reference.
    np.testing.assert_allclose(np.asarray(out), np.asarray(ref), rtol=5e-2, atol=5e-2)

    assert out.shape == (B, output_len, input_size)
    print("KERNEL_OK")
</pallas_src>

<mosaic_0001>
module attributes {stable_mosaic.version = 11 : i64} {
  func.func @kernel(%arg0: memref<64x8xbf16, #tpu.memory_space<vmem>>, %arg1: memref<8x128xbf16, #tpu.memory_space<vmem>>, %arg2: memref<32x128xbf16, #tpu.memory_space<vmem>>, %arg3: memref<1x128xf32, #tpu.memory_space<vmem>>, %arg4: memref<32x128xbf16, #tpu.memory_space<vmem>>, %arg5: memref<32x128xbf16, #tpu.memory_space<vmem>>, %arg6: memref<1x128xf32, #tpu.memory_space<vmem>>, %arg7: memref<8x128xbf16, #tpu.memory_space<vmem>>, %arg8: memref<32x128xbf16, #tpu.memory_space<vmem>>, %arg9: memref<1x128xf32, #tpu.memory_space<vmem>>, %arg10: memref<32x128xbf16, #tpu.memory_space<vmem>>, %arg11: memref<32x128xbf16, #tpu.memory_space<vmem>>, %arg12: memref<1x128xf32, #tpu.memory_space<vmem>>, %arg13: memref<32x8xbf16, #tpu.memory_space<vmem>>, %arg14: memref<1x8xf32, #tpu.memory_space<vmem>>, %arg15: memref<40x8xf32, #tpu.memory_space<vmem>>, %arg16: memref<64x32xf32, #tpu.memory_space<vmem>>) attributes {dimension_semantics = [], scalar_prefetch = 0 : i64, scratch_operands = 1 : i64, tpu.core_type = #tpu.core_type<tc>} {
    %c0 = arith.constant 0 : index
    %c0_0 = arith.constant 0 : index
    %0 = vector.load %arg1[%c0, %c0_0] : memref<8x128xbf16, #tpu.memory_space<vmem>>, vector<8x128xbf16>
    %c0_1 = arith.constant 0 : index
    %c0_2 = arith.constant 0 : index
    %1 = vector.load %arg2[%c0_1, %c0_2] : memref<32x128xbf16, #tpu.memory_space<vmem>>, vector<32x128xbf16>
    %c0_3 = arith.constant 0 : index
    %c0_4 = arith.constant 0 : index
    %2 = vector.load %arg3[%c0_3, %c0_4] : memref<1x128xf32, #tpu.memory_space<vmem>>, vector<1x128xf32>
    %c0_5 = arith.constant 0 : index
    %c0_6 = arith.constant 0 : index
    %3 = vector.load %arg0[%c0_5, %c0_6] : memref<64x8xbf16, #tpu.memory_space<vmem>>, vector<64x8xbf16>
    %cst = arith.constant dense<0.000000e+00> : vector<64x128xf32>
    %4 = tpu.matmul %3, %0, %cst {dimension_numbers = #tpu.dot_dimension_numbers<[1], [0], [0], [1], [0, 0, 1, 1], [], []>} : vector<64x8xbf16>, vector<8x128xbf16>, vector<64x128xf32> -> vector<64x128xf32>
    %5 = vector.broadcast %2 : vector<1x128xf32> to vector<64x128xf32>
    %6 = arith.addf %4, %5 : vector<64x128xf32>
    %cst_7 = arith.constant 0.000000e+00 : bf16
    %7 = vector.broadcast %cst_7 : bf16 to vector<8x32xbf16>
    %cst_8 = arith.constant 0.000000e+00 : f32
    %8 = vector.broadcast %cst_8 : f32 to vector<8x32xf32>
    %9 = vector.extract_strided_slice %6 {offsets = [0, 0], sizes = [8, 128], strides = [1, 1]} : vector<64x128xf32> to vector<8x128xf32>
    %cst_9 = arith.constant dense<0.000000e+00> : vector<8x128xf32>
    %10 = tpu.matmul %7, %1, %cst_9 {dimension_numbers = #tpu.dot_dimension_numbers<[1], [0], [0], [1], [0, 0, 1, 1], [], []>} : vector<8x32xbf16>, vector<32x128xbf16>, vector<8x128xf32> -> vector<8x128xf32>
    %11 = arith.addf %9, %10 : vector<8x128xf32>
    %cst_10 = arith.constant 5.000000e-01 : f32
    %12 = vector.broadcast %cst_10 : f32 to vector<8x128xf32>
    %13 = arith.mulf %12, %11 : vector<8x128xf32>
    %14 = math.tanh %13 : vector<8x128xf32>
    %cst_11 = arith.constant 5.000000e-01 : f32
    %15 = vector.broadcast %cst_11 : f32 to vector<8x128xf32>
    %16 = arith.mulf %15, %14 : vector<8x128xf32>
    %cst_12 = arith.constant 5.000000e-01 : f32
    %17 = vector.broadcast %cst_12 : f32 to vector<8x128xf32>
    %18 = arith.addf %16, %17 : vector<8x128xf32>
    %19 = math.tanh %11 : vector<8x128xf32>
    %20 = vector.extract_strided_slice %18 {offsets = [0, 0], sizes = [8, 32], strides = [1, 1]} : vector<8x128xf32> to vector<8x32xf32>
    %21 = vector.extract_strided_slice %18 {offsets = [0, 32], sizes = [8, 32], strides = [1, 1]} : vector<8x128xf32> to vector<8x32xf32>
    %22 = vector.extract_strided_slice %19 {offsets = [0, 64], sizes = [8, 32], strides = [1, 1]} : vector<8x128xf32> to vector<8x32xf32>
    %23 = vector.extract_strided_slice %18 {offsets = [0, 96], sizes = [8, 32], strides = [1, 1]} : vector<8x128xf32> to vector<8x32xf32>
    %24 = arith.mulf %21, %8 : vector<8x32xf32>
    %25 = arith.mulf %20, %22 : vector<8x32xf32>
    %26 = arith.addf %24, %25 : vector<8x32xf32>
    %27 = math.tanh %26 : vector<8x32xf32>
    %28 = arith.mulf %23, %27 : vector<8x32xf32>
    %29 = arith.truncf %28 : vector<8x32xf32> to vector<8x32xbf16>
    %c0_13 = arith.constant 0 : index
    %c0_14 = arith.constant 0 : index
    %30 = vector.load %arg16[%c0_13, %c0_14] : memref<64x32xf32, #tpu.memory_space<vmem>>, vector<8x32xf32>
    tpu.vector_store %arg16[%c0_13, %c0_14], %28 {strides = array<i32>} : memref<64x32xf32, #tpu.memory_space<vmem>>, vector<8x32xf32>,
    %31 = vector.extract_strided_slice %6 {offsets = [8, 0], sizes = [8, 128], strides = [1, 1]} : vector<64x128xf32> to vector<8x128xf32>
    %cst_15 = arith.constant dense<0.000000e+00> : vector<8x128xf32>
    %32 = tpu.matmul %29, %1, %cst_15 {dimension_numbers = #tpu.dot_dimension_numbers<[1], [0], [0], [1], [0, 0, 1, 1], [], []>} : vector<8x32xbf16>, vector<32x128xbf16>, vector<8x128xf32> -> vector<8x128xf32>
    %33 = arith.addf %31, %32 : vector<8x128xf32>
    %cst_16 = arith.constant 5.000000e-01 : f32
    %34 = vector.broadcast %cst_16 : f32 to vector<8x128xf32>
    %35 = arith.mulf %34, %33 : vector<8x128xf32>
    %36 = math.tanh %35 : vector<8x128xf32>
    %cst_17 = arith.constant 5.000000e-01 : f32
    %37 = vector.broadcast %cst_17 : f32 to vector<8x128xf32>
    %38 = arith.mulf %37, %36 : vector<8x128xf32>
    %cst_18 = arith.constant 5.000000e-01 : f32
    %39 = vector.broadcast %cst_18 : f32 to vector<8x128xf32>
    %40 = arith.addf %38, %39 : vector<8x128xf32>
    %41 = math.tanh %33 : vector<8x128xf32>
    %42 = vector.extract_strided_slice %40 {offsets = [0, 0], sizes = [8, 32], strides = [1, 1]} : vector<8x128xf32> to vector<8x32xf32>
    %43 = vector.extract_strided_slice %40 {offsets = [0, 32], sizes = [8, 32], strides = [1, 1]} : vector<8x128xf32> to vector<8x32xf32>
    %44 = vector.extract_strided_slice %41 {offsets = [0, 64], sizes = [8, 32], strides = [1, 1]} : vector<8x128xf32> to vector<8x32xf32>
    %45 = vector.extract_strided_slice %40 {offsets = [0, 96], sizes = [8, 32], strides = [1, 1]} : vector<8x128xf32> to vector<8x32xf32>
    %46 = arith.mulf %43, %26 : vector<8x32xf32>
    %47 = arith.mulf %42, %44 : vector<8x32xf32>
    %48 = arith.addf %46, %47 : vector<8x32xf32>
    %49 = math.tanh %48 : vector<8x32xf32>
    %50 = arith.mulf %45, %49 : vector<8x32xf32>
    %51 = arith.truncf %50 : vector<8x32xf32> to vector<8x32xbf16>
    %c8 = arith.constant 8 : index
    %c0_19 = arith.constant 0 : index
    %52 = vector.load %arg16[%c8, %c0_19] : memref<64x32xf32, #tpu.memory_space<vmem>>, vector<8x32xf32>
    tpu.vector_store %arg16[%c8, %c0_19], %50 {strides = array<i32>} : memref<64x32xf32, #tpu.memory_space<vmem>>, vector<8x32xf32>,
    %53 = vector.extract_strided_slice %6 {offsets = [16, 0], sizes = [8, 128], strides = [1, 1]} : vector<64x128xf32> to vector<8x128xf32>
    %cst_20 = arith.constant dense<0.000000e+00> : vector<8x128xf32>
    %54 = tpu.matmul %51, %1, %cst_20 {dimension_numbers = #tpu.dot_dimension_numbers<[1], [0], [0], [1], [0, 0, 1, 1], [], []>} : vector<8x32xbf16>, vector<32x128xbf16>, vector<8x128xf32> -> vector<8x128xf32>
    %55 = arith.addf %53, %54 : vector<8x128xf32>
    %cst_21 = arith.constant 5.000000e-01 : f32
    %56 = vector.broadcast %cst_21 : f32 to vector<8x128xf32>
    %57 = arith.mulf %56, %55 : vector<8x128xf32>
    %58 = math.tanh %57 : vector<8x128xf32>
    %cst_22 = arith.constant 5.000000e-01 : f32
    %59 = vector.broadcast %cst_22 : f32 to vector<8x128xf32>
    %60 = arith.mulf %59, %58 : vector<8x128xf32>
    %cst_23 = arith.constant 5.000000e-01 : f32
    %61 = vector.broadcast %cst_23 : f32 to vector<8x128xf32>
    %62 = arith.addf %60, %61 : vector<8x128xf32>
    %63 = math.tanh %55 : vector<8x128xf32>
    %64 = vector.extract_strided_slice %62 {offsets = [0, 0], sizes = [8, 32], strides = [1, 1]} : vector<8x128xf32> to vector<8x32xf32>
    %65 = vector.extract_strided_slice %62 {offsets = [0, 32], sizes = [8, 32], strides = [1, 1]} : vector<8x128xf32> to vector<8x32xf32>
    %66 = vector.extract_strided_slice %63 {offsets = [0, 64], sizes = [8, 32], strides = [1, 1]} : vector<8x128xf32> to vector<8x32xf32>
    %67 = vector.extract_strided_slice %62 {offsets = [0, 96], sizes = [8, 32], strides = [1, 1]} : vector<8x128xf32> to vector<8x32xf32>
    %68 = arith.mulf %65, %48 : vector<8x32xf32>
    %69 = arith.mulf %64, %66 : vector<8x32xf32>
    %70 = arith.addf %68, %69 : vector<8x32xf32>
    %71 = math.tanh %70 : vector<8x32xf32>
    %72 = arith.mulf %67, %71 : vector<8x32xf32>
    %73 = arith.truncf %72 : vector<8x32xf32> to vector<8x32xbf16>
    %c16 = arith.constant 16 : index
    %c0_24 = arith.constant 0 : index
    %74 = vector.load %arg16[%c16, %c0_24] : memref<64x32xf32, #tpu.memory_space<vmem>>, vector<8x32xf32>
    tpu.vector_store %arg16[%c16, %c0_24], %72 {strides = array<i32>} : memref<64x32xf32, #tpu.memory_space<vmem>>, vector<8x32xf32>,
    %75 = vector.extract_strided_slice %6 {offsets = [24, 0], sizes = [8, 128], strides = [1, 1]} : vector<64x128xf32> to vector<8x128xf32>
    %cst_25 = arith.constant dense<0.000000e+00> : vector<8x128xf32>
    %76 = tpu.matmul %73, %1, %cst_25 {dimension_numbers = #tpu.dot_dimension_numbers<[1], [0], [0], [1], [0, 0, 1, 1], [], []>} : vector<8x32xbf16>, vector<32x128xbf16>, vector<8x128xf32> -> vector<8x128xf32>
    %77 = arith.addf %75, %76 : vector<8x128xf32>
    %cst_26 = arith.constant 5.000000e-01 : f32
    %78 = vector.broadcast %cst_26 : f32 to vector<8x128xf32>
    %79 = arith.mulf %78, %77 : vector<8x128xf32>
    %80 = math.tanh %79 : vector<8x128xf32>
    %cst_27 = arith.constant 5.000000e-01 : f32
    %81 = vector.broadcast %cst_27 : f32 to vector<8x128xf32>
    %82 = arith.mulf %81, %80 : vector<8x128xf32>
    %cst_28 = arith.constant 5.000000e-01 : f32
    %83 = vector.broadcast %cst_28 : f32 to vector<8x128xf32>
    %84 = arith.addf %82, %83 : vector<8x128xf32>
    %85 = math.tanh %77 : vector<8x128xf32>
    %86 = vector.extract_strided_slice %84 {offsets = [0, 0], sizes = [8, 32], strides = [1, 1]} : vector<8x128xf32> to vector<8x32xf32>
    %87 = vector.extract_strided_slice %84 {offsets = [0, 32], sizes = [8, 32], strides = [1, 1]} : vector<8x128xf32> to vector<8x32xf32>
    %88 = vector.extract_strided_slice %85 {offsets = [0, 64], sizes = [8, 32], strides = [1, 1]} : vector<8x128xf32> to vector<8x32xf32>
    %89 = vector.extract_strided_slice %84 {offsets = [0, 96], sizes = [8, 32], strides = [1, 1]} : vector<8x128xf32> to vector<8x32xf32>
    %90 = arith.mulf %87, %70 : vector<8x32xf32>
    %91 = arith.mulf %86, %88 : vector<8x32xf32>
    %92 = arith.addf %90, %91 : vector<8x32xf32>
    %93 = math.tanh %92 : vector<8x32xf32>
    %94 = arith.mulf %89, %93 : vector<8x32xf32>
    %95 = arith.truncf %94 : vector<8x32xf32> to vector<8x32xbf16>
    %c24 = arith.constant 24 : index
    %c0_29 = arith.constant 0 : index
    %96 = vector.load %arg16[%c24, %c0_29] : memref<64x32xf32, #tpu.memory_space<vmem>>, vector<8x32xf32>
    tpu.vector_store %arg16[%c24, %c0_29], %94 {strides = array<i32>} : memref<64x32xf32, #tpu.memory_space<vmem>>, vector<8x32xf32>,
    %97 = vector.extract_strided_slice %6 {offsets = [32, 0], sizes = [8, 128], strides = [1, 1]} : vector<64x128xf32> to vector<8x128xf32>
    %cst_30 = arith.constant dense<0.000000e+00> : vector<8x128xf32>
    %98 = tpu.matmul %95, %1, %cst_30 {dimension_numbers = #tpu.dot_dimension_numbers<[1], [0], [0], [1], [0, 0, 1, 1], [], []>} : vector<8x32xbf16>, vector<32x128xbf16>, vector<8x128xf32> -> vector<8x128xf32>
    %99 = arith.addf %97, %98 : vector<8x128xf32>
    %cst_31 = arith.constant 5.000000e-01 : f32
    %100 = vector.broadcast %cst_31 : f32 to vector<8x128xf32>
    %101 = arith.mulf %100, %99 : vector<8x128xf32>
    %102 = math.tanh %101 : vector<8x128xf32>
    %cst_32 = arith.constant 5.000000e-01 : f32
    %103 = vector.broadcast %cst_32 : f32 to vector<8x128xf32>
    %104 = arith.mulf %103, %102 : vector<8x128xf32>
    %cst_33 = arith.constant 5.000000e-01 : f32
    %105 = vector.broadcast %cst_33 : f32 to vector<8x128xf32>
    %106 = arith.addf %104, %105 : vector<8x128xf32>
    %107 = math.tanh %99 : vector<8x128xf32>
    %108 = vector.extract_strided_slice %106 {offsets = [0, 0], sizes = [8, 32], strides = [1, 1]} : vector<8x128xf32> to vector<8x32xf32>
    %109 = vector.extract_strided_slice %106 {offsets = [0, 32], sizes = [8, 32], strides = [1, 1]} : vector<8x128xf32> to vector<8x32xf32>
    %110 = vector.extract_strided_slice %107 {offsets = [0, 64], sizes = [8, 32], strides = [1, 1]} : vector<8x128xf32> to vector<8x32xf32>
    %111 = vector.extract_strided_slice %106 {offsets = [0, 96], sizes = [8, 32], strides = [1, 1]} : vector<8x128xf32> to vector<8x32xf32>
    %112 = arith.mulf %109, %92 : vector<8x32xf32>
    %113 = arith.mulf %108, %110 : vector<8x32xf32>
    %114 = arith.addf %112, %113 : vector<8x32xf32>
    %115 = math.tanh %114 : vector<8x32xf32>
    %116 = arith.mulf %111, %115 : vector<8x32xf32>
    %117 = arith.truncf %116 : vector<8x32xf32> to vector<8x32xbf16>
    %c32 = arith.constant 32 : index
    %c0_34 = arith.constant 0 : index
    %118 = vector.load %arg16[%c32, %c0_34] : memref<64x32xf32, #tpu.memory_space<vmem>>, vector<8x32xf32>
    tpu.vector_store %arg16[%c32, %c0_34], %116 {strides = array<i32>} : memref<64x32xf32, #tpu.memory_space<vmem>>, vector<8x32xf32>,
    %119 = vector.extract_strided_slice %6 {offsets = [40, 0], sizes = [8, 128], strides = [1, 1]} : vector<64x128xf32> to vector<8x128xf32>
    %cst_35 = arith.constant dense<0.000000e+00> : vector<8x128xf32>
    %120 = tpu.matmul %117, %1, %cst_35 {dimension_numbers = #tpu.dot_dimension_numbers<[1], [0], [0], [1], [0, 0, 1, 1], [], []>} : vector<8x32xbf16>, vector<32x128xbf16>, vector<8x128xf32> -> vector<8x128xf32>
    %121 = arith.addf %119, %120 : vector<8x128xf32>
    %cst_36 = arith.constant 5.000000e-01 : f32
    %122 = vector.broadcast %cst_36 : f32 to vector<8x128xf32>
    %123 = arith.mulf %122, %121 : vector<8x128xf32>
    %124 = math.tanh %123 : vector<8x128xf32>
    %cst_37 = arith.constant 5.000000e-01 : f32
    %125 = vector.broadcast %cst_37 : f32 to vector<8x128xf32>
    %126 = arith.mulf %125, %124 : vector<8x128xf32>
    %cst_38 = arith.constant 5.000000e-01 : f32
    %127 = vector.broadcast %cst_38 : f32 to vector<8x128xf32>
    %128 = arith.addf %126, %127 : vector<8x128xf32>
    %129 = math.tanh %121 : vector<8x128xf32>
    %130 = vector.extract_strided_slice %128 {offsets = [0, 0], sizes = [8, 32], strides = [1, 1]} : vector<8x128xf32> to vector<8x32xf32>
    %131 = vector.extract_strided_slice %128 {offsets = [0, 32], sizes = [8, 32], strides = [1, 1]} : vector<8x128xf32> to vector<8x32xf32>
    %132 = vector.extract_strided_slice %129 {offsets = [0, 64], sizes = [8, 32], strides = [1, 1]} : vector<8x128xf32> to vector<8x32xf32>
    %133 = vector.extract_strided_slice %128 {offsets = [0, 96], sizes = [8, 32], strides = [1, 1]} : vector<8x128xf32> to vector<8x32xf32>
    %134 = arith.mulf %131, %114 : vector<8x32xf32>
    %135 = arith.mulf %130, %132 : vector<8x32xf32>
    %136 = arith.addf %134, %135 : vector<8x32xf32>
    %137 = math.tanh %136 : vector<8x32xf32>
    %138 = arith.mulf %133, %137 : vector<8x32xf32>
    %139 = arith.truncf %138 : vector<8x32xf32> to vector<8x32xbf16>
    %c40 = arith.constant 40 : index
    %c0_39 = arith.constant 0 : index
    %140 = vector.load %arg16[%c40, %c0_39] : memref<64x32xf32, #tpu.memory_space<vmem>>, vector<8x32xf32>
    tpu.vector_store %arg16[%c40, %c0_39], %138 {strides = array<i32>} : memref<64x32xf32, #tpu.memory_space<vmem>>, vector<8x32xf32>,
    %141 = vector.extract_strided_slice %6 {offsets = [48, 0], sizes = [8, 128], strides = [1, 1]} : vector<64x128xf32> to vector<8x128xf32>
    %cst_40 = arith.constant dense<0.000000e+00> : vector<8x128xf32>
    %142 = tpu.matmul %139, %1, %cst_40 {dimension_numbers = #tpu.dot_dimension_numbers<[1], [0], [0], [1], [0, 0, 1, 1], [], []>} : vector<8x32xbf16>, vector<32x128xbf16>, vector<8x128xf32> -> vector<8x128xf32>
    %143 = arith.addf %141, %142 : vector<8x128xf32>
    %cst_41 = arith.constant 5.000000e-01 : f32
    %144 = vector.broadcast %cst_41 : f32 to vector<8x128xf32>
    %145 = arith.mulf %144, %143 : vector<8x128xf32>
    %146 = math.tanh %145 : vector<8x128xf32>
    %cst_42 = arith.constant 5.000000e-01 : f32
    %147 = vector.broadcast %cst_42 : f32 to vector<8x128xf32>
    %148 = arith.mulf %147, %146 : vector<8x128xf32>
    %cst_43 = arith.constant 5.000000e-01 : f32
    %149 = vector.broadcast %cst_43 : f32 to vector<8x128xf32>
    %150 = arith.addf %148, %149 : vector<8x128xf32>
    %151 = math.tanh %143 : vector<8x128xf32>
    %152 = vector.extract_strided_slice %150 {offsets = [0, 0], sizes = [8, 32], strides = [1, 1]} : vector<8x128xf32> to vector<8x32xf32>
    %153 = vector.extract_strided_slice %150 {offsets = [0, 32], sizes = [8, 32], strides = [1, 1]} : vector<8x128xf32> to vector<8x32xf32>
    %154 = vector.extract_strided_slice %151 {offsets = [0, 64], sizes = [8, 32], strides = [1, 1]} : vector<8x128xf32> to vector<8x32xf32>
    %155 = vector.extract_strided_slice %150 {offsets = [0, 96], sizes = [8, 32], strides = [1, 1]} : vector<8x128xf32> to vector<8x32xf32>
    %156 = arith.mulf %153, %136 : vector<8x32xf32>
    %157 = arith.mulf %152, %154 : vector<8x32xf32>
    %158 = arith.addf %156, %157 : vector<8x32xf32>
    %159 = math.tanh %158 : vector<8x32xf32>
    %160 = arith.mulf %155, %159 : vector<8x32xf32>
    %161 = arith.truncf %160 : vector<8x32xf32> to vector<8x32xbf16>
    %c48 = arith.constant 48 : index
    %c0_44 = arith.constant 0 : index
    %162 = vector.load %arg16[%c48, %c0_44] : memref<64x32xf32, #tpu.memory_space<vmem>>, vector<8x32xf32>
    tpu.vector_store %arg16[%c48, %c0_44], %160 {strides = array<i32>} : memref<64x32xf32, #tpu.memory_space<vmem>>, vector<8x32xf32>,
    %163 = vector.extract_strided_slice %6 {offsets = [56, 0], sizes = [8, 128], strides = [1, 1]} : vector<64x128xf32> to vector<8x128xf32>
    %cst_45 = arith.constant dense<0.000000e+00> : vector<8x128xf32>
    %164 = tpu.matmul %161, %1, %cst_45 {dimension_numbers = #tpu.dot_dimension_numbers<[1], [0], [0], [1], [0, 0, 1, 1], [], []>} : vector<8x32xbf16>, vector<32x128xbf16>, vector<8x128xf32> -> vector<8x128xf32>
    %165 = arith.addf %163, %164 : vector<8x128xf32>
    %cst_46 = arith.constant 5.000000e-01 : f32
    %166 = vector.broadcast %cst_46 : f32 to vector<8x128xf32>
    %167 = arith.mulf %166, %165 : vector<8x128xf32>
    %168 = math.tanh %167 : vector<8x128xf32>
    %cst_47 = arith.constant 5.000000e-01 : f32
    %169 = vector.broadcast %cst_47 : f32 to vector<8x128xf32>
    %170 = arith.mulf %169, %168 : vector<8x128xf32>
    %cst_48 = arith.constant 5.000000e-01 : f32
    %171 = vector.broadcast %cst_48 : f32 to vector<8x128xf32>
    %172 = arith.addf %170, %171 : vector<8x128xf32>
    %173 = math.tanh %165 : vector<8x128xf32>
    %174 = vector.extract_strided_slice %172 {offsets = [0, 0], sizes = [8, 32], strides = [1, 1]} : vector<8x128xf32> to vector<8x32xf32>
    %175 = vector.extract_strided_slice %172 {offsets = [0, 32], sizes = [8, 32], strides = [1, 1]} : vector<8x128xf32> to vector<8x32xf32>
    %176 = vector.extract_strided_slice %173 {offsets = [0, 64], sizes = [8, 32], strides = [1, 1]} : vector<8x128xf32> to vector<8x32xf32>
    %177 = vector.extract_strided_slice %172 {offsets = [0, 96], sizes = [8, 32], strides = [1, 1]} : vector<8x128xf32> to vector<8x32xf32>
    %178 = arith.mulf %175, %158 : vector<8x32xf32>
    %179 = arith.mulf %174, %176 : vector<8x32xf32>
    %180 = arith.addf %178, %179 : vector<8x32xf32>
    %181 = math.tanh %180 : vector<8x32xf32>
    %182 = arith.mulf %177, %181 : vector<8x32xf32>
    %183 = arith.truncf %182 : vector<8x32xf32> to vector<8x32xbf16>
    %c56 = arith.constant 56 : index
    %c0_49 = arith.constant 0 : index
    %184 = vector.load %arg16[%c56, %c0_49] : memref<64x32xf32, #tpu.memory_space<vmem>>, vector<8x32xf32>
    tpu.vector_store %arg16[%c56, %c0_49], %182 {strides = array<i32>} : memref<64x32xf32, #tpu.memory_space<vmem>>, vector<8x32xf32>,
    %c0_50 = arith.constant 0 : index
    %c0_51 = arith.constant 0 : index
    %185 = vector.load %arg4[%c0_50, %c0_51] : memref<32x128xbf16, #tpu.memory_space<vmem>>, vector<32x128xbf16>
    %c0_52 = arith.constant 0 : index
    %c0_53 = arith.constant 0 : index
    %186 = vector.load %arg5[%c0_52, %c0_53] : memref<32x128xbf16, #tpu.memory_space<vmem>>, vector<32x128xbf16>
    %c0_54 = arith.constant 0 : index
    %c0_55 = arith.constant 0 : index
    %187 = vector.load %arg6[%c0_54, %c0_55] : memref<1x128xf32, #tpu.memory_space<vmem>>, vector<1x128xf32>
    %c0_56 = arith.constant 0 : index
    %c0_57 = arith.constant 0 : index
    %188 = vector.load %arg16[%c0_56, %c0_57] : memref<64x32xf32, #tpu.memory_space<vmem>>, vector<64x32xf32>
    %189 = arith.truncf %188 : vector<64x32xf32> to vector<64x32xbf16>
    %cst_58 = arith.constant dense<0.000000e+00> : vector<64x128xf32>
    %190 = tpu.matmul %189, %185, %cst_58 {dimension_numbers = #tpu.dot_dimension_numbers<[1], [0], [0], [1], [0, 0, 1, 1], [], []>} : vector<64x32xbf16>, vector<32x128xbf16>, vector<64x128xf32> -> vector<64x128xf32>
    %191 = vector.broadcast %187 : vector<1x128xf32> to vector<64x128xf32>
    %192 = arith.addf %190, %191 : vector<64x128xf32>
    %cst_59 = arith.constant 0.000000e+00 : bf16
    %193 = vector.broadcast %cst_59 : bf16 to vector<8x32xbf16>
    %cst_60 = arith.constant 0.000000e+00 : f32
    %194 = vector.broadcast %cst_60 : f32 to vector<8x32xf32>
    %195 = vector.extract_strided_slice %192 {offsets = [0, 0], sizes = [8, 128], strides = [1, 1]} : vector<64x128xf32> to vector<8x128xf32>
    %cst_61 = arith.constant dense<0.000000e+00> : vector<8x128xf32>
    %196 = tpu.matmul %193, %186, %cst_61 {dimension_numbers = #tpu.dot_dimension_numbers<[1], [0], [0], [1], [0, 0, 1, 1], [], []>} : vector<8x32xbf16>, vector<32x128xbf16>, vector<8x128xf32> -> vector<8x128xf32>
    %197 = arith.addf %195, %196 : vector<8x128xf32>
    %cst_62 = arith.constant 5.000000e-01 : f32
    %198 = vector.broadcast %cst_62 : f32 to vector<8x128xf32>
    %199 = arith.mulf %198, %197 : vector<8x128xf32>
    %200 = math.tanh %199 : vector<8x128xf32>
    %cst_63 = arith.constant 5.000000e-01 : f32
    %201 = vector.broadcast %cst_63 : f32 to vector<8x128xf32>
    %202 = arith.mulf %201, %200 : vector<8x128xf32>
    %cst_64 = arith.constant 5.000000e-01 : f32
    %203 = vector.broadcast %cst_64 : f32 to vector<8x128xf32>
    %204 = arith.addf %202, %203 : vector<8x128xf32>
    %205 = math.tanh %197 : vector<8x128xf32>
    %206 = vector.extract_strided_slice %204 {offsets = [0, 0], sizes = [8, 32], strides = [1, 1]} : vector<8x128xf32> to vector<8x32xf32>
    %207 = vector.extract_strided_slice %204 {offsets = [0, 32], sizes = [8, 32], strides = [1, 1]} : vector<8x128xf32> to vector<8x32xf32>
    %208 = vector.extract_strided_slice %205 {offsets = [0, 64], sizes = [8, 32], strides = [1, 1]} : vector<8x128xf32> to vector<8x32xf32>
    %209 = vector.extract_strided_slice %204 {offsets = [0, 96], sizes = [8, 32], strides = [1, 1]} : vector<8x128xf32> to vector<8x32xf32>
    %210 = arith.mulf %207, %194 : vector<8x32xf32>
    %211 = arith.mulf %206, %208 : vector<8x32xf32>
    %212 = arith.addf %210, %211 : vector<8x32xf32>
    %213 = math.tanh %212 : vector<8x32xf32>
    %214 = arith.mulf %209, %213 : vector<8x32xf32>
    %215 = arith.truncf %214 : vector<8x32xf32> to vector<8x32xbf16>
    %216 = vector.extract_strided_slice %192 {offsets = [8, 0], sizes = [8, 128], strides = [1, 1]} : vector<64x128xf32> to vector<8x128xf32>
    %cst_65 = arith.constant dense<0.000000e+00> : vector<8x128xf32>
    %217 = tpu.matmul %215, %186, %cst_65 {dimension_numbers = #tpu.dot_dimension_numbers<[1], [0], [0], [1], [0, 0, 1, 1], [], []>} : vector<8x32xbf16>, vector<32x128xbf16>, vector<8x128xf32> -> vector<8x128xf32>
    %218 = arith.addf %216, %217 : vector<8x128xf32>
    %cst_66 = arith.constant 5.000000e-01 : f32
    %219 = vector.broadcast %cst_66 : f32 to vector<8x128xf32>
    %220 = arith.mulf %219, %218 : vector<8x128xf32>
    %221 = math.tanh %220 : vector<8x128xf32>
    %cst_67 = arith.constant 5.000000e-01 : f32
    %222 = vector.broadcast %cst_67 : f32 to vector<8x128xf32>
    %223 = arith.mulf %222, %221 : vector<8x128xf32>
    %cst_68 = arith.constant 5.000000e-01 : f32
    %224 = vector.broadcast %cst_68 : f32 to vector<8x128xf32>
    %225 = arith.addf %223, %224 : vector<8x128xf32>
    %226 = math.tanh %218 : vector<8x128xf32>
    %227 = vector.extract_strided_slice %225 {offsets = [0, 0], sizes = [8, 32], strides = [1, 1]} : vector<8x128xf32> to vector<8x32xf32>
    %228 = vector.extract_strided_slice %225 {offsets = [0, 32], sizes = [8, 32], strides = [1, 1]} : vector<8x128xf32> to vector<8x32xf32>
    %229 = vector.extract_strided_slice %226 {offsets = [0, 64], sizes = [8, 32], strides = [1, 1]} : vector<8x128xf32> to vector<8x32xf32>
    %230 = vector.extract_strided_slice %225 {offsets = [0, 96], sizes = [8, 32], strides = [1, 1]} : vector<8x128xf32> to vector<8x32xf32>
    %231 = arith.mulf %228, %212 : vector<8x32xf32>
    %232 = arith.mulf %227, %229 : vector<8x32xf32>
    %233 = arith.addf %231, %232 : vector<8x32xf32>
    %234 = math.tanh %233 : vector<8x32xf32>
    %235 = arith.mulf %230, %234 : vector<8x32xf32>
    %236 = arith.truncf %235 : vector<8x32xf32> to vector<8x32xbf16>
    %237 = vector.extract_strided_slice %192 {offsets = [16, 0], sizes = [8, 128], strides = [1, 1]} : vector<64x128xf32> to vector<8x128xf32>
    %cst_69 = arith.constant dense<0.000000e+00> : vector<8x128xf32>
    %238 = tpu.matmul %236, %186, %cst_69 {dimension_numbers = #tpu.dot_dimension_numbers<[1], [0], [0], [1], [0, 0, 1, 1], [], []>} : vector<8x32xbf16>, vector<32x128xbf16>, vector<8x128xf32> -> vector<8x128xf32>
    %239 = arith.addf %237, %238 : vector<8x128xf32>
    %cst_70 = arith.constant 5.000000e-01 : f32
    %240 = vector.broadcast %cst_70 : f32 to vector<8x128xf32>
    %241 = arith.mulf %240, %239 : vector<8x128xf32>
    %242 = math.tanh %241 : vector<8x128xf32>
    %cst_71 = arith.constant 5.000000e-01 : f32
    %243 = vector.broadcast %cst_71 : f32 to vector<8x128xf32>
    %244 = arith.mulf %243, %242 : vector<8x128xf32>
    %cst_72 = arith.constant 5.000000e-01 : f32
    %245 = vector.broadcast %cst_72 : f32 to vector<8x128xf32>
    %246 = arith.addf %244, %245 : vector<8x128xf32>
    %247 = math.tanh %239 : vector<8x128xf32>
    %248 = vector.extract_strided_slice %246 {offsets = [0, 0], sizes = [8, 32], strides = [1, 1]} : vector<8x128xf32> to vector<8x32xf32>
    %249 = vector.extract_strided_slice %246 {offsets = [0, 32], sizes = [8, 32], strides = [1, 1]} : vector<8x128xf32> to vector<8x32xf32>
    %250 = vector.extract_strided_slice %247 {offsets = [0, 64], sizes = [8, 32], strides = [1, 1]} : vector<8x128xf32> to vector<8x32xf32>
    %251 = vector.extract_strided_slice %246 {offsets = [0, 96], sizes = [8, 32], strides = [1, 1]} : vector<8x128xf32> to vector<8x32xf32>
    %252 = arith.mulf %249, %233 : vector<8x32xf32>
    %253 = arith.mulf %248, %250 : vector<8x32xf32>
    %254 = arith.addf %252, %253 : vector<8x32xf32>
    %255 = math.tanh %254 : vector<8x32xf32>
    %256 = arith.mulf %251, %255 : vector<8x32xf32>
    %257 = arith.truncf %256 : vector<8x32xf32> to vector<8x32xbf16>
    %258 = vector.extract_strided_slice %192 {offsets = [24, 0], sizes = [8, 128], strides = [1, 1]} : vector<64x128xf32> to vector<8x128xf32>
    %cst_73 = arith.constant dense<0.000000e+00> : vector<8x128xf32>
    %259 = tpu.matmul %257, %186, %cst_73 {dimension_numbers = #tpu.dot_dimension_numbers<[1], [0], [0], [1], [0, 0, 1, 1], [], []>} : vector<8x32xbf16>, vector<32x128xbf16>, vector<8x128xf32> -> vector<8x128xf32>
    %260 = arith.addf %258, %259 : vector<8x128xf32>
    %cst_74 = arith.constant 5.000000e-01 : f32
    %261 = vector.broadcast %cst_74 : f32 to vector<8x128xf32>
    %262 = arith.mulf %261, %260 : vector<8x128xf32>
    %263 = math.tanh %262 : vector<8x128xf32>
    %cst_75 = arith.constant 5.000000e-01 : f32
    %264 = vector.broadcast %cst_75 : f32 to vector<8x128xf32>
    %265 = arith.mulf %264, %263 : vector<8x128xf32>
    %cst_76 = arith.constant 5.000000e-01 : f32
    %266 = vector.broadcast %cst_76 : f32 to vector<8x128xf32>
    %267 = arith.addf %265, %266 : vector<8x128xf32>
    %268 = math.tanh %260 : vector<8x128xf32>
    %269 = vector.extract_strided_slice %267 {offsets = [0, 0], sizes = [8, 32], strides = [1, 1]} : vector<8x128xf32> to vector<8x32xf32>
    %270 = vector.extract_strided_slice %267 {offsets = [0, 32], sizes = [8, 32], strides = [1, 1]} : vector<8x128xf32> to vector<8x32xf32>
    %271 = vector.extract_strided_slice %268 {offsets = [0, 64], sizes = [8, 32], strides = [1, 1]} : vector<8x128xf32> to vector<8x32xf32>
    %272 = vector.extract_strided_slice %267 {offsets = [0, 96], sizes = [8, 32], strides = [1, 1]} : vector<8x128xf32> to vector<8x32xf32>
    %273 = arith.mulf %270, %254 : vector<8x32xf32>
    %274 = arith.mulf %269, %271 : vector<8x32xf32>
    %275 = arith.addf %273, %274 : vector<8x32xf32>
    %276 = math.tanh %275 : vector<8x32xf32>
    %277 = arith.mulf %272, %276 : vector<8x32xf32>
    %278 = arith.truncf %277 : vector<8x32xf32> to vector<8x32xbf16>
    %279 = vector.extract_strided_slice %192 {offsets = [32, 0], sizes = [8, 128], strides = [1, 1]} : vector<64x128xf32> to vector<8x128xf32>
    %cst_77 = arith.constant dense<0.000000e+00> : vector<8x128xf32>
    %280 = tpu.matmul %278, %186, %cst_77 {dimension_numbers = #tpu.dot_dimension_numbers<[1], [0], [0], [1], [0, 0, 1, 1], [], []>} : vector<8x32xbf16>, vector<32x128xbf16>, vector<8x128xf32> -> vector<8x128xf32>
    %281 = arith.addf %279, %280 : vector<8x128xf32>
    %cst_78 = arith.constant 5.000000e-01 : f32
    %282 = vector.broadcast %cst_78 : f32 to vector<8x128xf32>
    %283 = arith.mulf %282, %281 : vector<8x128xf32>
    %284 = math.tanh %283 : vector<8x128xf32>
    %cst_79 = arith.constant 5.000000e-01 : f32
    %285 = vector.broadcast %cst_79 : f32 to vector<8x128xf32>
    %286 = arith.mulf %285, %284 : vector<8x128xf32>
    %cst_80 = arith.constant 5.000000e-01 : f32
    %287 = vector.broadcast %cst_80 : f32 to vector<8x128xf32>
    %288 = arith.addf %286, %287 : vector<8x128xf32>
    %289 = math.tanh %281 : vector<8x128xf32>
    %290 = vector.extract_strided_slice %288 {offsets = [0, 0], sizes = [8, 32], strides = [1, 1]} : vector<8x128xf32> to vector<8x32xf32>
    %291 = vector.extract_strided_slice %288 {offsets = [0, 32], sizes = [8, 32], strides = [1, 1]} : vector<8x128xf32> to vector<8x32xf32>
    %292 = vector.extract_strided_slice %289 {offsets = [0, 64], sizes = [8, 32], strides = [1, 1]} : vector<8x128xf32> to vector<8x32xf32>
    %293 = vector.extract_strided_slice %288 {offsets = [0, 96], sizes = [8, 32], strides = [1, 1]} : vector<8x128xf32> to vector<8x32xf32>
    %294 = arith.mulf %291, %275 : vector<8x32xf32>
    %295 = arith.mulf %290, %292 : vector<8x32xf32>
    %296 = arith.addf %294, %295 : vector<8x32xf32>
    %297 = math.tanh %296 : vector<8x32xf32>
    %298 = arith.mulf %293, %297 : vector<8x32xf32>
    %299 = arith.truncf %298 : vector<8x32xf32> to vector<8x32xbf16>
    %300 = vector.extract_strided_slice %192 {offsets = [40, 0], sizes = [8, 128], strides = [1, 1]} : vector<64x128xf32> to vector<8x128xf32>
    %cst_81 = arith.constant dense<0.000000e+00> : vector<8x128xf32>
    %301 = tpu.matmul %299, %186, %cst_81 {dimension_numbers = #tpu.dot_dimension_numbers<[1], [0], [0], [1], [0, 0, 1, 1], [], []>} : vector<8x32xbf16>, vector<32x128xbf16>, vector<8x128xf32> -> vector<8x128xf32>
    %302 = arith.addf %300, %301 : vector<8x128xf32>
    %cst_82 = arith.constant 5.000000e-01 : f32
    %303 = vector.broadcast %cst_82 : f32 to vector<8x128xf32>
    %304 = arith.mulf %303, %302 : vector<8x128xf32>
    %305 = math.tanh %304 : vector<8x128xf32>
    %cst_83 = arith.constant 5.000000e-01 : f32
    %306 = vector.broadcast %cst_83 : f32 to vector<8x128xf32>
    %307 = arith.mulf %306, %305 : vector<8x128xf32>
    %cst_84 = arith.constant 5.000000e-01 : f32
    %308 = vector.broadcast %cst_84 : f32 to vector<8x128xf32>
    %309 = arith.addf %307, %308 : vector<8x128xf32>
    %310 = math.tanh %302 : vector<8x128xf32>
    %311 = vector.extract_strided_slice %309 {offsets = [0, 0], sizes = [8, 32], strides = [1, 1]} : vector<8x128xf32> to vector<8x32xf32>
    %312 = vector.extract_strided_slice %309 {offsets = [0, 32], sizes = [8, 32], strides = [1, 1]} : vector<8x128xf32> to vector<8x32xf32>
    %313 = vector.extract_strided_slice %310 {offsets = [0, 64], sizes = [8, 32], strides = [1, 1]} : vector<8x128xf32> to vector<8x32xf32>
    %314 = vector.extract_strided_slice %309 {offsets = [0, 96], sizes = [8, 32], strides = [1, 1]} : vector<8x128xf32> to vector<8x32xf32>
    %315 = arith.mulf %312, %296 : vector<8x32xf32>
    %316 = arith.mulf %311, %313 : vector<8x32xf32>
    %317 = arith.addf %315, %316 : vector<8x32xf32>
    %318 = math.tanh %317 : vector<8x32xf32>
    %319 = arith.mulf %314, %318 : vector<8x32xf32>
    %320 = arith.truncf %319 : vector<8x32xf32> to vector<8x32xbf16>
    %321 = vector.extract_strided_slice %192 {offsets = [48, 0], sizes = [8, 128], strides = [1, 1]} : vector<64x128xf32> to vector<8x128xf32>
    %cst_85 = arith.constant dense<0.000000e+00> : vector<8x128xf32>
    %322 = tpu.matmul %320, %186, %cst_85 {dimension_numbers = #tpu.dot_dimension_numbers<[1], [0], [0], [1], [0, 0, 1, 1], [], []>} : vector<8x32xbf16>, vector<32x128xbf16>, vector<8x128xf32> -> vector<8x128xf32>
    %323 = arith.addf %321, %322 : vector<8x128xf32>
    %cst_86 = arith.constant 5.000000e-01 : f32
    %324 = vector.broadcast %cst_86 : f32 to vector<8x128xf32>
    %325 = arith.mulf %324, %323 : vector<8x128xf32>
    %326 = math.tanh %325 : vector<8x128xf32>
    %cst_87 = arith.constant 5.000000e-01 : f32
    %327 = vector.broadcast %cst_87 : f32 to vector<8x128xf32>
    %328 = arith.mulf %327, %326 : vector<8x128xf32>
    %cst_88 = arith.constant 5.000000e-01 : f32
    %329 = vector.broadcast %cst_88 : f32 to vector<8x128xf32>
    %330 = arith.addf %328, %329 : vector<8x128xf32>
    %331 = math.tanh %323 : vector<8x128xf32>
    %332 = vector.extract_strided_slice %330 {offsets = [0, 0], sizes = [8, 32], strides = [1, 1]} : vector<8x128xf32> to vector<8x32xf32>
    %333 = vector.extract_strided_slice %330 {offsets = [0, 32], sizes = [8, 32], strides = [1, 1]} : vector<8x128xf32> to vector<8x32xf32>
    %334 = vector.extract_strided_slice %331 {offsets = [0, 64], sizes = [8, 32], strides = [1, 1]} : vector<8x128xf32> to vector<8x32xf32>
    %335 = vector.extract_strided_slice %330 {offsets = [0, 96], sizes = [8, 32], strides = [1, 1]} : vector<8x128xf32> to vector<8x32xf32>
    %336 = arith.mulf %333, %317 : vector<8x32xf32>
    %337 = arith.mulf %332, %334 : vector<8x32xf32>
    %338 = arith.addf %336, %337 : vector<8x32xf32>
    %339 = math.tanh %338 : vector<8x32xf32>
    %340 = arith.mulf %335, %339 : vector<8x32xf32>
    %341 = arith.truncf %340 : vector<8x32xf32> to vector<8x32xbf16>
    %342 = vector.extract_strided_slice %192 {offsets = [56, 0], sizes = [8, 128], strides = [1, 1]} : vector<64x128xf32> to vector<8x128xf32>
    %cst_89 = arith.constant dense<0.000000e+00> : vector<8x128xf32>
    %343 = tpu.matmul %341, %186, %cst_89 {dimension_numbers = #tpu.dot_dimension_numbers<[1], [0], [0], [1], [0, 0, 1, 1], [], []>} : vector<8x32xbf16>, vector<32x128xbf16>, vector<8x128xf32> -> vector<8x128xf32>
    %344 = arith.addf %342, %343 : vector<8x128xf32>
    %cst_90 = arith.constant 5.000000e-01 : f32
    %345 = vector.broadcast %cst_90 : f32 to vector<8x128xf32>
    %346 = arith.mulf %345, %344 : vector<8x128xf32>
    %347 = math.tanh %346 : vector<8x128xf32>
    %cst_91 = arith.constant 5.000000e-01 : f32
    %348 = vector.broadcast %cst_91 : f32 to vector<8x128xf32>
    %349 = arith.mulf %348, %347 : vector<8x128xf32>
    %cst_92 = arith.constant 5.000000e-01 : f32
    %350 = vector.broadcast %cst_92 : f32 to vector<8x128xf32>
    %351 = arith.addf %349, %350 : vector<8x128xf32>
    %352 = math.tanh %344 : vector<8x128xf32>
    %353 = vector.extract_strided_slice %351 {offsets = [0, 0], sizes = [8, 32], strides = [1, 1]} : vector<8x128xf32> to vector<8x32xf32>
    %354 = vector.extract_strided_slice %351 {offsets = [0, 32], sizes = [8, 32], strides = [1, 1]} : vector<8x128xf32> to vector<8x32xf32>
    %355 = vector.extract_strided_slice %352 {offsets = [0, 64], sizes = [8, 32], strides = [1, 1]} : vector<8x128xf32> to vector<8x32xf32>
    %356 = vector.extract_strided_slice %351 {offsets = [0, 96], sizes = [8, 32], strides = [1, 1]} : vector<8x128xf32> to vector<8x32xf32>
    %357 = arith.mulf %354, %338 : vector<8x32xf32>
    %358 = arith.mulf %353, %355 : vector<8x32xf32>
    %359 = arith.addf %357, %358 : vector<8x32xf32>
    %360 = math.tanh %359 : vector<8x32xf32>
    %361 = arith.mulf %356, %360 : vector<8x32xf32>
    %362 = arith.truncf %361 : vector<8x32xf32> to vector<8x32xbf16>
    %c0_93 = arith.constant 0 : index
    %c0_94 = arith.constant 0 : index
    %363 = vector.load %arg7[%c0_93, %c0_94] : memref<8x128xbf16, #tpu.memory_space<vmem>>, vector<8x128xbf16>
    %c0_95 = arith.constant 0 : index
    %c0_96 = arith.constant 0 : index
    %364 = vector.load %arg8[%c0_95, %c0_96] : memref<32x128xbf16, #tpu.memory_space<vmem>>, vector<32x128xbf16>
    %c0_97 = arith.constant 0 : index
    %c0_98 = arith.constant 0 : index
    %365 = vector.load %arg9[%c0_97, %c0_98] : memref<1x128xf32, #tpu.memory_space<vmem>>, vector<1x128xf32>
    %c0_99 = arith.constant 0 : index
    %c0_100 = arith.constant 0 : index
    %366 = vector.load %arg10[%c0_99, %c0_100] : memref<32x128xbf16, #tpu.memory_space<vmem>>, vector<32x128xbf16>
    %c0_101 = arith.constant 0 : index
    %c0_102 = arith.constant 0 : index
    %367 = vector.load %arg11[%c0_101, %c0_102] : memref<32x128xbf16, #tpu.memory_space<vmem>>, vector<32x128xbf16>
    %c0_103 = arith.constant 0 : index
    %c0_104 = arith.constant 0 : index
    %368 = vector.load %arg12[%c0_103, %c0_104] : memref<1x128xf32, #tpu.memory_space<vmem>>, vector<1x128xf32>
    %c0_105 = arith.constant 0 : index
    %c0_106 = arith.constant 0 : index
    %369 = vector.load %arg13[%c0_105, %c0_106] : memref<32x8xbf16, #tpu.memory_space<vmem>>, vector<32x8xbf16>
    %c0_107 = arith.constant 0 : index
    %c0_108 = arith.constant 0 : index
    %370 = vector.load %arg14[%c0_107, %c0_108] : memref<1x8xf32, #tpu.memory_space<vmem>>, vector<1x8xf32>
    %c56_109 = arith.constant 56 : index
    %c0_110 = arith.constant 0 : index
    %371 = vector.load %arg0[%c56_109, %c0_110] : memref<64x8xbf16, #tpu.memory_space<vmem>>, vector<8x8xbf16>
    %cst_111 = arith.constant dense<0.000000e+00> : vector<8x128xf32>
    %372 = tpu.matmul %371, %363, %cst_111 {dimension_numbers = #tpu.dot_dimension_numbers<[1], [0], [0], [1], [0, 0, 1, 1], [], []>} : vector<8x8xbf16>, vector<8x128xbf16>, vector<8x128xf32> -> vector<8x128xf32>
    %cst_112 = arith.constant dense<0.000000e+00> : vector<8x128xf32>
    %373 = tpu.matmul %183, %364, %cst_112 {dimension_numbers = #tpu.dot_dimension_numbers<[1], [0], [0], [1], [0, 0, 1, 1], [], []>} : vector<8x32xbf16>, vector<32x128xbf16>, vector<8x128xf32> -> vector<8x128xf32>
    %374 = arith.addf %372, %373 : vector<8x128xf32>
    %375 = vector.broadcast %365 : vector<1x128xf32> to vector<8x128xf32>
    %376 = arith.addf %374, %375 : vector<8x128xf32>
    %cst_113 = arith.constant 5.000000e-01 : f32
    %377 = vector.broadcast %cst_113 : f32 to vector<8x128xf32>
    %378 = arith.mulf %377, %376 : vector<8x128xf32>
    %379 = math.tanh %378 : vector<8x128xf32>
    %cst_114 = arith.constant 5.000000e-01 : f32
    %380 = vector.broadcast %cst_114 : f32 to vector<8x128xf32>
    %381 = arith.mulf %380, %379 : vector<8x128xf32>
    %cst_115 = arith.constant 5.000000e-01 : f32
    %382 = vector.broadcast %cst_115 : f32 to vector<8x128xf32>
    %383 = arith.addf %381, %382 : vector<8x128xf32>
    %384 = math.tanh %376 : vector<8x128xf32>
    %385 = vector.extract_strided_slice %383 {offsets = [0, 0], sizes = [8, 32], strides = [1, 1]} : vector<8x128xf32> to vector<8x32xf32>
    %386 = vector.extract_strided_slice %383 {offsets = [0, 32], sizes = [8, 32], strides = [1, 1]} : vector<8x128xf32> to vector<8x32xf32>
    %387 = vector.extract_strided_slice %384 {offsets = [0, 64], sizes = [8, 32], strides = [1, 1]} : vector<8x128xf32> to vector<8x32xf32>
    %388 = vector.extract_strided_slice %383 {offsets = [0, 96], sizes = [8, 32], strides = [1, 1]} : vector<8x128xf32> to vector<8x32xf32>
    %389 = arith.mulf %386, %180 : vector<8x32xf32>
    %390 = arith.mulf %385, %387 : vector<8x32xf32>
    %391 = arith.addf %389, %390 : vector<8x32xf32>
    %392 = math.tanh %391 : vector<8x32xf32>
    %393 = arith.mulf %388, %392 : vector<8x32xf32>
    %394 = arith.truncf %393 : vector<8x32xf32> to vector<8x32xbf16>
    %cst_116 = arith.constant dense<0.000000e+00> : vector<8x128xf32>
    %395 = tpu.matmul %394, %366, %cst_116 {dimension_numbers = #tpu.dot_dimension_numbers<[1], [0], [0], [1], [0, 0, 1, 1], [], []>} : vector<8x32xbf16>, vector<32x128xbf16>, vector<8x128xf32> -> vector<8x128xf32>
    %cst_117 = arith.constant dense<0.000000e+00> : vector<8x128xf32>
    %396 = tpu.matmul %362, %367, %cst_117 {dimension_numbers = #tpu.dot_dimension_numbers<[1], [0], [0], [1], [0, 0, 1, 1], [], []>} : vector<8x32xbf16>, vector<32x128xbf16>, vector<8x128xf32> -> vector<8x128xf32>
    %397 = arith.addf %395, %396 : vector<8x128xf32>
    %398 = vector.broadcast %368 : vector<1x128xf32> to vector<8x128xf32>
    %399 = arith.addf %397, %398 : vector<8x128xf32>
    %cst_118 = arith.constant 5.000000e-01 : f32
    %400 = vector.broadcast %cst_118 : f32 to vector<8x128xf32>
    %401 = arith.mulf %400, %399 : vector<8x128xf32>
    %402 = math.tanh %401 : vector<8x128xf32>
    %cst_119 = arith.constant 5.000000e-01 : f32
    %403 = vector.broadcast %cst_119 : f32 to vector<8x128xf32>
    %404 = arith.mulf %403, %402 : vector<8x128xf32>
    %cst_120 = arith.constant 5.000000e-01 : f32
    %405 = vector.broadcast %cst_120 : f32 to vector<8x128xf32>
    %406 = arith.addf %404, %405 : vector<8x128xf32>
    %407 = math.tanh %399 : vector<8x128xf32>
    %408 = vector.extract_strided_slice %406 {offsets = [0, 0], sizes = [8, 32], strides = [1, 1]} : vector<8x128xf32> to vector<8x32xf32>
    %409 = vector.extract_strided_slice %406 {offsets = [0, 32], sizes = [8, 32], strides = [1, 1]} : vector<8x128xf32> to vector<8x32xf32>
    %410 = vector.extract_strided_slice %407 {offsets = [0, 64], sizes = [8, 32], strides = [1, 1]} : vector<8x128xf32> to vector<8x32xf32>
    %411 = vector.extract_strided_slice %406 {offsets = [0, 96], sizes = [8, 32], strides = [1, 1]} : vector<8x128xf32> to vector<8x32xf32>
    %412 = arith.mulf %409, %359 : vector<8x32xf32>
    %413 = arith.mulf %408, %410 : vector<8x32xf32>
    %414 = arith.addf %412, %413 : vector<8x32xf32>
    %415 = math.tanh %414 : vector<8x32xf32>
    %416 = arith.mulf %411, %415 : vector<8x32xf32>
    %417 = arith.truncf %416 : vector<8x32xf32> to vector<8x32xbf16>
    %cst_121 = arith.constant dense<0.000000e+00> : vector<8x8xf32>
    %418 = tpu.matmul %417, %369, %cst_121 {dimension_numbers = #tpu.dot_dimension_numbers<[1], [0], [0], [1], [0, 0, 1, 1], [], []>} : vector<8x32xbf16>, vector<32x8xbf16>, vector<8x8xf32> -> vector<8x8xf32>
    %419 = vector.broadcast %370 : vector<1x8xf32> to vector<8x8xf32>
    %420 = arith.addf %418, %419 : vector<8x8xf32>
    %c0_122 = arith.constant 0 : index
    %c0_123 = arith.constant 0 : index
    %421 = vector.load %arg15[%c0_122, %c0_123] : memref<40x8xf32, #tpu.memory_space<vmem>>, vector<8x8xf32>
    tpu.vector_store %arg15[%c0_122, %c0_123], %420 {strides = array<i32>} : memref<40x8xf32, #tpu.memory_space<vmem>>, vector<8x8xf32>,
    %422 = arith.truncf %420 : vector<8x8xf32> to vector<8x8xbf16>
    %cst_124 = arith.constant dense<0.000000e+00> : vector<8x128xf32>
    %423 = tpu.matmul %422, %363, %cst_124 {dimension_numbers = #tpu.dot_dimension_numbers<[1], [0], [0], [1], [0, 0, 1, 1], [], []>} : vector<8x8xbf16>, vector<8x128xbf16>, vector<8x128xf32> -> vector<8x128xf32>
    %cst_125 = arith.constant dense<0.000000e+00> : vector<8x128xf32>
    %424 = tpu.matmul %394, %364, %cst_125 {dimension_numbers = #tpu.dot_dimension_numbers<[1], [0], [0], [1], [0, 0, 1, 1], [], []>} : vector<8x32xbf16>, vector<32x128xbf16>, vector<8x128xf32> -> vector<8x128xf32>
    %425 = arith.addf %423, %424 : vector<8x128xf32>
    %426 = vector.broadcast %365 : vector<1x128xf32> to vector<8x128xf32>
    %427 = arith.addf %425, %426 : vector<8x128xf32>
    %cst_126 = arith.constant 5.000000e-01 : f32
    %428 = vector.broadcast %cst_126 : f32 to vector<8x128xf32>
    %429 = arith.mulf %428, %427 : vector<8x128xf32>
    %430 = math.tanh %429 : vector<8x128xf32>
    %cst_127 = arith.constant 5.000000e-01 : f32
    %431 = vector.broadcast %cst_127 : f32 to vector<8x128xf32>
    %432 = arith.mulf %431, %430 : vector<8x128xf32>
    %cst_128 = arith.constant 5.000000e-01 : f32
    %433 = vector.broadcast %cst_128 : f32 to vector<8x128xf32>
    %434 = arith.addf %432, %433 : vector<8x128xf32>
    %435 = math.tanh %427 : vector<8x128xf32>
    %436 = vector.extract_strided_slice %434 {offsets = [0, 0], sizes = [8, 32], strides = [1, 1]} : vector<8x128xf32> to vector<8x32xf32>
    %437 = vector.extract_strided_slice %434 {offsets = [0, 32], sizes = [8, 32], strides = [1, 1]} : vector<8x128xf32> to vector<8x32xf32>
    %438 = vector.extract_strided_slice %435 {offsets = [0, 64], sizes = [8, 32], strides = [1, 1]} : vector<8x128xf32> to vector<8x32xf32>
    %439 = vector.extract_strided_slice %434 {offsets = [0, 96], sizes = [8, 32], strides = [1, 1]} : vector<8x128xf32> to vector<8x32xf32>
    %440 = arith.mulf %437, %391 : vector<8x32xf32>
    %441 = arith.mulf %436, %438 : vector<8x32xf32>
    %442 = arith.addf %440, %441 : vector<8x32xf32>
    %443 = math.tanh %442 : vector<8x32xf32>
    %444 = arith.mulf %439, %443 : vector<8x32xf32>
    %445 = arith.truncf %444 : vector<8x32xf32> to vector<8x32xbf16>
    %cst_129 = arith.constant dense<0.000000e+00> : vector<8x128xf32>
    %446 = tpu.matmul %445, %366, %cst_129 {dimension_numbers = #tpu.dot_dimension_numbers<[1], [0], [0], [1], [0, 0, 1, 1], [], []>} : vector<8x32xbf16>, vector<32x128xbf16>, vector<8x128xf32> -> vector<8x128xf32>
    %cst_130 = arith.constant dense<0.000000e+00> : vector<8x128xf32>
    %447 = tpu.matmul %417, %367, %cst_130 {dimension_numbers = #tpu.dot_dimension_numbers<[1], [0], [0], [1], [0, 0, 1, 1], [], []>} : vector<8x32xbf16>, vector<32x128xbf16>, vector<8x128xf32> -> vector<8x128xf32>
    %448 = arith.addf %446, %447 : vector<8x128xf32>
    %449 = vector.broadcast %368 : vector<1x128xf32> to vector<8x128xf32>
    %450 = arith.addf %448, %449 : vector<8x128xf32>
    %cst_131 = arith.constant 5.000000e-01 : f32
    %451 = vector.broadcast %cst_131 : f32 to vector<8x128xf32>
    %452 = arith.mulf %451, %450 : vector<8x128xf32>
    %453 = math.tanh %452 : vector<8x128xf32>
    %cst_132 = arith.constant 5.000000e-01 : f32
    %454 = vector.broadcast %cst_132 : f32 to vector<8x128xf32>
    %455 = arith.mulf %454, %453 : vector<8x128xf32>
    %cst_133 = arith.constant 5.000000e-01 : f32
    %456 = vector.broadcast %cst_133 : f32 to vector<8x128xf32>
    %457 = arith.addf %455, %456 : vector<8x128xf32>
    %458 = math.tanh %450 : vector<8x128xf32>
    %459 = vector.extract_strided_slice %457 {offsets = [0, 0], sizes = [8, 32], strides = [1, 1]} : vector<8x128xf32> to vector<8x32xf32>
    %460 = vector.extract_strided_slice %457 {offsets = [0, 32], sizes = [8, 32], strides = [1, 1]} : vector<8x128xf32> to vector<8x32xf32>
    %461 = vector.extract_strided_slice %458 {offsets = [0, 64], sizes = [8, 32], strides = [1, 1]} : vector<8x128xf32> to vector<8x32xf32>
    %462 = vector.extract_strided_slice %457 {offsets = [0, 96], sizes = [8, 32], strides = [1, 1]} : vector<8x128xf32> to vector<8x32xf32>
    %463 = arith.mulf %460, %414 : vector<8x32xf32>
    %464 = arith.mulf %459, %461 : vector<8x32xf32>
    %465 = arith.addf %463, %464 : vector<8x32xf32>
    %466 = math.tanh %465 : vector<8x32xf32>
    %467 = arith.mulf %462, %466 : vector<8x32xf32>
    %468 = arith.truncf %467 : vector<8x32xf32> to vector<8x32xbf16>
    %cst_134 = arith.constant dense<0.000000e+00> : vector<8x8xf32>
    %469 = tpu.matmul %468, %369, %cst_134 {dimension_numbers = #tpu.dot_dimension_numbers<[1], [0], [0], [1], [0, 0, 1, 1], [], []>} : vector<8x32xbf16>, vector<32x8xbf16>, vector<8x8xf32> -> vector<8x8xf32>
    %470 = vector.broadcast %370 : vector<1x8xf32> to vector<8x8xf32>
    %471 = arith.addf %469, %470 : vector<8x8xf32>
    %c8_135 = arith.constant 8 : index
    %c0_136 = arith.constant 0 : index
    %472 = vector.load %arg15[%c8_135, %c0_136] : memref<40x8xf32, #tpu.memory_space<vmem>>, vector<8x8xf32>
    tpu.vector_store %arg15[%c8_135, %c0_136], %471 {strides = array<i32>} : memref<40x8xf32, #tpu.memory_space<vmem>>, vector<8x8xf32>,
    %473 = arith.truncf %471 : vector<8x8xf32> to vector<8x8xbf16>
    %cst_137 = arith.constant dense<0.000000e+00> : vector<8x128xf32>
    %474 = tpu.matmul %473, %363, %cst_137 {dimension_numbers = #tpu.dot_dimension_numbers<[1], [0], [0], [1], [0, 0, 1, 1], [], []>} : vector<8x8xbf16>, vector<8x128xbf16>, vector<8x128xf32> -> vector<8x128xf32>
    %cst_138 = arith.constant dense<0.000000e+00> : vector<8x128xf32>
    %475 = tpu.matmul %445, %364, %cst_138 {dimension_numbers = #tpu.dot_dimension_numbers<[1], [0], [0], [1], [0, 0, 1, 1], [], []>} : vector<8x32xbf16>, vector<32x128xbf16>, vector<8x128xf32> -> vector<8x128xf32>
    %476 = arith.addf %474, %475 : vector<8x128xf32>
    %477 = vector.broadcast %365 : vector<1x128xf32> to vector<8x128xf32>
    %478 = arith.addf %476, %477 : vector<8x128xf32>
    %cst_139 = arith.constant 5.000000e-01 : f32
    %479 = vector.broadcast %cst_139 : f32 to vector<8x128xf32>
    %480 = arith.mulf %479, %478 : vector<8x128xf32>
    %481 = math.tanh %480 : vector<8x128xf32>
    %cst_140 = arith.constant 5.000000e-01 : f32
    %482 = vector.broadcast %cst_140 : f32 to vector<8x128xf32>
    %483 = arith.mulf %482, %481 : vector<8x128xf32>
    %cst_141 = arith.constant 5.000000e-01 : f32
    %484 = vector.broadcast %cst_141 : f32 to vector<8x128xf32>
    %485 = arith.addf %483, %484 : vector<8x128xf32>
    %486 = math.tanh %478 : vector<8x128xf32>
    %487 = vector.extract_strided_slice %485 {offsets = [0, 0], sizes = [8, 32], strides = [1, 1]} : vector<8x128xf32> to vector<8x32xf32>
    %488 = vector.extract_strided_slice %485 {offsets = [0, 32], sizes = [8, 32], strides = [1, 1]} : vector<8x128xf32> to vector<8x32xf32>
    %489 = vector.extract_strided_slice %486 {offsets = [0, 64], sizes = [8, 32], strides = [1, 1]} : vector<8x128xf32> to vector<8x32xf32>
    %490 = vector.extract_strided_slice %485 {offsets = [0, 96], sizes = [8, 32], strides = [1, 1]} : vector<8x128xf32> to vector<8x32xf32>
    %491 = arith.mulf %488, %442 : vector<8x32xf32>
    %492 = arith.mulf %487, %489 : vector<8x32xf32>
    %493 = arith.addf %491, %492 : vector<8x32xf32>
    %494 = math.tanh %493 : vector<8x32xf32>
    %495 = arith.mulf %490, %494 : vector<8x32xf32>
    %496 = arith.truncf %495 : vector<8x32xf32> to vector<8x32xbf16>
    %cst_142 = arith.constant dense<0.000000e+00> : vector<8x128xf32>
    %497 = tpu.matmul %496, %366, %cst_142 {dimension_numbers = #tpu.dot_dimension_numbers<[1], [0], [0], [1], [0, 0, 1, 1], [], []>} : vector<8x32xbf16>, vector<32x128xbf16>, vector<8x128xf32> -> vector<8x128xf32>
    %cst_143 = arith.constant dense<0.000000e+00> : vector<8x128xf32>
    %498 = tpu.matmul %468, %367, %cst_143 {dimension_numbers = #tpu.dot_dimension_numbers<[1], [0], [0], [1], [0, 0, 1, 1], [], []>} : vector<8x32xbf16>, vector<32x128xbf16>, vector<8x128xf32> -> vector<8x128xf32>
    %499 = arith.addf %497, %498 : vector<8x128xf32>
    %500 = vector.broadcast %368 : vector<1x128xf32> to vector<8x128xf32>
    %501 = arith.addf %499, %500 : vector<8x128xf32>
    %cst_144 = arith.constant 5.000000e-01 : f32
    %502 = vector.broadcast %cst_144 : f32 to vector<8x128xf32>
    %503 = arith.mulf %502, %501 : vector<8x128xf32>
    %504 = math.tanh %503 : vector<8x128xf32>
    %cst_145 = arith.constant 5.000000e-01 : f32
    %505 = vector.broadcast %cst_145 : f32 to vector<8x128xf32>
    %506 = arith.mulf %505, %504 : vector<8x128xf32>
    %cst_146 = arith.constant 5.000000e-01 : f32
    %507 = vector.broadcast %cst_146 : f32 to vector<8x128xf32>
    %508 = arith.addf %506, %507 : vector<8x128xf32>
    %509 = math.tanh %501 : vector<8x128xf32>
    %510 = vector.extract_strided_slice %508 {offsets = [0, 0], sizes = [8, 32], strides = [1, 1]} : vector<8x128xf32> to vector<8x32xf32>
    %511 = vector.extract_strided_slice %508 {offsets = [0, 32], sizes = [8, 32], strides = [1, 1]} : vector<8x128xf32> to vector<8x32xf32>
    %512 = vector.extract_strided_slice %509 {offsets = [0, 64], sizes = [8, 32], strides = [1, 1]} : vector<8x128xf32> to vector<8x32xf32>
    %513 = vector.extract_strided_slice %508 {offsets = [0, 96], sizes = [8, 32], strides = [1, 1]} : vector<8x128xf32> to vector<8x32xf32>
    %514 = arith.mulf %511, %465 : vector<8x32xf32>
    %515 = arith.mulf %510, %512 : vector<8x32xf32>
    %516 = arith.addf %514, %515 : vector<8x32xf32>
    %517 = math.tanh %516 : vector<8x32xf32>
    %518 = arith.mulf %513, %517 : vector<8x32xf32>
    %519 = arith.truncf %518 : vector<8x32xf32> to vector<8x32xbf16>
    %cst_147 = arith.constant dense<0.000000e+00> : vector<8x8xf32>
    %520 = tpu.matmul %519, %369, %cst_147 {dimension_numbers = #tpu.dot_dimension_numbers<[1], [0], [0], [1], [0, 0, 1, 1], [], []>} : vector<8x32xbf16>, vector<32x8xbf16>, vector<8x8xf32> -> vector<8x8xf32>
    %521 = vector.broadcast %370 : vector<1x8xf32> to vector<8x8xf32>
    %522 = arith.addf %520, %521 : vector<8x8xf32>
    %c16_148 = arith.constant 16 : index
    %c0_149 = arith.constant 0 : index
    %523 = vector.load %arg15[%c16_148, %c0_149] : memref<40x8xf32, #tpu.memory_space<vmem>>, vector<8x8xf32>
    tpu.vector_store %arg15[%c16_148, %c0_149], %522 {strides = array<i32>} : memref<40x8xf32, #tpu.memory_space<vmem>>, vector<8x8xf32>,
    %524 = arith.truncf %522 : vector<8x8xf32> to vector<8x8xbf16>
    %cst_150 = arith.constant dense<0.000000e+00> : vector<8x128xf32>
    %525 = tpu.matmul %524, %363, %cst_150 {dimension_numbers = #tpu.dot_dimension_numbers<[1], [0], [0], [1], [0, 0, 1, 1], [], []>} : vector<8x8xbf16>, vector<8x128xbf16>, vector<8x128xf32> -> vector<8x128xf32>
    %cst_151 = arith.constant dense<0.000000e+00> : vector<8x128xf32>
    %526 = tpu.matmul %496, %364, %cst_151 {dimension_numbers = #tpu.dot_dimension_numbers<[1], [0], [0], [1], [0, 0, 1, 1], [], []>} : vector<8x32xbf16>, vector<32x128xbf16>, vector<8x128xf32> -> vector<8x128xf32>
    %527 = arith.addf %525, %526 : vector<8x128xf32>
    %528 = vector.broadcast %365 : vector<1x128xf32> to vector<8x128xf32>
    %529 = arith.addf %527, %528 : vector<8x128xf32>
    %cst_152 = arith.constant 5.000000e-01 : f32
    %530 = vector.broadcast %cst_152 : f32 to vector<8x128xf32>
    %531 = arith.mulf %530, %529 : vector<8x128xf32>
    %532 = math.tanh %531 : vector<8x128xf32>
    %cst_153 = arith.constant 5.000000e-01 : f32
    %533 = vector.broadcast %cst_153 : f32 to vector<8x128xf32>
    %534 = arith.mulf %533, %532 : vector<8x128xf32>
    %cst_154 = arith.constant 5.000000e-01 : f32
    %535 = vector.broadcast %cst_154 : f32 to vector<8x128xf32>
    %536 = arith.addf %534, %535 : vector<8x128xf32>
    %537 = math.tanh %529 : vector<8x128xf32>
    %538 = vector.extract_strided_slice %536 {offsets = [0, 0], sizes = [8, 32], strides = [1, 1]} : vector<8x128xf32> to vector<8x32xf32>
    %539 = vector.extract_strided_slice %536 {offsets = [0, 32], sizes = [8, 32], strides = [1, 1]} : vector<8x128xf32> to vector<8x32xf32>
    %540 = vector.extract_strided_slice %537 {offsets = [0, 64], sizes = [8, 32], strides = [1, 1]} : vector<8x128xf32> to vector<8x32xf32>
    %541 = vector.extract_strided_slice %536 {offsets = [0, 96], sizes = [8, 32], strides = [1, 1]} : vector<8x128xf32> to vector<8x32xf32>
    %542 = arith.mulf %539, %493 : vector<8x32xf32>
    %543 = arith.mulf %538, %540 : vector<8x32xf32>
    %544 = arith.addf %542, %543 : vector<8x32xf32>
    %545 = math.tanh %544 : vector<8x32xf32>
    %546 = arith.mulf %541, %545 : vector<8x32xf32>
    %547 = arith.truncf %546 : vector<8x32xf32> to vector<8x32xbf16>
    %cst_155 = arith.constant dense<0.000000e+00> : vector<8x128xf32>
    %548 = tpu.matmul %547, %366, %cst_155 {dimension_numbers = #tpu.dot_dimension_numbers<[1], [0], [0], [1], [0, 0, 1, 1], [], []>} : vector<8x32xbf16>, vector<32x128xbf16>, vector<8x128xf32> -> vector<8x128xf32>
    %cst_156 = arith.constant dense<0.000000e+00> : vector<8x128xf32>
    %549 = tpu.matmul %519, %367, %cst_156 {dimension_numbers = #tpu.dot_dimension_numbers<[1], [0], [0], [1], [0, 0, 1, 1], [], []>} : vector<8x32xbf16>, vector<32x128xbf16>, vector<8x128xf32> -> vector<8x128xf32>
    %550 = arith.addf %548, %549 : vector<8x128xf32>
    %551 = vector.broadcast %368 : vector<1x128xf32> to vector<8x128xf32>
    %552 = arith.addf %550, %551 : vector<8x128xf32>
    %cst_157 = arith.constant 5.000000e-01 : f32
    %553 = vector.broadcast %cst_157 : f32 to vector<8x128xf32>
    %554 = arith.mulf %553, %552 : vector<8x128xf32>
    %555 = math.tanh %554 : vector<8x128xf32>
    %cst_158 = arith.constant 5.000000e-01 : f32
    %556 = vector.broadcast %cst_158 : f32 to vector<8x128xf32>
    %557 = arith.mulf %556, %555 : vector<8x128xf32>
    %cst_159 = arith.constant 5.000000e-01 : f32
    %558 = vector.broadcast %cst_159 : f32 to vector<8x128xf32>
    %559 = arith.addf %557, %558 : vector<8x128xf32>
    %560 = math.tanh %552 : vector<8x128xf32>
    %561 = vector.extract_strided_slice %559 {offsets = [0, 0], sizes = [8, 32], strides = [1, 1]} : vector<8x128xf32> to vector<8x32xf32>
    %562 = vector.extract_strided_slice %559 {offsets = [0, 32], sizes = [8, 32], strides = [1, 1]} : vector<8x128xf32> to vector<8x32xf32>
    %563 = vector.extract_strided_slice %560 {offsets = [0, 64], sizes = [8, 32], strides = [1, 1]} : vector<8x128xf32> to vector<8x32xf32>
    %564 = vector.extract_strided_slice %559 {offsets = [0, 96], sizes = [8, 32], strides = [1, 1]} : vector<8x128xf32> to vector<8x32xf32>
    %565 = arith.mulf %562, %516 : vector<8x32xf32>
    %566 = arith.mulf %561, %563 : vector<8x32xf32>
    %567 = arith.addf %565, %566 : vector<8x32xf32>
    %568 = math.tanh %567 : vector<8x32xf32>
    %569 = arith.mulf %564, %568 : vector<8x32xf32>
    %570 = arith.truncf %569 : vector<8x32xf32> to vector<8x32xbf16>
    %cst_160 = arith.constant dense<0.000000e+00> : vector<8x8xf32>
    %571 = tpu.matmul %570, %369, %cst_160 {dimension_numbers = #tpu.dot_dimension_numbers<[1], [0], [0], [1], [0, 0, 1, 1], [], []>} : vector<8x32xbf16>, vector<32x8xbf16>, vector<8x8xf32> -> vector<8x8xf32>
    %572 = vector.broadcast %370 : vector<1x8xf32> to vector<8x8xf32>
    %573 = arith.addf %571, %572 : vector<8x8xf32>
    %c24_161 = arith.constant 24 : index
    %c0_162 = arith.constant 0 : index
    %574 = vector.load %arg15[%c24_161, %c0_162] : memref<40x8xf32, #tpu.memory_space<vmem>>, vector<8x8xf32>
    tpu.vector_store %arg15[%c24_161, %c0_162], %573 {strides = array<i32>} : memref<40x8xf32, #tpu.memory_space<vmem>>, vector<8x8xf32>,
    %575 = arith.truncf %573 : vector<8x8xf32> to vector<8x8xbf16>
    %cst_163 = arith.constant dense<0.000000e+00> : vector<8x128xf32>
    %576 = tpu.matmul %575, %363, %cst_163 {dimension_numbers = #tpu.dot_dimension_numbers<[1], [0], [0], [1], [0, 0, 1, 1], [], []>} : vector<8x8xbf16>, vector<8x128xbf16>, vector<8x128xf32> -> vector<8x128xf32>
    %cst_164 = arith.constant dense<0.000000e+00> : vector<8x128xf32>
    %577 = tpu.matmul %547, %364, %cst_164 {dimension_numbers = #tpu.dot_dimension_numbers<[1], [0], [0], [1], [0, 0, 1, 1], [], []>} : vector<8x32xbf16>, vector<32x128xbf16>, vector<8x128xf32> -> vector<8x128xf32>
    %578 = arith.addf %576, %577 : vector<8x128xf32>
    %579 = vector.broadcast %365 : vector<1x128xf32> to vector<8x128xf32>
    %580 = arith.addf %578, %579 : vector<8x128xf32>
    %cst_165 = arith.constant 5.000000e-01 : f32
    %581 = vector.broadcast %cst_165 : f32 to vector<8x128xf32>
    %582 = arith.mulf %581, %580 : vector<8x128xf32>
    %583 = math.tanh %582 : vector<8x128xf32>
    %cst_166 = arith.constant 5.000000e-01 : f32
    %584 = vector.broadcast %cst_166 : f32 to vector<8x128xf32>
    %585 = arith.mulf %584, %583 : vector<8x128xf32>
    %cst_167 = arith.constant 5.000000e-01 : f32
    %586 = vector.broadcast %cst_167 : f32 to vector<8x128xf32>
    %587 = arith.addf %585, %586 : vector<8x128xf32>
    %588 = math.tanh %580 : vector<8x128xf32>
    %589 = vector.extract_strided_slice %587 {offsets = [0, 0], sizes = [8, 32], strides = [1, 1]} : vector<8x128xf32> to vector<8x32xf32>
    %590 = vector.extract_strided_slice %587 {offsets = [0, 32], sizes = [8, 32], strides = [1, 1]} : vector<8x128xf32> to vector<8x32xf32>
    %591 = vector.extract_strided_slice %588 {offsets = [0, 64], sizes = [8, 32], strides = [1, 1]} : vector<8x128xf32> to vector<8x32xf32>
    %592 = vector.extract_strided_slice %587 {offsets = [0, 96], sizes = [8, 32], strides = [1, 1]} : vector<8x128xf32> to vector<8x32xf32>
    %593 = arith.mulf %590, %544 : vector<8x32xf32>
    %594 = arith.mulf %589, %591 : vector<8x32xf32>
    %595 = arith.addf %593, %594 : vector<8x32xf32>
    %596 = math.tanh %595 : vector<8x32xf32>
    %597 = arith.mulf %592, %596 : vector<8x32xf32>
    %598 = arith.truncf %597 : vector<8x32xf32> to vector<8x32xbf16>
    %cst_168 = arith.constant dense<0.000000e+00> : vector<8x128xf32>
    %599 = tpu.matmul %598, %366, %cst_168 {dimension_numbers = #tpu.dot_dimension_numbers<[1], [0], [0], [1], [0, 0, 1, 1], [], []>} : vector<8x32xbf16>, vector<32x128xbf16>, vector<8x128xf32> -> vector<8x128xf32>
    %cst_169 = arith.constant dense<0.000000e+00> : vector<8x128xf32>
    %600 = tpu.matmul %570, %367, %cst_169 {dimension_numbers = #tpu.dot_dimension_numbers<[1], [0], [0], [1], [0, 0, 1, 1], [], []>} : vector<8x32xbf16>, vector<32x128xbf16>, vector<8x128xf32> -> vector<8x128xf32>
    %601 = arith.addf %599, %600 : vector<8x128xf32>
    %602 = vector.broadcast %368 : vector<1x128xf32> to vector<8x128xf32>
    %603 = arith.addf %601, %602 : vector<8x128xf32>
    %cst_170 = arith.constant 5.000000e-01 : f32
    %604 = vector.broadcast %cst_170 : f32 to vector<8x128xf32>
    %605 = arith.mulf %604, %603 : vector<8x128xf32>
    %606 = math.tanh %605 : vector<8x128xf32>
    %cst_171 = arith.constant 5.000000e-01 : f32
    %607 = vector.broadcast %cst_171 : f32 to vector<8x128xf32>
    %608 = arith.mulf %607, %606 : vector<8x128xf32>
    %cst_172 = arith.constant 5.000000e-01 : f32
    %609 = vector.broadcast %cst_172 : f32 to vector<8x128xf32>
    %610 = arith.addf %608, %609 : vector<8x128xf32>
    %611 = math.tanh %603 : vector<8x128xf32>
    %612 = vector.extract_strided_slice %610 {offsets = [0, 0], sizes = [8, 32], strides = [1, 1]} : vector<8x128xf32> to vector<8x32xf32>
    %613 = vector.extract_strided_slice %610 {offsets = [0, 32], sizes = [8, 32], strides = [1, 1]} : vector<8x128xf32> to vector<8x32xf32>
    %614 = vector.extract_strided_slice %611 {offsets = [0, 64], sizes = [8, 32], strides = [1, 1]} : vector<8x128xf32> to vector<8x32xf32>
    %615 = vector.extract_strided_slice %610 {offsets = [0, 96], sizes = [8, 32], strides = [1, 1]} : vector<8x128xf32> to vector<8x32xf32>
    %616 = arith.mulf %613, %567 : vector<8x32xf32>
    %617 = arith.mulf %612, %614 : vector<8x32xf32>
    %618 = arith.addf %616, %617 : vector<8x32xf32>
    %619 = math.tanh %618 : vector<8x32xf32>
    %620 = arith.mulf %615, %619 : vector<8x32xf32>
    %621 = arith.truncf %620 : vector<8x32xf32> to vector<8x32xbf16>
    %cst_173 = arith.constant dense<0.000000e+00> : vector<8x8xf32>
    %622 = tpu.matmul %621, %369, %cst_173 {dimension_numbers = #tpu.dot_dimension_numbers<[1], [0], [0], [1], [0, 0, 1, 1], [], []>} : vector<8x32xbf16>, vector<32x8xbf16>, vector<8x8xf32> -> vector<8x8xf32>
    %623 = vector.broadcast %370 : vector<1x8xf32> to vector<8x8xf32>
    %624 = arith.addf %622, %623 : vector<8x8xf32>
    %c32_174 = arith.constant 32 : index
    %c0_175 = arith.constant 0 : index
    %625 = vector.load %arg15[%c32_174, %c0_175] : memref<40x8xf32, #tpu.memory_space<vmem>>, vector<8x8xf32>
    tpu.vector_store %arg15[%c32_174, %c0_175], %624 {strides = array<i32>} : memref<40x8xf32, #tpu.memory_space<vmem>>, vector<8x8xf32>,
    return
  }
}

</mosaic_0001>

<bundles_post_ra>
// kernel: tpu_custom_call.1
= control target key start
LH: loop header
LB: loop body
LE: loop exit
PB: predicated region body
PF: predicated region fallthrough
CT: control target
= control target key end

     0   :  { %20 = vsyncpa [#allocation4], 0  ;;  %s4631_s0 = inlined_call_operand.vmem [shape: bf16[64,8], index: 0, kind: input, shape index: {}]   ;;  %s4632_s1 = inlined_call_operand.hbm [shape: bf16[8,128], index: 1, kind: input, shape index: {}]   ;;  %s4633_s2 = inlined_call_operand.vmem [shape: bf16[32,128], index: 2, kind: input, shape index: {}]   ;;  %s4634_s3 = inlined_call_operand.vmem [shape: f32[1,128], index: 3, kind: input, shape index: {}]   ;;  %s4635_s4 = inlined_call_operand.vmem [shape: bf16[32,128], index: 4, kind: input, shape index: {}]   ;;  %s4636_s5 = inlined_call_operand.vmem [shape: bf16[32,128], index: 5, kind: input, shape index: {}]   ;;  %s4637_s6 = inlined_call_operand.hbm [shape: f32[1,128], index: 6, kind: input, shape index: {}]   ;;  %s4638_s7 = inlined_call_operand.hbm [shape: bf16[8,128], index: 7, kind: input, shape index: {}]   ;;  %s4639_s8 = inlined_call_operand.vmem [shape: bf16[32,128], index: 8, kind: input, shape index: {}]   ;;  %s4640_s9 = inlined_call_operand.hbm [shape: f32[1,128], index: 9, kind: input, shape index: {}]   ;;  %s4641_s10 = inlined_call_operand.vmem [shape: bf16[32,128], index: 10, kind: input, shape index: {}]   ;;  %s4642_s11 = inlined_call_operand.vmem [shape: bf16[32,128], index: 11, kind: input, shape index: {}]   ;;  %s4643_s12 = inlined_call_operand.hbm [shape: f32[1,128], index: 12, kind: input, shape index: {}]   ;;  %s4644_s13 = inlined_call_operand.vmem [shape: bf16[32,8], index: 13, kind: input, shape index: {}]   ;;  %s4645_s14 = inlined_call_operand.vmem [shape: f32[1,8], index: 14, kind: input, shape index: {}]   ;;  %s4646_s15 = inlined_call_operand.vmem [shape: f32[40,8], index: 15, kind: output, shape index: {}]  }
   0x1   :  { %21 = vsyncpa [#allocation6], 0 }
   0x2   :  { %22 = vsyncpa [#allocation9], 0  ;;  %s3796_s18 = smov [#allocation5]   ;;  %s3797_s20 = smov [#allocation8]  }
   0x3   :  { %s49_s19 = sshll.u32 %s3796_s18, 4  ;;  %s71_s21 = sshll.u32 %s3797_s20, 4  ;;  %s50_s19 = int_to_ptr.vmem [resolvable:$true] %s49_s19  ;;  %s72_s21 = int_to_ptr.vmem [resolvable:$true] %s71_s21 }
   0x4   :  { %s3680_s24 = scalar_lea.hbm %s4637_s6, 16 }
   0x5   :  { %p3681_p0 = scmp.ne.s32.totalorder %s4637_s6, %s3680_s24  ;;  %p3684_p1 = scmp.lt.u32.totalorder %s3680_s24, %s4637_s6 }
   0x7   :  { %p3686_p2 = pnand %p3684_p1, %p3681_p0 }
   0x9   :  { %3689 = shalt.err (!%p3686_p2)
}
   0xa   :  { %s3690_s29 = scalar_lea.vmem %s50_s19, 16  ;;  %s3694_s30 = scalar_lea.vmem %s50_s19, 32 }
   0xb   :  { %p3691_p3 = scmp.ne.s32.totalorder %s50_s19, %s3690_s29  ;;  %p3695_p4 = scmp.lt.s32.totalorder %s50_s19, %s50_s19 }
   0xc   :  { %p3696_p5 = scmp.lt.s32.totalorder %s3694_s30, %s3690_s29 }
   0xe   :  { %p3697_p6 = por %p3696_p5, %p3695_p4 }
  0x10   :  { %p3698_p7 = pnand %p3697_p6, %p3691_p3 }
  0x12   :  { %3701 = shalt.err (!%p3698_p7)
}
  0x13   :  { %52 = dma.hbm_to_vmem [thread:$0]  %s4637_s6, 16, %s50_s19, [#allocation6]  }
  0x14   :  { %s3702_s22 = scalar_lea.hbm %s4640_s9, 16 }
  0x15   :  { %p3703_p8 = scmp.ne.s32.totalorder %s4640_s9, %s3702_s22  ;;  %p3706_p9 = scmp.lt.u32.totalorder %s3702_s22, %s4640_s9 }
  0x17   :  { %p3708_p10 = pnand %p3706_p9, %p3703_p8 }
  0x19   :  { %3711 = shalt.err (!%p3708_p10)
}
  0x1a   :  { %s3712_s27 = scalar_lea.vmem %s72_s21, 16  ;;  %s3716_s28 = scalar_lea.vmem %s72_s21, 32 }
  0x1b   :  { %p3713_p11 = scmp.ne.s32.totalorder %s72_s21, %s3712_s27  ;;  %p3717_p12 = scmp.lt.s32.totalorder %s72_s21, %s72_s21 }
  0x1c   :  { %p3718_p13 = scmp.lt.s32.totalorder %s3716_s28, %s3712_s27 }
  0x1e   :  { %p3719_p0 = por %p3718_p13, %p3717_p12 }
  0x20   :  { %p3720_p1 = pnand %p3719_p0, %p3713_p11 }
  0x22   :  { %3723 = shalt.err (!%p3720_p1)
}
  0x23   :  { %74 = dma.hbm_to_vmem [thread:$0]  %s4640_s9, 16, %s72_s21, [#allocation9]  }
  0x24   :  { %s3798_s29 = smov [#allocation3]   ;;  %s3799_s16 = smov [#allocation7]  }
  0x25   :  { %s31_s30 = sshll.u32 %s3798_s29, 4  ;;  %s59_s17 = sshll.u32 %s3799_s16, 4  ;;  %s32_s30 = int_to_ptr.vmem [resolvable:$true] %s31_s30  ;;  %s60_s17 = int_to_ptr.vmem [resolvable:$true] %s59_s17 }
  0x26   :  { %s3724_s22 = scalar_lea.hbm %s4632_s1, 64 }
  0x27   :  { %p3725_p2 = scmp.ne.s32.totalorder %s4632_s1, %s3724_s22  ;;  %p3728_p3 = scmp.lt.u32.totalorder %s3724_s22, %s4632_s1 }
  0x29   :  { %p3730_p4 = pnand %p3728_p3, %p3725_p2 }
  0x2b   :  { %3733 = shalt.err (!%p3730_p4)
}
  0x2c   :  { %s3734_s9 = scalar_lea.vmem %s32_s30, 64  ;;  %p3739_p6 = scmp.lt.s32.totalorder %s32_s30, %s32_s30 }
  0x2d   :  { %p3735_p5 = scmp.ne.s32.totalorder %s32_s30, %s3734_s9  ;;  %p3740_p7 = scmp.lt.s32.totalorder %s3734_s9, %s3734_s9 }
  0x2f   :  { %p3741_p8 = por %p3740_p7, %p3739_p6 }
  0x31   :  { %p3742_p9 = pnand %p3741_p8, %p3735_p5 }
  0x33   :  { %3745 = shalt.err (!%p3742_p9)
}
  0x34   :  { %34 = dma.hbm_to_vmem [thread:$0]  %s4632_s1, 64, %s32_s30, [#allocation4]  }
  0x35   :  { %s3746_s19 = scalar_lea.hbm %s4638_s7, 64 }
  0x36   :  { %p3747_p10 = scmp.ne.s32.totalorder %s4638_s7, %s3746_s19  ;;  %p3750_p11 = scmp.lt.u32.totalorder %s3746_s19, %s4638_s7 }
  0x38   :  { %p3752_p12 = pnand %p3750_p11, %p3747_p10 }
  0x3a   :  { %3755 = shalt.err (!%p3752_p12)
}
  0x3b   :  { %s3756_s22 = scalar_lea.vmem %s60_s17, 64  ;;  %p3761_p0 = scmp.lt.s32.totalorder %s60_s17, %s60_s17 }
  0x3c   :  { %p3757_p13 = scmp.ne.s32.totalorder %s60_s17, %s3756_s22  ;;  %p3762_p1 = scmp.lt.s32.totalorder %s3756_s22, %s3756_s22 }
  0x3e   :  { %p3763_p2 = por %p3762_p1, %p3761_p0 }
  0x40   :  { %p3764_p3 = pnand %p3763_p2, %p3757_p13 }
  0x42   :  { %3767 = shalt.err (!%p3764_p3)
}
  0x43   :  { %62 = dma.hbm_to_vmem [thread:$0]  %s4638_s7, 64, %s60_s17, [#allocation6]  }
  0x44   :  { %s3800_s23 = smov [#allocation10]   ;;  %s3768_s9 = scalar_lea.hbm %s4643_s12, 16 }
  0x45   :  { %s85_s24 = sshll.u32 %s3800_s23, 4  ;;  %p3769_p4 = scmp.ne.s32.totalorder %s4643_s12, %s3768_s9  ;;  %s86_s24 = int_to_ptr.vmem [resolvable:$true] %s85_s24 }
  0x46   :  { %p3772_p5 = scmp.lt.u32.totalorder %s3768_s9, %s4643_s12 }
  0x48   :  { %p3774_p6 = pnand %p3772_p5, %p3769_p4 }
  0x4a   :  { %3777 = shalt.err (!%p3774_p6)
}
  0x4b   :  { %s3778_s19 = scalar_lea.vmem %s86_s24, 16  ;;  %s3782_s7 = scalar_lea.vmem %s86_s24, 32 }
  0x4c   :  { %p3779_p7 = scmp.ne.s32.totalorder %s86_s24, %s3778_s19  ;;  %p3783_p8 = scmp.lt.s32.totalorder %s86_s24, %s86_s24 }
  0x4d   :  { %p3784_p9 = scmp.lt.s32.totalorder %s3782_s7, %s3778_s19 }
  0x4f   :  { %p3785_p10 = por %p3784_p9, %p3783_p8 }
  0x51   :  { %p3786_p11 = pnand %p3785_p10, %p3779_p7 }
  0x53   :  { %3789 = shalt.err (!%p3786_p11)
}
  0x54   :  { %88 = dma.hbm_to_vmem [thread:$0]  %s4643_s12, 16, %s86_s24, [#allocation9]  }
  0x55   :  { %3790 = dma.done.wait [#allocation4], 64  }
  0x56   :  { %3791 = vsyncadd [#allocation4], 4294967232 }
  0x57   :  { %3792 = dma.done.wait [#allocation6], 80  }
  0x58   :  { %3793 = vsyncadd [#allocation6], 4294967216 }
  0x59   :  { %3794 = dma.done.wait [#allocation9], 32  }
  0x5a   :  { %3795 = vsyncadd [#allocation9], 4294967264  ;;  %v3801_v0 = vmov 0.0   ;;  %vm3802_vm0 = vmmov 0   ;;  %vm162_vm1 = vcmask 1043456   ;;  %vm149_vm2 = vcmask 64512  }
  0x5b   :  { %3165 = vmatprep.subr.bf16.mxu1 %v3801_v0  ;;  %3169 = vmatprep.mubr.msk.bf16.mxu1 %vm3802_vm0, %v3801_v0  ;;  %v109_v1 = vld [vmem:[#allocation3] sm:$0xf]  ;;  %v3508_v5 = vld [vmem:[%s4631_s0 + $0x8] sm:$0xff]   ;;  %v3803_v7 = vmov 0   ;;  %s3804_s25 = smov 64   ;;  %vm243_vm3 = vcmask 261120  }
  0x5c   :  { %3495 = vmatprep.subr.msk.bf16.mxu0 %vm162_vm1, %v109_v1  ;;  %v164_v2 = vsel %vm162_vm1, %v109_v1, 0  ;;  %v3954_v3 = vld [vmem:[%s4633_s2] sm:$0xff]   ;;  %v3968_v6 = vld [vmem:[%s4633_s2 + $0x8] sm:$0xff]   ;;  %v3510_v50 = vld [vmem:[%s4631_s0 + $0x10] sm:$0xff]  }
  0x5d   :  { %v3507_v4 = vld [vmem:[%s4631_s0] sm:$0xff]   ;;  %3156 = vmatpush3.bf16.msra.mxu0 %v164_v2  ;;  %3166 = vmatpush3.bf16.msra.mxu1 %v3954_v3  ;;  %v3511_v51 = vld [vmem:[%s4631_s0 + $0x18] sm:$0xff]  }
  0x5e   :  { %3157 = vmatprep.mubr.msk.bf16.mxu0 %vm149_vm2, %v3507_v4  ;;  %3167 = vmatprep.subr.bf16.mxu1 %v3801_v0  ;;  %v3988_v8 = vld [vmem:[%s4634_s3] ss:$0 sm:$0xff]  ;;  %s3805_s3 = smov 32  }
  0x5f   :  { %3181 = vmatprep.subr.bf16.mxu0 %v3801_v0 }
  0x60   :  { %3158 = vmatmul.mubr.msk.bf16.vlgmr.msra.gmra.mrb[0].mxu0 %vm149_vm2, %v3508_v5 }
  0x61   :  { %3182 = vmatpush3.bf16.msra.mxu0 %v3954_v3  ;;  %3168 = vmatpush3.bf16.msra.mxu1 %v3968_v6 }
  0x62   :  { %3183 = vmatprep.subr.bf16.mxu0 %v3801_v0  ;;  %3173 = vmatprep.subr.bf16.mxu1 %v3801_v0 }
  0x63   :  { %3161 = vmatprep.mubr.msk.bf16.mxu0 %vm149_vm2, %v3510_v50 }
  0x64   :  { %3170 = vmatmul.mubr.bf16.vlgmr.msra.gmra.mrb[0].mxu1 %v3803_v7 }
  0x65   :  { %3184 = vmatpush3.bf16.msra.mxu0 %v3968_v6  ;;  %3174 = vmatpush3.bf16.msra.mxu1 %v3954_v3 }
  0x66   :  { %3177 = vmatprep.mubr.msk.bf16.mxu1 %vm3802_vm0, %v3801_v0  ;;  %3175 = vmatprep.subr.bf16.mxu1 %v3801_v0 }
  0x67   :  { %3197 = vmatprep.subr.bf16.mxu0 %v3801_v0 }
  0x68   :  { %3162 = vmatmul.mubr.msk.bf16.gmra.mrb[4].mxu0 %vm149_vm2, %v3511_v51 }
  0x69   :  { %3176 = vmatpush3.bf16.msra.mxu1 %v3968_v6  ;;  %3185 = vmatprep.mubr.msk.bf16.mxu0 %vm3802_vm0, %v3801_v0 }
  0x6a   :  { %3189 = vmatprep.subr.bf16.mxu1 %v3801_v0 }
 0x133   :  { %v3990_v9 = vpop.f32.mrb[0].mxu0 }
 0x134   :  { %v200_v10 = vpop.f32.mrb[1].mxu0  ;;  %v209_v61 = vadd.f32 %v3990_v9, %v3988_v8 }
 0x135   :  { %v201_v11 = vadd.f32 %v3988_v8, %v200_v10  ;;  %v3993_v12 = vpop.f32.mrb[2].mxu0 }
 0x136   :  { %v203_v13 = vpop.f32.mrb[3].mxu0 }
 0x137   :  { %v281_v14 = vpop.f32.mrb[0].mxu1  ;;  %v204_v34 = vadd.f32 %v3988_v8, %v203_v13 }
 0x138   :  { %v287_v15 = vadd.f32 %v281_v14, %v201_v11  ;;  %v3171_v16 = vpop.f32.mrb[1].mxu1 }
 0x139   :  { %v284_v17 = vpop.f32.mrb[2].mxu1 }
 0x13a   :  { %3524 = vtanh.f32 %v287_v15  ;;  %v3172_v18 = vpop.f32.mrb[3].mxu1  ;;  %v288_v20 = vmul.f32 0.5, %v287_v15 }
 0x13b   :  { %v4029_v56 = vpop.f32.mrb[4].mxu0 }
 0x13c   :  { %3526 = vtanh.f32 %v288_v20  ;;  %v4031_v57 = vpop.f32.mrb[5].mxu0 }
 0x13d   :  { %v4033_v58 = vpop.f32.mrb[6].mxu0 }
 0x13e   :  { %v4035_v59 = vpop.f32.mrb[7].mxu0 }
 0x144   :  { %v3525_v19 = vpop.eup %3524 }
 0x145   :  { %295 = vrot.lane.b32.xlu0 %v3525_v19, %s3804_s25 }
 0x146   :  { %v3527_v21 = vpop.eup %3526 }
 0x147   :  { %v290_v22 = vmul.f32 0.5, %v3527_v21 }
 0x149   :  { %v291_v23 = vadd.f32 0.5, %v290_v22 }
 0x14b   :  { %v293_v26 = vmul.f32 0.0, %v291_v23 }
 0x1b7   :  { %v296_v24 = vpop.permute.xlu0 %295 }
 0x1b8   :  { %v298_v25 = vmul.f32 %v296_v24, %v291_v23  ;;  %v212_v24 = vadd.f32 %v3993_v12, %v3988_v8 }
 0x1ba   :  { %300 = vrot.lane.b32.xlu0 %v298_v25, %s3805_s3 }
 0x22c   :  { %v301_v27 = vpop.permute.xlu0 %300 }
 0x22d   :  { %v303_v28 = vadd.f32 %v301_v27, %v293_v26 }
 0x22f   :  { %3528 = vtanh.f32 %v303_v28 }
 0x239   :  { %v3529_v29 = vpop.eup %3528 }
 0x23a   :  { %306 = vrot.lane.b32.xlu1 %v3529_v29, %s3804_s25 }
 0x2ac   :  { %v307_v30 = vpop.permute.xlu1 %306 }
 0x2ad   :  { %v3998_v31 = vmul.f32 %v307_v30, %v291_v23 }
 0x2af   :  { %v310_v32 = vpack.c.bf16 %v3998_v31, %v3998_v31 }
 0x2b1   :  { %317 = vrot.lane.b32.xlu1 %v310_v32, %s3805_s3 }
 0x323   :  { %v318_v33 = vpop.permute.xlu1 %317 }
 0x324   :  { %3178 = vmatmul.mubr.msk.bf16.vlgmr.msra.gmra.mrb[4].mxu1 %vm243_vm3, %v318_v33 }
 0x325   :  { %3190 = vmatpush3.bf16.msra.mxu1 %v3954_v3  ;;  %3193 = vmatprep.mubr.msk.bf16.mxu1 %vm3802_vm0, %v3801_v0 }
 0x326   :  { %3191 = vmatprep.subr.bf16.mxu1 %v3801_v0 }
 0x329   :  { %3192 = vmatpush3.bf16.msra.mxu1 %v3968_v6 }
 0x32a   :  { %3205 = vmatprep.subr.bf16.mxu1 %v3801_v0 }
 0x3f7   :  { %v356_v35 = vpop.f32.mrb[4].mxu1 }
 0x3f8   :  { %v362_v36 = vadd.f32 %v356_v35, %v204_v34  ;;  %v3179_v37 = vpop.f32.mrb[5].mxu1 }
 0x3f9   :  { %v359_v38 = vpop.f32.mrb[6].mxu1 }
 0x3fa   :  { %3530 = vtanh.f32 %v362_v36  ;;  %v3180_v39 = vpop.f32.mrb[7].mxu1  ;;  %v363_v41 = vmul.f32 0.5, %v362_v36 }
 0x3fc   :  { %3532 = vtanh.f32 %v363_v41 }
 0x404   :  { %v3531_v40 = vpop.eup %3530 }
 0x405   :  { %370 = vrot.lane.b32.xlu0 %v3531_v40, %s3804_s25 }
 0x406   :  { %v3533_v42 = vpop.eup %3532 }
 0x407   :  { %v365_v43 = vmul.f32 0.5, %v3533_v42 }
 0x409   :  { %v366_v44 = vadd.f32 0.5, %v365_v43 }
 0x40b   :  { %v368_v47 = vmul.f32 %v366_v44, %v303_v28 }
 0x477   :  { %v371_v45 = vpop.permute.xlu0 %370 }
 0x478   :  { %v373_v46 = vmul.f32 %v371_v45, %v366_v44  ;;  %v217_v45 = vadd.f32 %v3988_v8, %v4031_v57 }
 0x47a   :  { %375 = vrot.lane.b32.xlu1 %v373_v46, %s3805_s3 }
 0x4ec   :  { %v376_v48 = vpop.permute.xlu1 %375 }
 0x4ed   :  { %v378_v49 = vadd.f32 %v376_v48, %v368_v47 }
 0x4ef   :  { %3534 = vtanh.f32 %v378_v49 }
 0x4f9   :  { %v3535_v52 = vpop.eup %3534 }
 0x4fa   :  { %381 = vrot.lane.b32.xlu0 %v3535_v52, %s3804_s25 }
 0x56c   :  { %v382_v53 = vpop.permute.xlu0 %381 }
 0x56d   :  { %v4024_v54 = vmul.f32 %v382_v53, %v366_v44 }
 0x56f   :  { %v385_v55 = vpack.c.bf16 %v4024_v54, %v4024_v54 }
 0x571   :  { %392 = vrot.lane.b32.xlu1 %v385_v55, %s3805_s3 }
 0x5e3   :  { %v393_v60 = vpop.permute.xlu1 %392 }
 0x5e4   :  { %3186 = vmatmul.mubr.msk.bf16.vlgmr.msra.gmra.mrb[8].mxu0 %vm243_vm3, %v393_v60 }
 0x5e5   :  { %3198 = vmatpush3.bf16.msra.mxu0 %v3954_v3  ;;  %3201 = vmatprep.mubr.msk.bf16.mxu0 %vm3802_vm0, %v3801_v0 }
 0x5e6   :  { %3199 = vmatprep.subr.bf16.mxu0 %v3801_v0 }
 0x5e9   :  { %3200 = vmatpush3.bf16.msra.mxu0 %v3968_v6 }
 0x5ea   :  { %3213 = vmatprep.subr.bf16.mxu0 %v3801_v0 }
 0x6b7   :  { %v431_v62 = vpop.f32.mrb[8].mxu0 }
 0x6b8   :  { %v437_v63 = vadd.f32 %v431_v62, %v209_v61  ;;  %v3187_v1 = vpop.f32.mrb[9].mxu0 }
 0x6b9   :  { %v434_v2 = vpop.f32.mrb[10].mxu0 }
 0x6ba   :  { %3536 = vtanh.f32 %v437_v63  ;;  %v3188_v4 = vpop.f32.mrb[11].mxu0  ;;  %v438_v10 = vmul.f32 0.5, %v437_v63 }
 0x6bc   :  { %3538 = vtanh.f32 %v438_v10 }
 0x6c4   :  { %v3537_v5 = vpop.eup %3536 }
 0x6c5   :  { %445 = vrot.lane.b32.xlu0 %v3537_v5, %s3804_s25 }
 0x6c6   :  { %v3539_v11 = vpop.eup %3538 }
 0x6c7   :  { %v440_v13 = vmul.f32 0.5, %v3539_v11 }
 0x6c9   :  { %v441_v14 = vadd.f32 0.5, %v440_v13  ;;  %v220_v13 = vadd.f32 %v3988_v8, %v4035_v59 }
 0x6cb   :  { %v443_v17 = vmul.f32 %v441_v14, %v378_v49 }
 0x737   :  { %v446_v15 = vpop.permute.xlu0 %445 }
 0x738   :  { %v448_v16 = vmul.f32 %v446_v15, %v441_v14 }
 0x73a   :  { %450 = vrot.lane.b32.xlu1 %v448_v16, %s3805_s3 }
 0x7ac   :  { %v451_v9 = vpop.permute.xlu1 %450 }
 0x7ad   :  { %v453_v18 = vadd.f32 %v451_v9, %v443_v17 }
 0x7af   :  { %3540 = vtanh.f32 %v453_v18 }
 0x7b9   :  { %v3541_v19 = vpop.eup %3540 }
 0x7ba   :  { %456 = vrot.lane.b32.xlu0 %v3541_v19, %s3804_s25 }
 0x82c   :  { %v457_v20 = vpop.permute.xlu0 %456 }
 0x82d   :  { %v4049_v21 = vmul.f32 %v457_v20, %v441_v14 }
 0x82f   :  { %v460_v22 = vpack.c.bf16 %v4049_v21, %v4049_v21 }
 0x831   :  { %467 = vrot.lane.b32.xlu1 %v460_v22, %s3805_s3 }
 0x8a3   :  { %v468_v23 = vpop.permute.xlu1 %467 }
 0x8a4   :  { %3194 = vmatmul.mubr.msk.bf16.vlgmr.msra.gmra.mrb[8].mxu1 %vm243_vm3, %v468_v23 }
 0x8a5   :  { %3206 = vmatpush3.bf16.msra.mxu1 %v3954_v3  ;;  %3209 = vmatprep.mubr.msk.bf16.mxu1 %vm3802_vm0, %v3801_v0 }
 0x8a6   :  { %3207 = vmatprep.subr.bf16.mxu1 %v3801_v0 }
 0x8a9   :  { %3208 = vmatpush3.bf16.msra.mxu1 %v3968_v6 }
 0x8aa   :  { %3221 = vmatprep.subr.bf16.mxu1 %v3801_v0 }
 0x977   :  { %v506_v25 = vpop.f32.mrb[8].mxu1 }
 0x978   :  { %v512_v26 = vadd.f32 %v506_v25, %v212_v24  ;;  %v3195_v27 = vpop.f32.mrb[9].mxu1 }
 0x979   :  { %v509_v28 = vpop.f32.mrb[10].mxu1 }
 0x97a   :  { %3542 = vtanh.f32 %v512_v26  ;;  %v3196_v29 = vpop.f32.mrb[11].mxu1  ;;  %v513_v32 = vmul.f32 0.5, %v512_v26 }
 0x97c   :  { %3544 = vtanh.f32 %v513_v32  ;;  %v225_v32 = vadd.f32 %v4029_v56, %v3988_v8 }
 0x984   :  { %v3543_v30 = vpop.eup %3542 }
 0x985   :  { %520 = vrot.lane.b32.xlu0 %v3543_v30, %s3804_s25 }
 0x986   :  { %v3545_v33 = vpop.eup %3544 }
 0x987   :  { %v515_v34 = vmul.f32 0.5, %v3545_v33 }
 0x989   :  { %v516_v35 = vadd.f32 0.5, %v515_v34 }
 0x98b   :  { %v518_v38 = vmul.f32 %v516_v35, %v453_v18 }
 0x9f7   :  { %v521_v36 = vpop.permute.xlu0 %520 }
 0x9f8   :  { %v523_v37 = vmul.f32 %v521_v36, %v516_v35 }
 0x9fa   :  { %525 = vrot.lane.b32.xlu1 %v523_v37, %s3805_s3 }
 0xa6c   :  { %v526_v12 = vpop.permute.xlu1 %525 }
 0xa6d   :  { %v528_v39 = vadd.f32 %v526_v12, %v518_v38 }
 0xa6f   :  { %3546 = vtanh.f32 %v528_v39 }
 0xa79   :  { %v3547_v40 = vpop.eup %3546 }
 0xa7a   :  { %531 = vrot.lane.b32.xlu0 %v3547_v40, %s3804_s25 }
 0xaec   :  { %v532_v41 = vpop.permute.xlu0 %531 }
 0xaed   :  { %v4066_v42 = vmul.f32 %v532_v41, %v516_v35 }
 0xaef   :  { %v535_v43 = vpack.c.bf16 %v4066_v42, %v4066_v42 }
 0xaf1   :  { %542 = vrot.lane.b32.xlu1 %v535_v43, %s3805_s3 }
 0xb63   :  { %v543_v44 = vpop.permute.xlu1 %542 }
 0xb64   :  { %3202 = vmatmul.mubr.msk.bf16.vlgmr.msra.gmra.mrb[12].mxu0 %vm243_vm3, %v543_v44 }
 0xb65   :  { %3214 = vmatpush3.bf16.msra.mxu0 %v3954_v3  ;;  %3217 = vmatprep.mubr.msk.bf16.mxu0 %vm3802_vm0, %v3801_v0 }
 0xb66   :  { %3215 = vmatprep.subr.bf16.mxu0 %v3801_v0 }
 0xb69   :  { %3216 = vmatpush3.bf16.msra.mxu0 %v3968_v6 }
 0xc37   :  { %v581_v46 = vpop.f32.mrb[12].mxu0 }
 0xc38   :  { %v587_v47 = vadd.f32 %v581_v46, %v217_v45  ;;  %v3203_v48 = vpop.f32.mrb[13].mxu0 }
 0xc39   :  { %v584_v49 = vpop.f32.mrb[14].mxu0 }
 0xc3a   :  { %3548 = vtanh.f32 %v587_v47  ;;  %v3204_v50 = vpop.f32.mrb[15].mxu0  ;;  %v588_v52 = vmul.f32 0.5, %v587_v47  ;;  %v3512_v49 = vld [vmem:[%s4635_s4] sm:$0xff]  }
 0xc3b   :  { %3229 = vmatprep.subr.bf16.mxu0 %v3512_v49 }
 0xc3c   :  { %3550 = vtanh.f32 %v588_v52 }
 0xc44   :  { %v3549_v51 = vpop.eup %3548 }
 0xc45   :  { %595 = vrot.lane.b32.xlu0 %v3549_v51, %s3804_s25 }
 0xc46   :  { %v3551_v53 = vpop.eup %3550 }
 0xc47   :  { %v590_v55 = vmul.f32 0.5, %v3551_v53 }
 0xc49   :  { %v591_v60 = vadd.f32 0.5, %v590_v55 }
 0xc4b   :  { %v593_v63 = vmul.f32 %v591_v60, %v528_v39 }
 0xcb7   :  { %v596_v61 = vpop.permute.xlu0 %595 }
 0xcb8   :  { %v598_v62 = vmul.f32 %v596_v61, %v591_v60 }
 0xcba   :  { %600 = vrot.lane.b32.xlu1 %v598_v62, %s3805_s3 }
 0xd2c   :  { %v601_v57 = vpop.permute.xlu1 %600 }
 0xd2d   :  { %v603_v1 = vadd.f32 %v601_v57, %v593_v63  ;;  %v4141_v57 = vld [vmem:[%s4636_s5] sm:$0xff]  }
 0xd2f   :  { %3552 = vtanh.f32 %v603_v1 }
 0xd39   :  { %v3553_v2 = vpop.eup %3552 }
 0xd3a   :  { %606 = vrot.lane.b32.xlu0 %v3553_v2, %s3804_s25 }
 0xdac   :  { %v607_v4 = vpop.permute.xlu0 %606 }
 0xdad   :  { %v4082_v5 = vmul.f32 %v607_v4, %v591_v60 }
 0xdaf   :  { %v610_v10 = vpack.c.bf16 %v4082_v5, %v4082_v5 }
 0xdb1   :  { %617 = vrot.lane.b32.xlu1 %v610_v10, %s3805_s3 }
 0xe23   :  { %v618_v11 = vpop.permute.xlu1 %617 }
 0xe24   :  { %3210 = vmatmul.mubr.msk.bf16.vlgmr.msra.gmra.mrb[12].mxu1 %vm243_vm3, %v618_v11 }
 0xe25   :  { %3222 = vmatpush3.bf16.msra.mxu1 %v3954_v3  ;;  %3225 = vmatprep.mubr.msk.bf16.mxu1 %vm3802_vm0, %v3801_v0 }
 0xe26   :  { %3223 = vmatprep.subr.bf16.mxu1 %v3801_v0 }
 0xe29   :  { %3224 = vmatpush3.bf16.msra.mxu1 %v3968_v6 }
 0xe2a   :  { %3241 = vmatprep.subr.bf16.mxu1 %v3801_v0 }
 0xef7   :  { %v656_v14 = vpop.f32.mrb[12].mxu1 }
 0xef8   :  { %v662_v15 = vadd.f32 %v656_v14, %v220_v13  ;;  %v3211_v16 = vpop.f32.mrb[13].mxu1 }
 0xef9   :  { %v659_v17 = vpop.f32.mrb[14].mxu1 }
 0xefa   :  { %3554 = vtanh.f32 %v662_v15  ;;  %v3212_v9 = vpop.f32.mrb[15].mxu1  ;;  %v663_v3 = vmul.f32 0.5, %v662_v15 }
 0xefc   :  { %3556 = vtanh.f32 %v663_v3 }
 0xf04   :  { %v3555_v18 = vpop.eup %3554 }
 0xf05   :  { %670 = vrot.lane.b32.xlu0 %v3555_v18, %s3804_s25  ;;  %v4175_v18 = vld [vmem:[#allocation5] ss:$0 sm:$0xff] }
 0xf06   :  { %v3557_v19 = vpop.eup %3556 }
 0xf07   :  { %v665_v20 = vmul.f32 0.5, %v3557_v19 }
 0xf09   :  { %v666_v22 = vadd.f32 0.5, %v665_v20 }
 0xf0b   :  { %v668_v24 = vmul.f32 %v666_v22, %v603_v1  ;;  %v4149_v1 = vld [vmem:[%s4636_s5 + $0x8] sm:$0xff]  }
 0xf77   :  { %v671_v6 = vpop.permute.xlu0 %670 }
 0xf78   :  { %v673_v23 = vmul.f32 %v671_v6, %v666_v22 }
 0xf7a   :  { %675 = vrot.lane.b32.xlu1 %v673_v23, %s3805_s3 }
 0xfec   :  { %v676_v59 = vpop.permute.xlu1 %675 }
 0xfed   :  { %v678_v25 = vadd.f32 %v676_v59, %v668_v24 }
 0xfef   :  { %3558 = vtanh.f32 %v678_v25 }
 0xff9   :  { %v3559_v26 = vpop.eup %3558 }
 0xffa   :  { %681 = vrot.lane.b32.xlu0 %v3559_v26, %s3804_s25 }
0x106c   :  { %v682_v27 = vpop.permute.xlu0 %681 }
0x106d   :  { %v4099_v28 = vmul.f32 %v682_v27, %v666_v22 }
0x106f   :  { %v685_v29 = vpack.c.bf16 %v4099_v28, %v4099_v28 }
0x1071   :  { %692 = vrot.lane.b32.xlu1 %v685_v29, %s3805_s3 }
0x10e3   :  { %v693_v30 = vpop.permute.xlu1 %692 }
0x10e4   :  { %3218 = vmatmul.mubr.msk.bf16.vlgmr.msra.gmra.mrb[16].mxu0 %vm243_vm3, %v693_v30 }
0x10e5   :  { %3230 = vmatpush3.bf16.msra.mxu0 %v3512_v49 }
0x11b7   :  { %v731_v33 = vpop.f32.mrb[16].mxu0 }
0x11b8   :  { %v737_v34 = vadd.f32 %v731_v33, %v225_v32  ;;  %v3219_v35 = vpop.f32.mrb[17].mxu0 }
0x11b9   :  { %v734_v36 = vpop.f32.mrb[18].mxu0 }
0x11ba   :  { %3560 = vtanh.f32 %v737_v34  ;;  %v3220_v37 = vpop.f32.mrb[19].mxu0  ;;  %v738_v12 = vmul.f32 0.5, %v737_v34 }
0x11bc   :  { %3562 = vtanh.f32 %v738_v12 }
0x11c4   :  { %v3561_v38 = vpop.eup %3560 }
0x11c5   :  { %745 = vrot.lane.b32.xlu0 %v3561_v38, %s3804_s25 }
0x11c6   :  { %v3563_v39 = vpop.eup %3562 }
0x11c7   :  { %v740_v40 = vmul.f32 0.5, %v3563_v39 }
0x11c9   :  { %v741_v41 = vadd.f32 0.5, %v740_v40 }
0x11cb   :  { %v743_v56 = vmul.f32 %v741_v41, %v678_v25 }
0x1237   :  { %v746_v43 = vpop.permute.xlu0 %745 }
0x1238   :  { %v748_v44 = vmul.f32 %v746_v43, %v741_v41 }
0x123a   :  { %750 = vrot.lane.b32.xlu1 %v748_v44, %s3805_s3 }
0x123e   :  { %312 = vrot.lane.b32.xlu1 %v3998_v31, %s3805_s3  ;;  %v3513_v31 = vld [vmem:[%s4635_s4 + $0x8] sm:$0xff]  }
0x123f   :  { %3231 = vmatprep.subr.bf16.mxu0 %v3513_v31 }
0x1240   :  { %3232 = vmatpush3.bf16.msra.mxu0 %v3513_v31 }
0x1241   :  { %3257 = vmatprep.subr.bf16.mxu0 %v3801_v0 }
0x1242   :  { %462 = vrot.lane.b32.xlu1 %v4049_v21, %s3805_s3 }
0x12ac   :  { %v751_v45 = vpop.permute.xlu1 %750 }
0x12ad   :  { %v4113_v46 = vadd.f32 %v751_v45, %v743_v56 }
0x12af   :  { %3564 = vtanh.f32 %v4113_v46 }
0x12b0   :  { %v313_v47 = vpop.permute.xlu1 %312 }
0x12b1   :  { %315 = vst.msk [vmem:[#allocation2] sm:$0xff] %vm243_vm3, %v313_v47 }
0x12b4   :  { %v463_v48 = vpop.permute.xlu1 %462 }
0x12b5   :  { %465 = vst.msk [vmem:[#allocation2 + $0x10] sm:$0xff] %vm243_vm3, %v463_v48 }
0x12b8   :  { %v850_v60 = vld [vmem:[#allocation2] sm:$0xff] }
0x12b9   :  { %v3565_v21 = vpop.eup %3564 }
0x12ba   :  { %756 = vrot.lane.b32.xlu0 %v3565_v21, %s3804_s25 }
0x12be   :  { %387 = vrot.lane.b32.xlu0 %v4024_v54, %s3805_s3 }
0x12c2   :  { %537 = vrot.lane.b32.xlu0 %v4066_v42, %s3805_s3  ;;  %v852_v42 = vld [vmem:[#allocation2 + $0x10] sm:$0xff] }
0x132c   :  { %v757_v50 = vpop.permute.xlu0 %756 }
0x132d   :  { %v4130_v51 = vmul.f32 %v757_v50, %v741_v41 }
0x132f   :  { %v760_v52 = vpack.c.bf16 %v4130_v51, %v4130_v51 }
0x1330   :  { %v388_v53 = vpop.permute.xlu0 %387 }
0x1331   :  { %390 = vst.msk [vmem:[#allocation2 + $0x8] sm:$0xff] %vm243_vm3, %v388_v53  ;;  %767 = vrot.lane.b32.xlu1 %v760_v52, %s3805_s3 }
0x1334   :  { %v538_v55 = vpop.permute.xlu0 %537 }
0x1335   :  { %540 = vst.msk [vmem:[#allocation2 + $0x18] sm:$0xff] %vm243_vm3, %v538_v55 }
0x1338   :  { %v851_v61 = vld [vmem:[#allocation2 + $0x8] sm:$0xff] }
0x1339   :  { %v858_v54 = vpack.c.bf16 %v851_v61, %v850_v60 }
0x133b   :  { %3233 = vmatprep.mubr.msk.bf16.mxu0 %vm243_vm3, %v858_v54 }
0x133c   :  { %v853_v62 = vld [vmem:[#allocation2 + $0x18] sm:$0xff] }
0x133d   :  { %v859_v63 = vpack.c.bf16 %v853_v62, %v852_v42 }
0x133f   :  { %3234 = vmatmul.mubr.msk.bf16.vlgmr.msra.gmra.mrb[20].mxu0 %vm243_vm3, %v859_v63 }
0x1340   :  { %3258 = vmatpush3.bf16.msra.mxu0 %v4141_v57 }
0x1341   :  { %3259 = vmatprep.subr.bf16.mxu0 %v3801_v0 }
0x1344   :  { %3260 = vmatpush3.bf16.msra.mxu0 %v4149_v1 }
0x1345   :  { %3273 = vmatprep.subr.bf16.mxu0 %v3801_v0 }
0x13a3   :  { %v768_v2 = vpop.permute.xlu1 %767 }
0x13a4   :  { %3226 = vmatmul.mubr.msk.bf16.vlgmr.msra.gmra.mrb[16].mxu1 %vm243_vm3, %v768_v2 }
0x13a5   :  { %3242 = vmatpush3.bf16.msra.mxu1 %v4141_v57  ;;  %3245 = vmatprep.mubr.msk.bf16.mxu1 %vm3802_vm0, %v3801_v0 }
0x13a6   :  { %3243 = vmatprep.subr.bf16.mxu1 %v3801_v0 }
0x13a9   :  { %3244 = vmatpush3.bf16.msra.mxu1 %v4149_v1 }
0x13aa   :  { %3249 = vmatprep.subr.bf16.mxu1 %v3801_v0 }
0x13ac   :  { %3246 = vmatmul.mubr.bf16.vlgmr.msra.gmra.mrb[20].mxu1 %v3803_v7  ;;  %v228_v7 = vadd.f32 %v4033_v58, %v3988_v8 }
0x13ad   :  { %3250 = vmatpush3.bf16.msra.mxu1 %v4141_v57  ;;  %3253 = vmatprep.mubr.msk.bf16.mxu1 %vm3802_vm0, %v3801_v0 }
0x13ae   :  { %3251 = vmatprep.subr.bf16.mxu1 %v3801_v0 }
0x13b1   :  { %3252 = vmatpush3.bf16.msra.mxu1 %v4149_v1 }
0x13b2   :  { %3265 = vmatprep.subr.bf16.mxu1 %v3801_v0 }
0x1412   :  { %v4167_v4 = vpop.f32.mrb[20].mxu0 }
0x1413   :  { %v926_v10 = vpop.f32.mrb[21].mxu0 }
0x1414   :  { %v4169_v11 = vpop.f32.mrb[22].mxu0  ;;  %v927_v3 = vadd.f32 %v4175_v18, %v926_v10 }
0x1415   :  { %v4171_v13 = vpop.f32.mrb[23].mxu0 }
0x1416   :  { %v930_v21 = vadd.f32 %v4175_v18, %v4171_v13 }
0x1477   :  { %v806_v14 = vpop.f32.mrb[16].mxu1 }
0x1478   :  { %v812_v15 = vadd.f32 %v806_v14, %v228_v7  ;;  %v3227_v16 = vpop.f32.mrb[17].mxu1 }
0x1479   :  { %v809_v17 = vpop.f32.mrb[18].mxu1 }
0x147a   :  { %v3228_v9 = vpop.f32.mrb[19].mxu1  ;;  %v813_v35 = vmul.f32 0.5, %v812_v15 }
0x147f   :  { %v1003_v19 = vpop.f32.mrb[20].mxu1 }
0x1480   :  { %v1009_v20 = vadd.f32 %v1003_v19, %v927_v3  ;;  %v3247_v22 = vpop.f32.mrb[21].mxu1 }
0x1481   :  { %v1006_v6 = vpop.f32.mrb[22].mxu1 }
0x1482   :  { %3566 = vtanh.f32 %v1009_v20  ;;  %v3248_v23 = vpop.f32.mrb[23].mxu1  ;;  %v1010_v59 = vmul.f32 0.5, %v1009_v20 }
0x1484   :  { %3568 = vtanh.f32 %v1010_v59 }
0x148c   :  { %v3567_v24 = vpop.eup %3566 }
0x148d   :  { %1017 = vrot.lane.b32.xlu0 %v3567_v24, %s3804_s25 }
0x148e   :  { %v3569_v8 = vpop.eup %3568 }
0x148f   :  { %v1012_v58 = vmul.f32 0.5, %v3569_v8 }
0x1491   :  { %v1013_v25 = vadd.f32 0.5, %v1012_v58 }
0x1493   :  { %v1015_v29 = vmul.f32 0.0, %v1013_v25 }
0x14ff   :  { %v1018_v26 = vpop.permute.xlu0 %1017 }
0x1500   :  { %v1020_v27 = vmul.f32 %v1018_v26, %v1013_v25  ;;  %v935_v26 = vadd.f32 %v4167_v4, %v4175_v18 }
0x1502   :  { %1022 = vrot.lane.b32.xlu1 %v1020_v27, %s3805_s3 }
0x1574   :  { %v1023_v30 = vpop.permute.xlu1 %1022 }
0x1575   :  { %v1025_v32 = vadd.f32 %v1023_v30, %v1015_v29 }
0x1577   :  { %3570 = vtanh.f32 %v1025_v32 }
0x1578   :  { %3572 = vtanh.f32 %v812_v15 }
0x1579   :  { %3574 = vtanh.f32 %v813_v35 }
0x1581   :  { %v3571_v33 = vpop.eup %3570 }
0x1582   :  { %1028 = vrot.lane.b32.xlu0 %v3571_v33, %s3804_s25  ;;  %v3573_v34 = vpop.eup %3572 }
0x1583   :  { %v3575_v36 = vpop.eup %3574 }
0x1584   :  { %v815_v37 = vmul.f32 0.5, %v3575_v36 }
0x1586   :  { %820 = vrot.lane.b32.xlu0 %v3573_v34, %s3804_s25  ;;  %v816_v40 = vadd.f32 0.5, %v815_v37 }
0x1588   :  { %v818_v56 = vmul.f32 %v816_v40, %v4113_v46 }
0x15f4   :  { %v1029_v38 = vpop.permute.xlu0 %1028 }
0x15f5   :  { %v1031_v12 = vmul.f32 %v1029_v38, %v1013_v25 }
0x15f7   :  { %v1032_v39 = vpack.c.bf16 %v1031_v12, %v1031_v12 }
0x15f8   :  { %v821_v41 = vpop.permute.xlu0 %820 }
0x15f9   :  { %v823_v43 = vmul.f32 %v821_v41, %v816_v40  ;;  %1034 = vrot.lane.b32.xlu1 %v1032_v39, %s3805_s3 }
0x15fb   :  { %825 = vrot.lane.b32.xlu0 %v823_v43, %s3805_s3 }
0x166b   :  { %v1035_v44 = vpop.permute.xlu1 %1034 }
0x166c   :  { %3254 = vmatmul.mubr.msk.bf16.vlgmr.msra.gmra.mrb[24].mxu1 %vm243_vm3, %v1035_v44 }
0x166d   :  { %v826_v45 = vpop.permute.xlu0 %825  ;;  %3266 = vmatpush3.bf16.msra.mxu1 %v4141_v57  ;;  %3269 = vmatprep.mubr.msk.bf16.mxu1 %vm3802_vm0, %v3801_v0 }
0x166e   :  { %v4189_v47 = vadd.f32 %v826_v45, %v818_v56  ;;  %3267 = vmatprep.subr.bf16.mxu1 %v3801_v0 }
0x1670   :  { %3576 = vtanh.f32 %v4189_v47 }
0x1671   :  { %3268 = vmatpush3.bf16.msra.mxu1 %v4149_v1 }
0x1672   :  { %3281 = vmatprep.subr.bf16.mxu1 %v3801_v0 }
0x167a   :  { %v3577_v48 = vpop.eup %3576 }
0x167b   :  { %831 = vrot.lane.b32.xlu0 %v3577_v48, %s3804_s25 }
0x167f   :  { %612 = vrot.lane.b32.xlu0 %v4082_v5, %s3805_s3 }
0x1683   :  { %762 = vrot.lane.b32.xlu0 %v4130_v51, %s3805_s3 }
0x16ed   :  { %v832_v46 = vpop.permute.xlu0 %831 }
0x16ee   :  { %v4209_v14 = vmul.f32 %v832_v46, %v816_v40  ;;  %v938_v46 = vadd.f32 %v4169_v11, %v4175_v18 }
0x16f1   :  { %v613_v49 = vpop.permute.xlu0 %612 }
0x16f2   :  { %615 = vst.msk [vmem:[#allocation2 + $0x20] sm:$0xff] %vm243_vm3, %v613_v49 }
0x16f5   :  { %v763_v31 = vpop.permute.xlu0 %762 }
0x16f6   :  { %765 = vst.msk [vmem:[#allocation2 + $0x30] sm:$0xff] %vm243_vm3, %v763_v31 }
0x16f9   :  { %v854_v19 = vld [vmem:[#allocation2 + $0x20] sm:$0xff] }
0x173f   :  { %v1073_v50 = vpop.f32.mrb[24].mxu1 }
0x1740   :  { %v1079_v52 = vadd.f32 %v1073_v50, %v930_v21  ;;  %v3255_v53 = vpop.f32.mrb[25].mxu1 }
0x1741   :  { %v1076_v55 = vpop.f32.mrb[26].mxu1 }
0x1742   :  { %3578 = vtanh.f32 %v1079_v52  ;;  %v3256_v60 = vpop.f32.mrb[27].mxu1  ;;  %v1080_v51 = vmul.f32 0.5, %v1079_v52 }
0x1744   :  { %3580 = vtanh.f32 %v1080_v51 }
0x174c   :  { %v3579_v5 = vpop.eup %3578 }
0x174d   :  { %1087 = vrot.lane.b32.xlu1 %v3579_v5, %s3804_s25 }
0x174e   :  { %v3581_v61 = vpop.eup %3580 }
0x174f   :  { %v1082_v54 = vmul.f32 0.5, %v3581_v61 }
0x1751   :  { %v1083_v42 = vadd.f32 0.5, %v1082_v54 }
0x1753   :  { %v1085_v2 = vmul.f32 %v1083_v42, %v1025_v32 }
0x17bf   :  { %v1088_v62 = vpop.permute.xlu1 %1087 }
0x17c0   :  { %v1090_v63 = vmul.f32 %v1088_v62, %v1083_v42 }
0x17c2   :  { %1092 = vrot.lane.b32.xlu1 %v1090_v63, %s3805_s3 }
0x1834   :  { %v1093_v10 = vpop.permute.xlu1 %1092 }
0x1835   :  { %v1095_v13 = vadd.f32 %v1093_v10, %v1085_v2 }
0x1837   :  { %3582 = vtanh.f32 %v1095_v13 }
0x1841   :  { %v3583_v7 = vpop.eup %3582 }
0x1842   :  { %1098 = vrot.lane.b32.xlu1 %v3583_v7, %s3804_s25 }
0x1846   :  { %687 = vrot.lane.b32.xlu1 %v4099_v28, %s3805_s3  ;;  %v856_v28 = vld [vmem:[#allocation2 + $0x30] sm:$0xff] }
0x184a   :  { %837 = vrot.lane.b32.xlu1 %v4209_v14, %s3805_s3 }
0x18b4   :  { %v1099_v15 = vpop.permute.xlu1 %1098 }
0x18b5   :  { %v1101_v16 = vmul.f32 %v1099_v15, %v1083_v42 }
0x18b7   :  { %v1102_v17 = vpack.c.bf16 %v1101_v16, %v1101_v16 }
0x18b8   :  { %v688_v9 = vpop.permute.xlu1 %687 }
0x18b9   :  { %690 = vst.msk [vmem:[#allocation2 + $0x28] sm:$0xff] %vm243_vm3, %v688_v9  ;;  %1104 = vrot.lane.b32.xlu0 %v1102_v17, %s3805_s3 }
0x18bc   :  { %v838_v3 = vpop.permute.xlu1 %837 }
0x18bd   :  { %840 = vst.msk [vmem:[#allocation2 + $0x38] sm:$0xff] %vm243_vm3, %v838_v3 }
0x18c0   :  { %v855_v20 = vld [vmem:[#allocation2 + $0x28] sm:$0xff] }
0x18c1   :  { %v860_v22 = vpack.c.bf16 %v855_v20, %v854_v19 }
0x18c3   :  { %3237 = vmatprep.mubr.msk.bf16.mxu0 %vm243_vm3, %v860_v22 }
0x18c4   :  { %v857_v6 = vld [vmem:[#allocation2 + $0x38] sm:$0xff] }
0x18c5   :  { %v861_v23 = vpack.c.bf16 %v857_v6, %v856_v28 }
0x18c7   :  { %3238 = vmatmul.mubr.msk.bf16.gmra.mrb[24].mxu0 %vm243_vm3, %v861_v23 }
0x18c8   :  { %3261 = vmatprep.mubr.msk.bf16.mxu0 %vm3802_vm0, %v3801_v0 }
0x192b   :  { %v1105_v24 = vpop.permute.xlu0 %1104 }
0x192c   :  { %3262 = vmatmul.mubr.msk.bf16.vlgmr.msra.gmra.mrb[28].mxu0 %vm243_vm3, %v1105_v24 }
0x192d   :  { %3274 = vmatpush3.bf16.msra.mxu0 %v4141_v57  ;;  %3277 = vmatprep.mubr.msk.bf16.mxu0 %vm3802_vm0, %v3801_v0 }
0x192e   :  { %3275 = vmatprep.subr.bf16.mxu0 %v3801_v0 }
0x1931   :  { %3276 = vmatpush3.bf16.msra.mxu0 %v4149_v1 }
0x1932   :  { %3289 = vmatprep.subr.bf16.mxu0 %v3801_v0 }
0x199a   :  { %v4227_v59 = vpop.f32.mrb[24].mxu0 }
0x199b   :  { %v4229_v8 = vpop.f32.mrb[25].mxu0 }
0x199c   :  { %v4231_v58 = vpop.f32.mrb[26].mxu0  ;;  %v943_v15 = vadd.f32 %v4175_v18, %v4229_v8 }
0x199d   :  { %v4233_v25 = vpop.f32.mrb[27].mxu0 }
0x19ff   :  { %v1143_v27 = vpop.f32.mrb[28].mxu0 }
0x1a00   :  { %v1149_v29 = vadd.f32 %v1143_v27, %v935_v26  ;;  %v3263_v30 = vpop.f32.mrb[29].mxu0 }
0x1a01   :  { %v1146_v32 = vpop.f32.mrb[30].mxu0 }
0x1a02   :  { %3584 = vtanh.f32 %v1149_v29  ;;  %v3264_v33 = vpop.f32.mrb[31].mxu0  ;;  %v1150_v35 = vmul.f32 0.5, %v1149_v29 }
0x1a04   :  { %3586 = vtanh.f32 %v1150_v35 }
0x1a0c   :  { %v3585_v34 = vpop.eup %3584 }
0x1a0d   :  { %1157 = vrot.lane.b32.xlu1 %v3585_v34, %s3804_s25 }
0x1a0e   :  { %v3587_v36 = vpop.eup %3586 }
0x1a0f   :  { %v1152_v37 = vmul.f32 0.5, %v3587_v36  ;;  %v946_v36 = vadd.f32 %v4175_v18, %v4233_v25 }
0x1a11   :  { %v1153_v38 = vadd.f32 0.5, %v1152_v37 }
0x1a13   :  { %v1155_v40 = vmul.f32 %v1153_v38, %v1095_v13 }
0x1a7f   :  { %v1158_v12 = vpop.permute.xlu1 %1157 }
0x1a80   :  { %v1160_v39 = vmul.f32 %v1158_v12, %v1153_v38 }
0x1a82   :  { %1162 = vrot.lane.b32.xlu0 %v1160_v39, %s3805_s3 }
0x1af4   :  { %v1163_v4 = vpop.permute.xlu0 %1162 }
0x1af5   :  { %v1165_v41 = vadd.f32 %v1163_v4, %v1155_v40 }
0x1af7   :  { %3588 = vtanh.f32 %v1165_v41 }
0x1b01   :  { %v3589_v43 = vpop.eup %3588 }
0x1b02   :  { %1168 = vrot.lane.b32.xlu1 %v3589_v43, %s3804_s25 }
0x1b74   :  { %v1169_v44 = vpop.permute.xlu1 %1168 }
0x1b75   :  { %v1171_v56 = vmul.f32 %v1169_v44, %v1153_v38 }
0x1b77   :  { %v1172_v45 = vpack.c.bf16 %v1171_v56, %v1171_v56 }
0x1b79   :  { %1174 = vrot.lane.b32.xlu0 %v1172_v45, %s3805_s3 }
0x1beb   :  { %v1175_v48 = vpop.permute.xlu0 %1174 }
0x1bec   :  { %3270 = vmatmul.mubr.msk.bf16.vlgmr.msra.gmra.mrb[28].mxu1 %vm243_vm3, %v1175_v48 }
0x1bed   :  { %3282 = vmatpush3.bf16.msra.mxu1 %v4141_v57  ;;  %3285 = vmatprep.mubr.msk.bf16.mxu1 %vm3802_vm0, %v3801_v0 }
0x1bee   :  { %3283 = vmatprep.subr.bf16.mxu1 %v3801_v0 }
0x1bf1   :  { %3284 = vmatpush3.bf16.msra.mxu1 %v4149_v1 }
0x1bf2   :  { %3297 = vmatprep.subr.bf16.mxu1 %v3801_v0 }
0x1cbf   :  { %v1213_v49 = vpop.f32.mrb[28].mxu1 }
0x1cc0   :  { %v1219_v31 = vadd.f32 %v1213_v49, %v938_v46  ;;  %v3271_v21 = vpop.f32.mrb[29].mxu1 }
0x1cc1   :  { %v1216_v50 = vpop.f32.mrb[30].mxu1 }
0x1cc2   :  { %3590 = vtanh.f32 %v1219_v31  ;;  %v3272_v52 = vpop.f32.mrb[31].mxu1  ;;  %v1220_v55 = vmul.f32 0.5, %v1219_v31 }
0x1cc3   :  { %v951_v52 = vadd.f32 %v4227_v59, %v4175_v18  ;;  %v4290_v59 = vld [vmem:[%s4639_s8] sm:$0xff]  }
0x1cc4   :  { %3592 = vtanh.f32 %v1220_v55 }
0x1ccc   :  { %v3591_v53 = vpop.eup %3590 }
0x1ccd   :  { %1227 = vrot.lane.b32.xlu1 %v3591_v53, %s3804_s25 }
0x1cce   :  { %v3593_v60 = vpop.eup %3592 }
0x1ccf   :  { %v1222_v5 = vmul.f32 0.5, %v3593_v60 }
0x1cd1   :  { %v1223_v51 = vadd.f32 0.5, %v1222_v5 }
0x1cd3   :  { %v1225_v42 = vmul.f32 %v1223_v51, %v1165_v41 }
0x1d3f   :  { %v1228_v61 = vpop.permute.xlu1 %1227 }
0x1d40   :  { %v1230_v54 = vmul.f32 %v1228_v61, %v1223_v51 }
0x1d42   :  { %1232 = vrot.lane.b32.xlu0 %v1230_v54, %s3805_s3 }
0x1db4   :  { %v1233_v11 = vpop.permute.xlu0 %1232 }
0x1db5   :  { %v1235_v62 = vadd.f32 %v1233_v11, %v1225_v42 }
0x1db7   :  { %3594 = vtanh.f32 %v1235_v62 }
0x1dc1   :  { %v3595_v63 = vpop.eup %3594 }
0x1dc2   :  { %1238 = vrot.lane.b32.xlu1 %v3595_v63, %s3804_s25 }
0x1e34   :  { %v1239_v2 = vpop.permute.xlu1 %1238 }
0x1e35   :  { %v1241_v10 = vmul.f32 %v1239_v2, %v1223_v51 }
0x1e37   :  { %v1242_v13 = vpack.c.bf16 %v1241_v10, %v1241_v10 }
0x1e39   :  { %1244 = vrot.lane.b32.xlu0 %v1242_v13, %s3805_s3 }
0x1eab   :  { %v1245_v7 = vpop.permute.xlu0 %1244 }
0x1eac   :  { %3278 = vmatmul.mubr.msk.bf16.vlgmr.msra.gmra.mrb[32].mxu0 %vm243_vm3, %v1245_v7  ;;  %v4297_v7 = vld [vmem:[%s4639_s8 + $0x8] sm:$0xff]  }
0x1ead   :  { %3290 = vmatpush3.bf16.msra.mxu0 %v4141_v57  ;;  %3293 = vmatprep.mubr.msk.bf16.mxu0 %vm3802_vm0, %v3801_v0 }
0x1eae   :  { %3291 = vmatprep.subr.bf16.mxu0 %v3801_v0 }
0x1eb1   :  { %3292 = vmatpush3.bf16.msra.mxu0 %v4149_v1 }
0x1eb2   :  { %3305 = vmatprep.subr.bf16.mxu0 %v3801_v0 }
0x1f7f   :  { %v1283_v16 = vpop.f32.mrb[32].mxu0 }
0x1f80   :  { %v1289_v17 = vadd.f32 %v1283_v16, %v943_v15  ;;  %v3279_v9 = vpop.f32.mrb[33].mxu0 }
0x1f81   :  { %v1286_v3 = vpop.f32.mrb[34].mxu0 }
0x1f82   :  { %3596 = vtanh.f32 %v1289_v17  ;;  %v3280_v19 = vpop.f32.mrb[35].mxu0  ;;  %v1290_v22 = vmul.f32 0.5, %v1289_v17  ;;  %v835_v17 = vpack.c.bf16 %v4209_v14, %v4209_v14  ;;  %v1543_v14 = vld [vmem:[%s4631_s0 + $0x1c] sm:$0xf] }
0x1f84   :  { %3598 = vtanh.f32 %v1290_v22  ;;  %v1523_v22 = vld [vmem:[#allocation7] sm:$0xf] }
0x1f8c   :  { %v3597_v20 = vpop.eup %3596 }
0x1f8d   :  { %1297 = vrot.lane.b32.xlu1 %v3597_v20, %s3804_s25 }
0x1f8e   :  { %v3599_v28 = vpop.eup %3598 }
0x1f8f   :  { %v1292_v6 = vmul.f32 0.5, %v3599_v28  ;;  %v4313_v28 = vsel %vm162_vm1, %v1523_v22, 0 }
0x1f91   :  { %v1293_v23 = vadd.f32 0.5, %v1292_v6 }
0x1f93   :  { %v1295_v27 = vmul.f32 %v1293_v23, %v1235_v62 }
0x1fff   :  { %v1298_v24 = vpop.permute.xlu1 %1297 }
0x2000   :  { %v1300_v26 = vmul.f32 %v1298_v24, %v1293_v23 }
0x2002   :  { %1302 = vrot.lane.b32.xlu0 %v1300_v26, %s3805_s3 }
0x2074   :  { %v1303_v8 = vpop.permute.xlu0 %1302 }
0x2075   :  { %v1305_v29 = vadd.f32 %v1303_v8, %v1295_v27  ;;  %v954_v8 = vadd.f32 %v4231_v58, %v4175_v18 }
0x2077   :  { %3600 = vtanh.f32 %v1305_v29 }
0x2081   :  { %v3601_v30 = vpop.eup %3600 }
0x2082   :  { %1308 = vrot.lane.b32.xlu1 %v3601_v30, %s3804_s25 }
0x20f4   :  { %v1309_v32 = vpop.permute.xlu1 %1308 }
0x20f5   :  { %v1311_v33 = vmul.f32 %v1309_v32, %v1293_v23 }
0x20f7   :  { %v1312_v34 = vpack.c.bf16 %v1311_v33, %v1311_v33 }
0x20f9   :  { %1314 = vrot.lane.b32.xlu0 %v1312_v34, %s3805_s3 }
0x216b   :  { %v1315_v35 = vpop.permute.xlu0 %1314 }
0x216c   :  { %3286 = vmatmul.mubr.msk.bf16.vlgmr.msra.gmra.mrb[32].mxu1 %vm243_vm3, %v1315_v35  ;;  %v4328_v35 = vld [vmem:[#allocation8] ss:$0 sm:$0xff] }
0x216d   :  { %3298 = vmatpush3.bf16.msra.mxu1 %v4141_v57  ;;  %3301 = vmatprep.mubr.msk.bf16.mxu1 %vm3802_vm0, %v3801_v0 }
0x216e   :  { %3299 = vmatprep.subr.bf16.mxu1 %v3801_v0 }
0x2171   :  { %3300 = vmatpush3.bf16.msra.mxu1 %v4149_v1 }
0x2172   :  { %3313 = vmatprep.subr.bf16.mxu1 %v3801_v0 }
0x223f   :  { %v1353_v37 = vpop.f32.mrb[32].mxu1 }
0x2240   :  { %v1359_v38 = vadd.f32 %v1353_v37, %v946_v36  ;;  %v3287_v12 = vpop.f32.mrb[33].mxu1 }
0x2241   :  { %v1356_v39 = vpop.f32.mrb[34].mxu1 }
0x2242   :  { %3602 = vtanh.f32 %v1359_v38  ;;  %v3288_v40 = vpop.f32.mrb[35].mxu1  ;;  %v1360_v57 = vmul.f32 0.5, %v1359_v38 }
0x2244   :  { %3604 = vtanh.f32 %v1360_v57 }
0x224c   :  { %v3603_v4 = vpop.eup %3602 }
0x224d   :  { %1367 = vrot.lane.b32.xlu1 %v3603_v4, %s3804_s25 }
0x224e   :  { %v3605_v41 = vpop.eup %3604 }
0x224f   :  { %v1362_v43 = vmul.f32 0.5, %v3605_v41 }
0x2251   :  { %v1363_v44 = vadd.f32 0.5, %v1362_v43 }
0x2253   :  { %v1365_v45 = vmul.f32 %v1363_v44, %v1305_v29 }
0x22bf   :  { %v1368_v1 = vpop.permute.xlu1 %1367 }
0x22c0   :  { %v1370_v56 = vmul.f32 %v1368_v1, %v1363_v44 }
0x22c2   :  { %1372 = vrot.lane.b32.xlu0 %v1370_v56, %s3805_s3 }
0x2334   :  { %v1373_v25 = vpop.permute.xlu0 %1372 }
0x2335   :  { %v1375_v48 = vadd.f32 %v1373_v25, %v1365_v45 }
0x2337   :  { %3606 = vtanh.f32 %v1375_v48 }
0x2341   :  { %v3607_v46 = vpop.eup %3606 }
0x2342   :  { %1378 = vrot.lane.b32.xlu1 %v3607_v46, %s3804_s25 }
0x23b4   :  { %v1379_v49 = vpop.permute.xlu1 %1378 }
0x23b5   :  { %v1381_v31 = vmul.f32 %v1379_v49, %v1363_v44 }
0x23b7   :  { %v1382_v21 = vpack.c.bf16 %v1381_v31, %v1381_v31 }
0x23b9   :  { %1384 = vrot.lane.b32.xlu0 %v1382_v21, %s3805_s3 }
0x242b   :  { %v1385_v50 = vpop.permute.xlu0 %1384 }
0x242c   :  { %3294 = vmatmul.mubr.msk.bf16.vlgmr.msra.gmra.mrb[36].mxu0 %vm243_vm3, %v1385_v50 }
0x242d   :  { %3309 = vmatprep.mubr.msk.bf16.mxu0 %vm3802_vm0, %v3801_v0  ;;  %3306 = vmatpush3.bf16.msra.mxu0 %v4290_v59 }
0x242e   :  { %3307 = vmatprep.subr.bf16.mxu0 %v3801_v0 }
0x2431   :  { %3308 = vmatpush3.bf16.msra.mxu0 %v4297_v7 }
0x2432   :  { %3319 = vmatprep.subr.bf16.mxu0 %v3801_v0 }
0x24ff   :  { %v1423_v53 = vpop.f32.mrb[36].mxu0 }
0x2500   :  { %v1429_v55 = vadd.f32 %v1423_v53, %v951_v52  ;;  %v3295_v60 = vpop.f32.mrb[37].mxu0 }
0x2501   :  { %v1426_v5 = vpop.f32.mrb[38].mxu0 }
0x2502   :  { %3608 = vtanh.f32 %v1429_v55  ;;  %v3296_v51 = vpop.f32.mrb[39].mxu0  ;;  %v1430_v54 = vmul.f32 0.5, %v1429_v55  ;;  %v4347_v5 = vld [vmem:[%s4642_s11] sm:$0xff]  }
0x2503   :  { %v4353_v51 = vld [vmem:[%s4642_s11 + $0x8] sm:$0xff]  }
0x2504   :  { %3610 = vtanh.f32 %v1430_v54  ;;  %v4368_v54 = vld [vmem:[%s4641_s10 + $0x8] sm:$0xff]  }
0x250c   :  { %v3609_v61 = vpop.eup %3608 }
0x250d   :  { %1437 = vrot.lane.b32.xlu1 %v3609_v61, %s3804_s25  ;;  %v4362_v61 = vld [vmem:[%s4641_s10] sm:$0xff]  }
0x250e   :  { %v3611_v42 = vpop.eup %3610 }
0x250f   :  { %v1432_v11 = vmul.f32 0.5, %v3611_v42 }
0x2511   :  { %v1433_v62 = vadd.f32 0.5, %v1432_v11 }
0x2513   :  { %v1435_v10 = vmul.f32 %v1433_v62, %v1375_v48 }
0x257f   :  { %v1438_v63 = vpop.permute.xlu1 %1437 }
0x2580   :  { %v1440_v2 = vmul.f32 %v1438_v63, %v1433_v62 }
0x2582   :  { %1442 = vrot.lane.b32.xlu0 %v1440_v2, %s3805_s3 }
0x25f4   :  { %v1443_v13 = vpop.permute.xlu0 %1442 }
0x25f5   :  { %v4299_v15 = vadd.f32 %v1443_v13, %v1435_v10 }
0x25f7   :  { %3612 = vtanh.f32 %v4299_v15 }
0x2601   :  { %v3613_v16 = vpop.eup %3612 }
0x2602   :  { %1448 = vrot.lane.b32.xlu1 %v3613_v16, %s3804_s25 }
0x2606   :  { %1545 = vrot.lane.b32.xlu1 %v835_v17, %s3805_s3 }
0x2674   :  { %v1449_v9 = vpop.permute.xlu1 %1448 }
0x2675   :  { %v1451_v3 = vmul.f32 %v1449_v9, %v1433_v62 }
0x2677   :  { %v1452_v19 = vpack.c.bf16 %v1451_v3, %v1451_v3 }
0x2678   :  { %v1546_v20 = vpop.permute.xlu1 %1545 }
0x2679   :  { %1454 = vrot.lane.b32.xlu0 %v1452_v19, %s3805_s3  ;;  %3310 = vmatmul.mubr.msk.bf16.vlgmr.msra.gmra.mrb[40].mxu0 %vm243_vm3, %v1546_v20  ;;  %v4392_v19 = vld [vmem:[#allocation10] ss:$0 sm:$0xff] }
0x267a   :  { %3323 = vmatprep.mubr.msk.bf16.mxu0 %vm3802_vm0, %v3801_v0  ;;  %3320 = vmatpush3.bf16.msra.mxu0 %v4347_v5 }
0x267b   :  { %3321 = vmatprep.subr.bf16.mxu0 %v3801_v0 }
0x267e   :  { %3322 = vmatpush3.bf16.msra.mxu0 %v4353_v51 }
0x267f   :  { %3335 = vmatprep.subr.bf16.mxu0 %v3801_v0 }
0x26eb   :  { %v1455_v6 = vpop.permute.xlu0 %1454 }
0x26ec   :  { %3302 = vmatmul.mubr.msk.bf16.vlgmr.msra.gmra.mrb[36].mxu1 %vm243_vm3, %v1455_v6 }
0x26ed   :  { %3314 = vmatpush3.bf16.msra.mxu1 %v4313_v28  ;;  %3315 = vmatprep.mubr.msk.bf16.mxu1 %vm3802_vm0, %v3801_v0 }
0x26ee   :  { %3327 = vmatprep.subr.bf16.mxu1 %v3801_v0 }
0x26f4   :  { %3316 = vmatmul.mubr.msk.bf16.vlgmr.msra.gmra.mrb[40].mxu1 %vm149_vm2, %v1543_v14 }
0x26f5   :  { %3331 = vmatprep.mubr.msk.bf16.mxu1 %vm3802_vm0, %v3801_v0  ;;  %3328 = vmatpush3.bf16.msra.mxu1 %v4362_v61 }
0x26f6   :  { %3329 = vmatprep.subr.bf16.mxu1 %v3801_v0 }
0x26f9   :  { %3330 = vmatpush3.bf16.msra.mxu1 %v4368_v54 }
0x26fa   :  { %3343 = vmatprep.subr.bf16.mxu1 %v3801_v0 }
0x274c   :  { %v1596_v23 = vpop.f32.mrb[40].mxu0 }
0x274d   :  { %v3311_v24 = vpop.f32.mrb[41].mxu0 }
0x274e   :  { %v1599_v26 = vpop.f32.mrb[42].mxu0 }
0x274f   :  { %v3312_v27 = vpop.f32.mrb[43].mxu0 }
0x27bf   :  { %v1493_v29 = vpop.f32.mrb[36].mxu1 }
0x27c0   :  { %v1499_v30 = vadd.f32 %v1493_v29, %v954_v8  ;;  %v3303_v32 = vpop.f32.mrb[37].mxu1 }
0x27c1   :  { %v1496_v33 = vpop.f32.mrb[38].mxu1 }
0x27c2   :  { %3614 = vtanh.f32 %v1499_v30  ;;  %v3304_v34 = vpop.f32.mrb[39].mxu1  ;;  %v1500_v58 = vmul.f32 0.5, %v1499_v30 }
0x27c7   :  { %v1642_v36 = vpop.f32.mrb[40].mxu1 }
0x27c8   :  { %v1643_v37 = vadd.f32 %v1642_v36, %v1596_v23  ;;  %v3317_v38 = vpop.f32.mrb[41].mxu1 }
0x27c9   :  { %v1645_v12 = vpop.f32.mrb[42].mxu1 }
0x27ca   :  { %v1654_v39 = vadd.f32 %v4328_v35, %v1643_v37  ;;  %v3318_v40 = vpop.f32.mrb[43].mxu1 }
0x27cc   :  { %v3615_v4 = vpop.eup %3614  ;;  %3616 = vtanh.f32 %v1654_v39  ;;  %v1655_v57 = vmul.f32 0.5, %v1654_v39 }
0x27cd   :  { %1507 = vrot.lane.b32.xlu0 %v3615_v4, %s3804_s25  ;;  %3618 = vtanh.f32 %v1500_v58  ;;  %v4404_v4 = vld [vmem:[%s4644_s13] sm:$0xff]  }
0x27ce   :  { %3620 = vtanh.f32 %v1655_v57 }
0x27d6   :  { %v3617_v18 = vpop.eup %3616 }
0x27d7   :  { %1662 = vrot.lane.b32.xlu1 %v3617_v18, %s3804_s25  ;;  %v3619_v41 = vpop.eup %3618  ;;  %v4410_v18 = vld [vmem:[%s4644_s13 + $0x8] sm:$0xff]  }
0x27d8   :  { %v1502_v43 = vmul.f32 0.5, %v3619_v41  ;;  %v3621_v45 = vpop.eup %3620 }
0x27d9   :  { %v1657_v25 = vmul.f32 0.5, %v3621_v45 }
0x27da   :  { %v1503_v44 = vadd.f32 0.5, %v1502_v43 }
0x27db   :  { %v1658_v48 = vadd.f32 0.5, %v1657_v25 }
0x27dc   :  { %v1505_v31 = vmul.f32 %v1503_v44, %v4299_v15 }
0x27dd   :  { %v1660_v52 = vmul.f32 %v1658_v48, %v4189_v47 }
0x283f   :  { %v1508_v1 = vpop.permute.xlu0 %1507 }
0x2840   :  { %v1510_v56 = vmul.f32 %v1508_v1, %v1503_v44  ;;  %v4432_v1 = vld [vmem:[%s4645_s14] ss:$0 sm:$0xff] }
0x2842   :  { %1512 = vrot.lane.b32.xlu0 %v1510_v56, %s3805_s3 }
0x2849   :  { %v1663_v46 = vpop.permute.xlu1 %1662 }
0x284a   :  { %v1665_v49 = vmul.f32 %v1663_v46, %v1658_v48 }
0x284c   :  { %1667 = vrot.lane.b32.xlu1 %v1665_v49, %s3805_s3 }
0x28b4   :  { %v1513_v21 = vpop.permute.xlu0 %1512 }
0x28b5   :  { %v4336_v50 = vadd.f32 %v1513_v21, %v1505_v31 }
0x28b7   :  { %3622 = vtanh.f32 %v4336_v50 }
0x28be   :  { %v1668_v53 = vpop.permute.xlu1 %1667 }
0x28bf   :  { %v4340_v55 = vadd.f32 %v1668_v53, %v1660_v52 }
0x28c1   :  { %v3623_v60 = vpop.eup %3622  ;;  %3624 = vtanh.f32 %v4340_v55 }
0x28c2   :  { %1518 = vrot.lane.b32.xlu0 %v3623_v60, %s3804_s25 }
0x28cb   :  { %v3625_v47 = vpop.eup %3624 }
0x28cc   :  { %1673 = vrot.lane.b32.xlu1 %v3625_v47, %s3804_s25 }
0x2934   :  { %v1519_v42 = vpop.permute.xlu0 %1518 }
0x2935   :  { %v1521_v11 = vmul.f32 %v1519_v42, %v1503_v44 }
0x2937   :  { %v1522_v62 = vpack.c.bf16 %v1521_v11, %v1521_v11 }
0x2939   :  { %1679 = vrot.lane.b32.xlu0 %v1522_v62, %s3805_s3 }
0x293e   :  { %v1674_v63 = vpop.permute.xlu1 %1673 }
0x293f   :  { %v1676_v2 = vmul.f32 %v1674_v63, %v1658_v48 }
0x2941   :  { %v1677_v10 = vpack.c.bf16 %v1676_v2, %v1676_v2 }
0x2943   :  { %1737 = vrot.lane.b32.xlu1 %v1677_v10, %s3805_s3 }
0x29ab   :  { %v1680_v13 = vpop.permute.xlu0 %1679 }
0x29ac   :  { %3324 = vmatmul.mubr.msk.bf16.vlgmr.msra.gmra.mrb[44].mxu0 %vm243_vm3, %v1680_v13 }
0x29ad   :  { %3339 = vmatprep.mubr.msk.bf16.mxu0 %vm3802_vm0, %v3801_v0  ;;  %3336 = vmatpush3.bf16.msra.mxu0 %v4404_v4 }
0x29ae   :  { %3337 = vmatprep.subr.bf16.mxu0 %v3801_v0 }
0x29b1   :  { %3338 = vmatpush3.bf16.msra.mxu0 %v4410_v18 }
0x29b2   :  { %3351 = vmatprep.subr.bf16.mxu0 %v3801_v0 }
0x29b5   :  { %v1738_v15 = vpop.permute.xlu1 %1737 }
0x29b6   :  { %3332 = vmatmul.mubr.msk.bf16.vlgmr.msra.gmra.mrb[44].mxu1 %vm243_vm3, %v1738_v15 }
0x29b7   :  { %3344 = vmatpush3.bf16.msra.mxu1 %v4290_v59  ;;  %3347 = vmatprep.mubr.msk.bf16.mxu1 %vm3802_vm0, %v3801_v0 }
0x29b8   :  { %3345 = vmatprep.subr.bf16.mxu1 %v3801_v0 }
0x29bb   :  { %3346 = vmatpush3.bf16.msra.mxu1 %v4297_v7 }
0x29bc   :  { %3357 = vmatprep.subr.bf16.mxu1 %v3801_v0 }
0x29be   :  { %3348 = vmatmul.mubr.msk.bf16.vlgmr.msra.gmra.mrb[48].mxu1 %vm243_vm3, %v1738_v15 }
0x29bf   :  { %3358 = vmatpush3.bf16.msra.mxu1 %v4347_v5  ;;  %3361 = vmatprep.mubr.msk.bf16.mxu1 %vm3802_vm0, %v3801_v0 }
0x29c0   :  { %3359 = vmatprep.subr.bf16.mxu1 %v3801_v0 }
0x29c3   :  { %3360 = vmatpush3.bf16.msra.mxu1 %v4353_v51 }
0x29c4   :  { %3373 = vmatprep.subr.bf16.mxu1 %v3801_v0 }
0x2a7f   :  { %v1730_v16 = vpop.f32.mrb[44].mxu0 }
0x2a80   :  { %v3325_v17 = vpop.f32.mrb[45].mxu0 }
0x2a81   :  { %v1733_v9 = vpop.f32.mrb[46].mxu0 }
0x2a82   :  { %v3326_v3 = vpop.f32.mrb[47].mxu0 }
0x2a89   :  { %v1788_v20 = vpop.f32.mrb[44].mxu1 }
0x2a8a   :  { %v1789_v22 = vadd.f32 %v1788_v20, %v1730_v16  ;;  %v3333_v6 = vpop.f32.mrb[45].mxu1 }
0x2a8b   :  { %v1791_v14 = vpop.f32.mrb[46].mxu1 }
0x2a8c   :  { %v1800_v23 = vadd.f32 %v4392_v19, %v1789_v22  ;;  %v3334_v24 = vpop.f32.mrb[47].mxu1 }
0x2a8e   :  { %3626 = vtanh.f32 %v1800_v23  ;;  %v1801_v32 = vmul.f32 0.5, %v1800_v23 }
0x2a90   :  { %3628 = vtanh.f32 %v1801_v32 }
0x2a91   :  { %v1924_v26 = vpop.f32.mrb[48].mxu1 }
0x2a92   :  { %v3349_v27 = vpop.f32.mrb[49].mxu1 }
0x2a93   :  { %v1927_v8 = vpop.f32.mrb[50].mxu1 }
0x2a94   :  { %v3350_v29 = vpop.f32.mrb[51].mxu1 }
0x2a98   :  { %v3627_v30 = vpop.eup %3626 }
0x2a99   :  { %1808 = vrot.lane.b32.xlu0 %v3627_v30, %s3804_s25 }
0x2a9a   :  { %v3629_v33 = vpop.eup %3628 }
0x2a9b   :  { %v1803_v34 = vmul.f32 0.5, %v3629_v33 }
0x2a9d   :  { %v1804_v36 = vadd.f32 0.5, %v1803_v34 }
0x2a9f   :  { %v1806_v12 = vmul.f32 %v1804_v36, %v4336_v50 }
0x2b0b   :  { %v1809_v37 = vpop.permute.xlu0 %1808 }
0x2b0c   :  { %v1811_v38 = vmul.f32 %v1809_v37, %v1804_v36 }
0x2b0e   :  { %1813 = vrot.lane.b32.xlu1 %v1811_v38, %s3805_s3 }
0x2b80   :  { %v1814_v39 = vpop.permute.xlu1 %1813 }
0x2b81   :  { %v4398_v40 = vadd.f32 %v1814_v39, %v1806_v12 }
0x2b83   :  { %3630 = vtanh.f32 %v4398_v40 }
0x2b8d   :  { %v3631_v58 = vpop.eup %3630 }
0x2b8e   :  { %1819 = vrot.lane.b32.xlu0 %v3631_v58, %s3804_s25 }
0x2c00   :  { %v1820_v57 = vpop.permute.xlu0 %1819 }
0x2c01   :  { %v1822_v41 = vmul.f32 %v1820_v57, %v1804_v36 }
0x2c03   :  { %v1823_v43 = vpack.c.bf16 %v1822_v41, %v1822_v41 }
0x2c05   :  { %1831 = vrot.lane.b32.xlu1 %v1823_v43, %s3805_s3 }
0x2c77   :  { %v1832_v44 = vpop.permute.xlu1 %1831 }
0x2c78   :  { %3340 = vmatmul.mubr.msk.bf16.vlgmr.msra.gmra.mrb[48].mxu0 %vm243_vm3, %v1832_v44  ;;  %3362 = vmatmul.mubr.msk.bf16.vlgmr.msra.gmra.mrb[52].mxu1 %vm243_vm3, %v1832_v44 }
0x2c79   :  { %3352 = vmatpush3.bf16.msra.mxu0 %v4313_v28  ;;  %3353 = vmatprep.mubr.msk.bf16.mxu0 %vm3802_vm0, %v3801_v0 }
0x2c7a   :  { %3365 = vmatprep.subr.bf16.mxu0 %v3801_v0  ;;  %3374 = vmatpush3.bf16.msra.mxu1 %v4404_v4 }
0x2c7b   :  { %3375 = vmatprep.subr.bf16.mxu1 %v3801_v0  ;;  %3377 = vmatprep.mubr.msk.bf16.mxu1 %vm3802_vm0, %v3801_v0 }
0x2c7e   :  { %3376 = vmatpush3.bf16.msra.mxu1 %v4410_v18 }
0x2c7f   :  { %3389 = vmatprep.subr.bf16.mxu1 %v3801_v0 }
0x2d4b   :  { %v1882_v56 = vpop.f32.mrb[48].mxu0  ;;  %v2031_v45 = vpop.f32.mrb[52].mxu1 }
0x2d4c   :  { %v1883_v25 = vadd.f32 %v4432_v1, %v1882_v56  ;;  %v3341_v48 = vpop.f32.mrb[49].mxu0  ;;  %v3363_v46 = vpop.f32.mrb[53].mxu1 }
0x2d4d   :  { %v1885_v49 = vpop.f32.mrb[50].mxu0  ;;  %v2034_v31 = vpop.f32.mrb[54].mxu1 }
0x2d4e   :  { %1888 = vst.msk [vmem:[%s4646_s15] sm:$0xff] %vm149_vm2, %v1883_v25  ;;  %v1889_v21 = vpack.c.bf16 %v1883_v25, %v1883_v25  ;;  %v3342_v50 = vpop.f32.mrb[51].mxu0  ;;  %v3364_v52 = vpop.f32.mrb[55].mxu1 }
0x2d50   :  { %3354 = vmatmul.mubr.msk.bf16.vlgmr.msra.gmra.mrb[52].mxu0 %vm149_vm2, %v1889_v21 }
0x2d51   :  { %3366 = vmatpush3.bf16.msra.mxu0 %v4362_v61  ;;  %3369 = vmatprep.mubr.msk.bf16.mxu0 %vm3802_vm0, %v3801_v0 }
0x2d52   :  { %3367 = vmatprep.subr.bf16.mxu0 %v3801_v0 }
0x2d55   :  { %3368 = vmatpush3.bf16.msra.mxu0 %v4368_v54 }
0x2d56   :  { %3381 = vmatprep.subr.bf16.mxu0 %v3801_v0 }
0x2e23   :  { %v1967_v53 = vpop.f32.mrb[52].mxu0 }
0x2e24   :  { %v1968_v60 = vadd.f32 %v1967_v53, %v1924_v26  ;;  %v3355_v47 = vpop.f32.mrb[53].mxu0 }
0x2e25   :  { %v1970_v42 = vpop.f32.mrb[54].mxu0 }
0x2e26   :  { %v1973_v11 = vadd.f32 %v4328_v35, %v1968_v60  ;;  %v3356_v62 = vpop.f32.mrb[55].mxu0 }
0x2e28   :  { %3632 = vtanh.f32 %v1973_v11  ;;  %v1974_v2 = vmul.f32 0.5, %v1973_v11 }
0x2e2a   :  { %3634 = vtanh.f32 %v1974_v2 }
0x2e32   :  { %v3633_v63 = vpop.eup %3632 }
0x2e33   :  { %1981 = vrot.lane.b32.xlu0 %v3633_v63, %s3804_s25 }
0x2e34   :  { %v3635_v10 = vpop.eup %3634 }
0x2e35   :  { %v1976_v13 = vmul.f32 0.5, %v3635_v10 }
0x2e37   :  { %v1977_v15 = vadd.f32 0.5, %v1976_v13 }
0x2e39   :  { %v1979_v9 = vmul.f32 %v1977_v15, %v4340_v55 }
0x2ea5   :  { %v1982_v16 = vpop.permute.xlu0 %1981 }
0x2ea6   :  { %v1984_v17 = vmul.f32 %v1982_v16, %v1977_v15 }
0x2ea8   :  { %1986 = vrot.lane.b32.xlu1 %v1984_v17, %s3805_s3 }
0x2f1a   :  { %v1987_v3 = vpop.permute.xlu1 %1986 }
0x2f1b   :  { %v4450_v20 = vadd.f32 %v1987_v3, %v1979_v9 }
0x2f1d   :  { %3636 = vtanh.f32 %v4450_v20 }
0x2f27   :  { %v3637_v22 = vpop.eup %3636 }
0x2f28   :  { %1992 = vrot.lane.b32.xlu0 %v3637_v22, %s3804_s25 }
0x2f9a   :  { %v1993_v6 = vpop.permute.xlu0 %1992 }
0x2f9b   :  { %v1995_v14 = vmul.f32 %v1993_v6, %v1977_v15 }
0x2f9d   :  { %v1996_v23 = vpack.c.bf16 %v1995_v14, %v1995_v14 }
0x2f9f   :  { %2038 = vrot.lane.b32.xlu1 %v1996_v23, %s3805_s3 }
0x3011   :  { %v2039_v24 = vpop.permute.xlu1 %2038 }
0x3012   :  { %3370 = vmatmul.mubr.msk.bf16.vlgmr.msra.gmra.mrb[56].mxu0 %vm243_vm3, %v2039_v24 }
0x3013   :  { %3382 = vmatpush3.bf16.msra.mxu0 %v4290_v59  ;;  %3385 = vmatprep.mubr.msk.bf16.mxu0 %vm3802_vm0, %v3801_v0 }
0x3014   :  { %3383 = vmatprep.subr.bf16.mxu0 %v3801_v0 }
0x3017   :  { %3384 = vmatpush3.bf16.msra.mxu0 %v4297_v7 }
0x3018   :  { %3395 = vmatprep.subr.bf16.mxu0 %v3801_v0 }
0x301a   :  { %3386 = vmatmul.mubr.msk.bf16.vlgmr.msra.gmra.mrb[60].mxu0 %vm243_vm3, %v2039_v24 }
0x301b   :  { %3396 = vmatpush3.bf16.msra.mxu0 %v4347_v5  ;;  %3399 = vmatprep.mubr.msk.bf16.mxu0 %vm3802_vm0, %v3801_v0 }
0x301c   :  { %3397 = vmatprep.subr.bf16.mxu0 %v3801_v0 }
0x301f   :  { %3398 = vmatpush3.bf16.msra.mxu0 %v4353_v51 }
0x3020   :  { %3411 = vmatprep.subr.bf16.mxu0 %v3801_v0 }
0x30e5   :  { %v2077_v55 = vpop.f32.mrb[56].mxu0 }
0x30e6   :  { %v2078_v26 = vadd.f32 %v2077_v55, %v2031_v45  ;;  %v3371_v27 = vpop.f32.mrb[57].mxu0 }
0x30e7   :  { %v2080_v8 = vpop.f32.mrb[58].mxu0 }
0x30e8   :  { %v2083_v29 = vadd.f32 %v4392_v19, %v2078_v26  ;;  %v3372_v30 = vpop.f32.mrb[59].mxu0 }
0x30ea   :  { %3638 = vtanh.f32 %v2083_v29  ;;  %v2084_v38 = vmul.f32 0.5, %v2083_v29 }
0x30ec   :  { %3640 = vtanh.f32 %v2084_v38 }
0x30ed   :  { %v2189_v32 = vpop.f32.mrb[60].mxu0 }
0x30ee   :  { %v3387_v33 = vpop.f32.mrb[61].mxu0 }
0x30ef   :  { %v2192_v34 = vpop.f32.mrb[62].mxu0 }
0x30f0   :  { %v3388_v36 = vpop.f32.mrb[63].mxu0 }
0x30f4   :  { %v3639_v37 = vpop.eup %3638 }
0x30f5   :  { %2091 = vrot.lane.b32.xlu0 %v3639_v37, %s3804_s25 }
0x30f6   :  { %v3641_v12 = vpop.eup %3640 }
0x30f7   :  { %v2086_v39 = vmul.f32 0.5, %v3641_v12 }
0x30f9   :  { %v2087_v58 = vadd.f32 0.5, %v2086_v39 }
0x30fb   :  { %v2089_v43 = vmul.f32 %v2087_v58, %v4398_v40 }
0x3167   :  { %v2092_v57 = vpop.permute.xlu0 %2091 }
0x3168   :  { %v2094_v41 = vmul.f32 %v2092_v57, %v2087_v58 }
0x316a   :  { %2096 = vrot.lane.b32.xlu1 %v2094_v41, %s3805_s3 }
0x31dc   :  { %v2097_v44 = vpop.permute.xlu1 %2096 }
0x31dd   :  { %v4473_v56 = vadd.f32 %v2097_v44, %v2089_v43 }
0x31df   :  { %3642 = vtanh.f32 %v4473_v56 }
0x31e9   :  { %v3643_v45 = vpop.eup %3642 }
0x31ea   :  { %2102 = vrot.lane.b32.xlu0 %v3643_v45, %s3804_s25 }
0x325c   :  { %v2103_v25 = vpop.permute.xlu0 %2102 }
0x325d   :  { %v2105_v48 = vmul.f32 %v2103_v25, %v2087_v58 }
0x325f   :  { %v2106_v46 = vpack.c.bf16 %v2105_v48, %v2105_v48 }
0x3261   :  { %2108 = vrot.lane.b32.xlu1 %v2106_v46, %s3805_s3 }
0x32d3   :  { %v2109_v49 = vpop.permute.xlu1 %2108 }
0x32d4   :  { %3378 = vmatmul.mubr.msk.bf16.vlgmr.msra.gmra.mrb[56].mxu1 %vm243_vm3, %v2109_v49  ;;  %3400 = vmatmul.mubr.msk.bf16.vlgmr.msra.gmra.mrb[64].mxu0 %vm243_vm3, %v2109_v49 }
0x32d5   :  { %3390 = vmatpush3.bf16.msra.mxu1 %v4313_v28  ;;  %3391 = vmatprep.mubr.msk.bf16.mxu1 %vm3802_vm0, %v3801_v0 }
0x32d6   :  { %3403 = vmatprep.subr.bf16.mxu1 %v3801_v0  ;;  %3412 = vmatpush3.bf16.msra.mxu0 %v4404_v4 }
0x32d7   :  { %3413 = vmatprep.subr.bf16.mxu0 %v3801_v0  ;;  %3415 = vmatprep.mubr.msk.bf16.mxu0 %vm3802_vm0, %v3801_v0 }
0x32da   :  { %3414 = vmatpush3.bf16.msra.mxu0 %v4410_v18 }
0x32db   :  { %3427 = vmatprep.subr.bf16.mxu0 %v3801_v0 }
0x33a7   :  { %v2147_v40 = vpop.f32.mrb[56].mxu1  ;;  %v2296_v31 = vpop.f32.mrb[64].mxu0 }
0x33a8   :  { %v2148_v21 = vadd.f32 %v4432_v1, %v2147_v40  ;;  %v3379_v50 = vpop.f32.mrb[57].mxu1  ;;  %v3401_v52 = vpop.f32.mrb[65].mxu0 }
0x33a9   :  { %v2150_v53 = vpop.f32.mrb[58].mxu1  ;;  %v2299_v60 = vpop.f32.mrb[66].mxu0 }
0x33aa   :  { %2153 = vst.msk [vmem:[%s4646_s15 + $0x8] sm:$0xff] %vm149_vm2, %v2148_v21  ;;  %v2154_v47 = vpack.c.bf16 %v2148_v21, %v2148_v21  ;;  %v3380_v42 = vpop.f32.mrb[59].mxu1  ;;  %v3402_v11 = vpop.f32.mrb[67].mxu0 }
0x33ac   :  { %3392 = vmatmul.mubr.msk.bf16.vlgmr.msra.gmra.mrb[60].mxu1 %vm149_vm2, %v2154_v47 }
0x33ad   :  { %3404 = vmatpush3.bf16.msra.mxu1 %v4362_v61  ;;  %3407 = vmatprep.mubr.msk.bf16.mxu1 %vm3802_vm0, %v3801_v0 }
0x33ae   :  { %3405 = vmatprep.subr.bf16.mxu1 %v3801_v0 }
0x33b1   :  { %3406 = vmatpush3.bf16.msra.mxu1 %v4368_v54 }
0x33b2   :  { %3419 = vmatprep.subr.bf16.mxu1 %v3801_v0 }
0x347f   :  { %v2232_v62 = vpop.f32.mrb[60].mxu1 }
0x3480   :  { %v2233_v63 = vadd.f32 %v2232_v62, %v2189_v32  ;;  %v3393_v2 = vpop.f32.mrb[61].mxu1 }
0x3481   :  { %v2235_v10 = vpop.f32.mrb[62].mxu1 }
0x3482   :  { %v2238_v13 = vadd.f32 %v4328_v35, %v2233_v63  ;;  %v3394_v15 = vpop.f32.mrb[63].mxu1 }
0x3484   :  { %3644 = vtanh.f32 %v2238_v13  ;;  %v2239_v17 = vmul.f32 0.5, %v2238_v13 }
0x3486   :  { %3646 = vtanh.f32 %v2239_v17 }
0x348e   :  { %v3645_v16 = vpop.eup %3644 }
0x348f   :  { %2246 = vrot.lane.b32.xlu0 %v3645_v16, %s3804_s25 }
0x3490   :  { %v3647_v9 = vpop.eup %3646 }
0x3491   :  { %v2241_v3 = vmul.f32 0.5, %v3647_v9 }
0x3493   :  { %v2242_v22 = vadd.f32 0.5, %v2241_v3 }
0x3495   :  { %v2244_v23 = vmul.f32 %v2242_v22, %v4450_v20 }
0x3501   :  { %v2247_v6 = vpop.permute.xlu0 %2246 }
0x3502   :  { %v2249_v14 = vmul.f32 %v2247_v6, %v2242_v22 }
0x3504   :  { %2251 = vrot.lane.b32.xlu1 %v2249_v14, %s3805_s3 }
0x3576   :  { %v2252_v24 = vpop.permute.xlu1 %2251 }
0x3577   :  { %v4506_v55 = vadd.f32 %v2252_v24, %v2244_v23 }
0x3579   :  { %3648 = vtanh.f32 %v4506_v55 }
0x3583   :  { %v3649_v26 = vpop.eup %3648 }
0x3584   :  { %2257 = vrot.lane.b32.xlu0 %v3649_v26, %s3804_s25 }
0x35f6   :  { %v2258_v27 = vpop.permute.xlu0 %2257 }
0x35f7   :  { %v2260_v8 = vmul.f32 %v2258_v27, %v2242_v22 }
0x35f9   :  { %v2261_v29 = vpack.c.bf16 %v2260_v8, %v2260_v8 }
0x35fb   :  { %2303 = vrot.lane.b32.xlu1 %v2261_v29, %s3805_s3 }
0x366d   :  { %v2304_v30 = vpop.permute.xlu1 %2303 }
0x366e   :  { %3408 = vmatmul.mubr.msk.bf16.vlgmr.msra.gmra.mrb[64].mxu1 %vm243_vm3, %v2304_v30 }
0x366f   :  { %3420 = vmatpush3.bf16.msra.mxu1 %v4290_v59  ;;  %3423 = vmatprep.mubr.msk.bf16.mxu1 %vm3802_vm0, %v3801_v0 }
0x3670   :  { %3421 = vmatprep.subr.bf16.mxu1 %v3801_v0 }
0x3673   :  { %3422 = vmatpush3.bf16.msra.mxu1 %v4297_v7 }
0x3674   :  { %3433 = vmatprep.subr.bf16.mxu1 %v3801_v0 }
0x3676   :  { %3424 = vmatmul.mubr.msk.bf16.vlgmr.msra.gmra.mrb[68].mxu1 %vm243_vm3, %v2304_v30 }
0x3677   :  { %3434 = vmatpush3.bf16.msra.mxu1 %v4347_v5  ;;  %3437 = vmatprep.mubr.msk.bf16.mxu1 %vm3802_vm0, %v3801_v0 }
0x3678   :  { %3435 = vmatprep.subr.bf16.mxu1 %v3801_v0 }
0x367b   :  { %3436 = vmatpush3.bf16.msra.mxu1 %v4353_v51 }
0x367c   :  { %3449 = vmatprep.subr.bf16.mxu1 %v3801_v0 }
0x3741   :  { %v2342_v20 = vpop.f32.mrb[64].mxu1 }
0x3742   :  { %v2343_v32 = vadd.f32 %v2342_v20, %v2296_v31  ;;  %v3409_v33 = vpop.f32.mrb[65].mxu1 }
0x3743   :  { %v2345_v34 = vpop.f32.mrb[66].mxu1 }
0x3744   :  { %v2348_v36 = vadd.f32 %v4392_v19, %v2343_v32  ;;  %v3410_v37 = vpop.f32.mrb[67].mxu1 }
0x3746   :  { %3650 = vtanh.f32 %v2348_v36  ;;  %v2349_v41 = vmul.f32 0.5, %v2348_v36 }
0x3748   :  { %3652 = vtanh.f32 %v2349_v41 }
0x3749   :  { %v2454_v38 = vpop.f32.mrb[68].mxu1 }
0x374a   :  { %v3425_v12 = vpop.f32.mrb[69].mxu1 }
0x374b   :  { %v2457_v39 = vpop.f32.mrb[70].mxu1 }
0x374c   :  { %v3426_v58 = vpop.f32.mrb[71].mxu1 }
0x3750   :  { %v3651_v57 = vpop.eup %3650 }
0x3751   :  { %2356 = vrot.lane.b32.xlu0 %v3651_v57, %s3804_s25 }
0x3752   :  { %v3653_v43 = vpop.eup %3652 }
0x3753   :  { %v2351_v44 = vmul.f32 0.5, %v3653_v43 }
0x3755   :  { %v2352_v45 = vadd.f32 0.5, %v2351_v44 }
0x3757   :  { %v2354_v46 = vmul.f32 %v2352_v45, %v4473_v56 }
0x37c3   :  { %v2357_v25 = vpop.permute.xlu0 %2356 }
0x37c4   :  { %v2359_v48 = vmul.f32 %v2357_v25, %v2352_v45 }
0x37c6   :  { %2361 = vrot.lane.b32.xlu1 %v2359_v48, %s3805_s3 }
0x3838   :  { %v2362_v49 = vpop.permute.xlu1 %2361 }
0x3839   :  { %v4529_v40 = vadd.f32 %v2362_v49, %v2354_v46 }
0x383b   :  { %3654 = vtanh.f32 %v4529_v40 }
0x3845   :  { %v3655_v31 = vpop.eup %3654 }
0x3846   :  { %2367 = vrot.lane.b32.xlu0 %v3655_v31, %s3804_s25 }
0x38b8   :  { %v2368_v21 = vpop.permute.xlu0 %2367 }
0x38b9   :  { %v2370_v50 = vmul.f32 %v2368_v21, %v2352_v45 }
0x38bb   :  { %v2371_v52 = vpack.c.bf16 %v2370_v50, %v2370_v50 }
0x38bd   :  { %2373 = vrot.lane.b32.xlu1 %v2371_v52, %s3805_s3 }
0x392f   :  { %v2374_v53 = vpop.permute.xlu1 %2373 }
0x3930   :  { %3416 = vmatmul.mubr.msk.bf16.vlgmr.msra.gmra.mrb[68].mxu0 %vm243_vm3, %v2374_v53  ;;  %3438 = vmatmul.mubr.msk.bf16.vlgmr.msra.gmra.mrb[72].mxu1 %vm243_vm3, %v2374_v53 }
0x3931   :  { %3428 = vmatpush3.bf16.msra.mxu0 %v4313_v28  ;;  %3429 = vmatprep.mubr.msk.bf16.mxu0 %vm3802_vm0, %v3801_v0 }
0x3932   :  { %3441 = vmatprep.subr.bf16.mxu0 %v3801_v0  ;;  %3450 = vmatpush3.bf16.msra.mxu1 %v4404_v4 }
0x3933   :  { %3451 = vmatprep.subr.bf16.mxu1 %v3801_v0  ;;  %3453 = vmatprep.mubr.msk.bf16.mxu1 %vm3802_vm0, %v3801_v0 }
0x3936   :  { %3452 = vmatpush3.bf16.msra.mxu1 %v4410_v18 }
0x3937   :  { %3465 = vmatprep.subr.bf16.mxu1 %v3801_v0 }
0x3a03   :  { %v2412_v56 = vpop.f32.mrb[68].mxu0  ;;  %v2561_v60 = vpop.f32.mrb[72].mxu1 }
0x3a04   :  { %v2413_v47 = vadd.f32 %v4432_v1, %v2412_v56  ;;  %v3417_v42 = vpop.f32.mrb[69].mxu0  ;;  %v3439_v11 = vpop.f32.mrb[73].mxu1 }
0x3a05   :  { %v2415_v62 = vpop.f32.mrb[70].mxu0  ;;  %v2564_v63 = vpop.f32.mrb[74].mxu1 }
0x3a06   :  { %2418 = vst.msk [vmem:[%s4646_s15 + $0x10] sm:$0xff] %vm149_vm2, %v2413_v47  ;;  %v2419_v2 = vpack.c.bf16 %v2413_v47, %v2413_v47  ;;  %v3418_v10 = vpop.f32.mrb[71].mxu0  ;;  %v3440_v13 = vpop.f32.mrb[75].mxu1 }
0x3a08   :  { %3430 = vmatmul.mubr.msk.bf16.vlgmr.msra.gmra.mrb[72].mxu0 %vm149_vm2, %v2419_v2 }
0x3a09   :  { %3442 = vmatpush3.bf16.msra.mxu0 %v4362_v61  ;;  %3445 = vmatprep.mubr.msk.bf16.mxu0 %vm3802_vm0, %v3801_v0 }
0x3a0a   :  { %3443 = vmatprep.subr.bf16.mxu0 %v3801_v0 }
0x3a0d   :  { %3444 = vmatpush3.bf16.msra.mxu0 %v4368_v54 }
0x3a0e   :  { %3457 = vmatprep.subr.bf16.mxu0 %v3801_v0 }
0x3adb   :  { %v2497_v15 = vpop.f32.mrb[72].mxu0 }
0x3adc   :  { %v2498_v16 = vadd.f32 %v2497_v15, %v2454_v38  ;;  %v3431_v17 = vpop.f32.mrb[73].mxu0 }
0x3add   :  { %v2500_v9 = vpop.f32.mrb[74].mxu0 }
0x3ade   :  { %v2503_v3 = vadd.f32 %v4328_v35, %v2498_v16  ;;  %v3432_v22 = vpop.f32.mrb[75].mxu0 }
0x3ae0   :  { %3656 = vtanh.f32 %v2503_v3  ;;  %v2504_v14 = vmul.f32 0.5, %v2503_v3 }
0x3ae2   :  { %3658 = vtanh.f32 %v2504_v14 }
0x3aea   :  { %v3657_v6 = vpop.eup %3656 }
0x3aeb   :  { %2511 = vrot.lane.b32.xlu0 %v3657_v6, %s3804_s25 }
0x3aec   :  { %v3659_v23 = vpop.eup %3658 }
0x3aed   :  { %v2506_v24 = vmul.f32 0.5, %v3659_v23 }
0x3aef   :  { %v2507_v26 = vadd.f32 0.5, %v2506_v24 }
0x3af1   :  { %v2509_v29 = vmul.f32 %v2507_v26, %v4506_v55 }
0x3b5d   :  { %v2512_v27 = vpop.permute.xlu0 %2511 }
0x3b5e   :  { %v2514_v8 = vmul.f32 %v2512_v27, %v2507_v26 }
0x3b60   :  { %2516 = vrot.lane.b32.xlu1 %v2514_v8, %s3805_s3 }
0x3bd2   :  { %v2517_v30 = vpop.permute.xlu1 %2516 }
0x3bd3   :  { %v4562_v20 = vadd.f32 %v2517_v30, %v2509_v29 }
0x3bd5   :  { %3660 = vtanh.f32 %v4562_v20 }
0x3bdf   :  { %v3661_v32 = vpop.eup %3660 }
0x3be0   :  { %2522 = vrot.lane.b32.xlu0 %v3661_v32, %s3804_s25 }
0x3c52   :  { %v2523_v33 = vpop.permute.xlu0 %2522 }
0x3c53   :  { %v2525_v34 = vmul.f32 %v2523_v33, %v2507_v26 }
0x3c55   :  { %v2526_v36 = vpack.c.bf16 %v2525_v34, %v2525_v34 }
0x3c57   :  { %2568 = vrot.lane.b32.xlu1 %v2526_v36, %s3805_s3 }
0x3cc9   :  { %v2569_v37 = vpop.permute.xlu1 %2568 }
0x3cca   :  { %3446 = vmatmul.mubr.msk.bf16.vlgmr.msra.gmra.mrb[76].mxu0 %vm243_vm3, %v2569_v37 }
0x3ccb   :  { %3458 = vmatpush3.bf16.msra.mxu0 %v4290_v59  ;;  %3461 = vmatprep.mubr.msk.bf16.mxu0 %vm3802_vm0, %v3801_v0 }
0x3ccc   :  { %3459 = vmatprep.subr.bf16.mxu0 %v3801_v0 }
0x3ccf   :  { %3460 = vmatpush3.bf16.msra.mxu0 %v4297_v7 }
0x3cd0   :  { %3471 = vmatprep.subr.bf16.mxu0 %v3801_v0 }
0x3cd2   :  { %3462 = vmatmul.mubr.msk.bf16.vlgmr.msra.gmra.mrb[80].mxu0 %vm243_vm3, %v2569_v37 }
0x3cd3   :  { %3472 = vmatpush3.bf16.msra.mxu0 %v4347_v5  ;;  %3475 = vmatprep.mubr.msk.bf16.mxu0 %vm3802_vm0, %v3801_v0 }
0x3cd4   :  { %3473 = vmatprep.subr.bf16.mxu0 %v3801_v0 }
0x3cd7   :  { %3474 = vmatpush3.bf16.msra.mxu0 %v4353_v51 }
0x3cd8   :  { %3487 = vmatprep.subr.bf16.mxu0 %v3801_v0 }
0x3d9d   :  { %v2607_v59 = vpop.f32.mrb[76].mxu0 }
0x3d9e   :  { %v2608_v55 = vadd.f32 %v2607_v59, %v2561_v60  ;;  %v3447_v38 = vpop.f32.mrb[77].mxu0 }
0x3d9f   :  { %v2610_v12 = vpop.f32.mrb[78].mxu0 }
0x3da0   :  { %v2613_v7 = vadd.f32 %v4392_v19, %v2608_v55  ;;  %v3448_v39 = vpop.f32.mrb[79].mxu0 }
0x3da2   :  { %3662 = vtanh.f32 %v2613_v7  ;;  %v2614_v44 = vmul.f32 0.5, %v2613_v7 }
0x3da4   :  { %3664 = vtanh.f32 %v2614_v44 }
0x3da5   :  { %v2719_v58 = vpop.f32.mrb[80].mxu0 }
0x3da6   :  { %v3463_v57 = vpop.f32.mrb[81].mxu0 }
0x3da7   :  { %v2722_v5 = vpop.f32.mrb[82].mxu0 }
0x3da8   :  { %v3464_v41 = vpop.f32.mrb[83].mxu0 }
0x3dac   :  { %v3663_v43 = vpop.eup %3662 }
0x3dad   :  { %2621 = vrot.lane.b32.xlu0 %v3663_v43, %s3804_s25 }
0x3dae   :  { %v3665_v51 = vpop.eup %3664 }
0x3daf   :  { %v2616_v45 = vmul.f32 0.5, %v3665_v51 }
0x3db1   :  { %v2617_v25 = vadd.f32 0.5, %v2616_v45 }
0x3db3   :  { %v2619_v49 = vmul.f32 %v2617_v25, %v4529_v40 }
0x3e1f   :  { %v2622_v48 = vpop.permute.xlu0 %2621 }
0x3e20   :  { %v2624_v46 = vmul.f32 %v2622_v48, %v2617_v25 }
0x3e22   :  { %2626 = vrot.lane.b32.xlu1 %v2624_v46, %s3805_s3 }
0x3e94   :  { %v2627_v31 = vpop.permute.xlu1 %2626 }
0x3e95   :  { %v4585_v21 = vadd.f32 %v2627_v31, %v2619_v49 }
0x3e97   :  { %3666 = vtanh.f32 %v4585_v21 }
0x3ea1   :  { %v3667_v50 = vpop.eup %3666 }
0x3ea2   :  { %2632 = vrot.lane.b32.xlu0 %v3667_v50, %s3804_s25 }
0x3f14   :  { %v2633_v52 = vpop.permute.xlu0 %2632 }
0x3f15   :  { %v2635_v53 = vmul.f32 %v2633_v52, %v2617_v25 }
0x3f17   :  { %v2636_v56 = vpack.c.bf16 %v2635_v53, %v2635_v53 }
0x3f19   :  { %2638 = vrot.lane.b32.xlu1 %v2636_v56, %s3805_s3 }
0x3f8b   :  { %v2639_v60 = vpop.permute.xlu1 %2638 }
0x3f8c   :  { %3454 = vmatmul.mubr.msk.bf16.vlgmr.msra.gmra.mrb[76].mxu1 %vm243_vm3, %v2639_v60  ;;  %3476 = vmatmul.mubr.msk.bf16.vlgmr.msra.gmra.mrb[84].mxu0 %vm243_vm3, %v2639_v60 }
0x3f8d   :  { %3466 = vmatpush3.bf16.msra.mxu1 %v4313_v28  ;;  %3467 = vmatprep.mubr.msk.bf16.mxu1 %vm3802_vm0, %v3801_v0 }
0x3f8e   :  { %3479 = vmatprep.subr.bf16.mxu1 %v3801_v0  ;;  %3488 = vmatpush3.bf16.msra.mxu0 %v4404_v4 }
0x3f8f   :  { %3489 = vmatprep.subr.bf16.mxu0 %v3801_v0  ;;  %3491 = vmatprep.mubr.msk.bf16.mxu0 %vm3802_vm0, %v3801_v0 }
0x3f92   :  { %3490 = vmatpush3.bf16.msra.mxu0 %v4410_v18 }
0x405f   :  { %v2677_v40 = vpop.f32.mrb[76].mxu1  ;;  %v2826_v47 = vpop.f32.mrb[84].mxu0 }
0x4060   :  { %v2678_v42 = vadd.f32 %v4432_v1, %v2677_v40  ;;  %v3455_v11 = vpop.f32.mrb[77].mxu1  ;;  %v3477_v28 = vpop.f32.mrb[85].mxu0 }
0x4061   :  { %v2680_v62 = vpop.f32.mrb[78].mxu1  ;;  %v2829_v63 = vpop.f32.mrb[86].mxu0 }
0x4062   :  { %2683 = vst.msk [vmem:[%s4646_s15 + $0x18] sm:$0xff] %vm149_vm2, %v2678_v42  ;;  %v2684_v4 = vpack.c.bf16 %v2678_v42, %v2678_v42  ;;  %v3456_v2 = vpop.f32.mrb[79].mxu1  ;;  %v3478_v10 = vpop.f32.mrb[87].mxu0 }
0x4064   :  { %3468 = vmatmul.mubr.msk.bf16.vlgmr.msra.gmra.mrb[80].mxu1 %vm149_vm2, %v2684_v4 }
0x4065   :  { %3480 = vmatpush3.bf16.msra.mxu1 %v4362_v61  ;;  %3483 = vmatprep.mubr.msk.bf16.mxu1 %vm3802_vm0, %v3801_v0 }
0x4066   :  { %3481 = vmatprep.subr.bf16.mxu1 %v3801_v0 }
0x4069   :  { %3482 = vmatpush3.bf16.msra.mxu1 %v4368_v54 }
0x4137   :  { %v2762_v18 = vpop.f32.mrb[80].mxu1 }
0x4138   :  { %v2763_v13 = vadd.f32 %v2762_v18, %v2719_v58  ;;  %v3469_v15 = vpop.f32.mrb[81].mxu1 }
0x4139   :  { %v2765_v16 = vpop.f32.mrb[82].mxu1 }
0x413a   :  { %v2768_v17 = vadd.f32 %v4328_v35, %v2763_v13  ;;  %v3470_v9 = vpop.f32.mrb[83].mxu1 }
0x413c   :  { %3668 = vtanh.f32 %v2768_v17  ;;  %v2769_v22 = vmul.f32 0.5, %v2768_v17 }
0x413e   :  { %3670 = vtanh.f32 %v2769_v22 }
0x4146   :  { %v3669_v3 = vpop.eup %3668 }
0x4147   :  { %2776 = vrot.lane.b32.xlu0 %v3669_v3, %s3804_s25 }
0x4148   :  { %v3671_v61 = vpop.eup %3670 }
0x4149   :  { %v2771_v6 = vmul.f32 0.5, %v3671_v61 }
0x414b   :  { %v2772_v14 = vadd.f32 0.5, %v2771_v6 }
0x414d   :  { %v2774_v54 = vmul.f32 %v2772_v14, %v4562_v20 }
0x41b9   :  { %v2777_v23 = vpop.permute.xlu0 %2776 }
0x41ba   :  { %v2779_v0 = vmul.f32 %v2777_v23, %v2772_v14 }
0x41bc   :  { %2781 = vrot.lane.b32.xlu1 %v2779_v0, %s3805_s3 }
0x422e   :  { %v2782_v24 = vpop.permute.xlu1 %2781 }
0x422f   :  { %v2784_v26 = vadd.f32 %v2782_v24, %v2774_v54 }
0x4231   :  { %3672 = vtanh.f32 %v2784_v26 }
0x423b   :  { %v3673_v35 = vpop.eup %3672 }
0x423c   :  { %2787 = vrot.lane.b32.xlu0 %v3673_v35, %s3804_s25 }
0x42ae   :  { %v2788_v27 = vpop.permute.xlu0 %2787 }
0x42af   :  { %v2790_v8 = vmul.f32 %v2788_v27, %v2772_v14 }
0x42b1   :  { %v2791_v29 = vpack.c.bf16 %v2790_v8, %v2790_v8 }
0x42b3   :  { %2833 = vrot.lane.b32.xlu1 %v2791_v29, %s3805_s3 }
0x4325   :  { %v2834_v30 = vpop.permute.xlu1 %2833 }
0x4326   :  { %3484 = vmatmul.mubr.msk.bf16.vlgmr.msra.gmra.mrb[84].mxu1 %vm243_vm3, %v2834_v30 }
0x43f9   :  { %v2872_v32 = vpop.f32.mrb[84].mxu1 }
0x43fa   :  { %v2873_v33 = vadd.f32 %v2872_v32, %v2826_v47  ;;  %v3485_v34 = vpop.f32.mrb[85].mxu1 }
0x43fb   :  { %v2875_v36 = vpop.f32.mrb[86].mxu1 }
0x43fc   :  { %v2878_v20 = vadd.f32 %v4392_v19, %v2873_v33  ;;  %v3486_v37 = vpop.f32.mrb[87].mxu1 }
0x43fe   :  { %3674 = vtanh.f32 %v2878_v20  ;;  %v2879_v55 = vmul.f32 0.5, %v2878_v20 }
0x4400   :  { %3676 = vtanh.f32 %v2879_v55 }
0x4408   :  { %v3675_v59 = vpop.eup %3674 }
0x4409   :  { %2886 = vrot.lane.b32.xlu0 %v3675_v59, %s3804_s25 }
0x440a   :  { %v3677_v38 = vpop.eup %3676 }
0x440b   :  { %v2881_v12 = vmul.f32 0.5, %v3677_v38 }
0x440d   :  { %v2882_v7 = vadd.f32 0.5, %v2881_v12 }
0x440f   :  { %v2884_v57 = vmul.f32 %v2882_v7, %v4585_v21 }
0x447b   :  { %v2887_v39 = vpop.permute.xlu0 %2886 }
0x447c   :  { %v2889_v58 = vmul.f32 %v2887_v39, %v2882_v7 }
0x447e   :  { %2891 = vrot.lane.b32.xlu1 %v2889_v58, %s3805_s3 }
0x44f0   :  { %v2892_v5 = vpop.permute.xlu1 %2891 }
0x44f1   :  { %v2894_v41 = vadd.f32 %v2892_v5, %v2884_v57 }
0x44f3   :  { %3678 = vtanh.f32 %v2894_v41 }
0x44fd   :  { %v3679_v19 = vpop.eup %3678 }
0x44fe   :  { %2897 = vrot.lane.b32.xlu0 %v3679_v19, %s3804_s25 }
0x4570   :  { %v2898_v43 = vpop.permute.xlu0 %2897 }
0x4571   :  { %v2900_v44 = vmul.f32 %v2898_v43, %v2882_v7 }
0x4573   :  { %v2901_v51 = vpack.c.bf16 %v2900_v44, %v2900_v44 }
0x4575   :  { %2903 = vrot.lane.b32.xlu1 %v2901_v51, %s3805_s3 }
0x45e7   :  { %v2904_v45 = vpop.permute.xlu1 %2903 }
0x45e8   :  { %3492 = vmatmul.mubr.msk.bf16.vlgmr.msra.gmra.mrb[88].mxu0 %vm243_vm3, %v2904_v45 }
0x46bb   :  { %v2942_v25 = vpop.f32.mrb[88].mxu0 }
0x46bc   :  { %v2943_v48 = vadd.f32 %v4432_v1, %v2942_v25  ;;  %v3493_v46 = vpop.f32.mrb[89].mxu0 }
0x46bd   :  { %v2945_v49 = vpop.f32.mrb[90].mxu0 }
0x46be   :  { %2948 = vst.msk [vmem:[%s4646_s15 + $0x20] sm:$0xff] %vm149_vm2, %v2943_v48  ;;  %v3494_v31 = vpop.f32.mrb[91].mxu0 }
0x46bf   :  { %2953 = vsyncpa [#allocation4], 1 }
0x46c0   :  { %2954 = vsyncpa [#allocation6], 1 }
0x46c1   :  { %2955 = vsyncpa [#allocation9], 1 }

</bundles_post_ra>
